<compile_context>
chip_gen: v6e
topology: v6e:2x2x1
jax: 0.10.0
libtpu: 0.0.40
codegen_flags: <defaults>
</compile_context>

<pallas_src>
import functools

import jax
import jax.numpy as jnp
from jax.experimental import pallas as pl
from jax.experimental.pallas import tpu as pltpu

BN_EPS = 1e-5


def _round_up(x: int, m: int) -> int:
    return (x + m - 1) // m * m


def head_kernel(feat_ref, w1_ref, p_ref, w2_ref, b2_ref,
                out_ref, h_scratch, sum_scratch, *, batch, eps):
    i = pl.program_id(0)
    nbt = pl.num_programs(0)
    tb = feat_ref.shape[0]

    @pl.when(i == 0)
    def _init():
        sum_scratch[...] = jnp.zeros_like(sum_scratch)

    # --- backbone tail: global average pool over spatial positions.
    # feat block is (TB, HW, C): channels ride the lane axis, pool = sublane reduce.
    feat = feat_ref[...].astype(jnp.float32)
    pooled = jnp.mean(feat, axis=1)                          # (TB, C) f32

    # --- Linear(2048, 512): bf16 MXU matmul, f32 accumulation.
    h = jnp.dot(pooled.astype(jnp.bfloat16), w1_ref[...],
                preferred_element_type=jnp.float32)
    h = h + p_ref[0:1, :]                                    # + b1  -> (TB, 512) f32

    # --- mask rows beyond the real batch (no host-side pad; partial last block
    #     data is unspecified, so use a select rather than a multiply).
    row = i * tb + jax.lax.broadcasted_iota(jnp.int32, (tb, 1), 0)
    hv = jnp.where(row < batch, h, 0.0)

    # --- BatchNorm1d statistics: only the sum is streamed; variance is
    #     computed two-pass in finalize from the resident activations.
    sum_scratch[...] += jnp.sum(hv, axis=0, keepdims=True)

    if tb == h_scratch.shape[0]:                             # single batch tile
        h_scratch[...] = hv.astype(h_scratch.dtype)
    else:                                                    # tb is a multiple of 8
        start = pl.multiple_of(i * tb, tb)
        h_scratch[pl.ds(start, tb), :] = hv.astype(h_scratch.dtype)

    @pl.when(i == nbt - 1)
    def _finalize():
        inv_n = 1.0 / batch
        mu = sum_scratch[...] * inv_n                        # (1, 512)
        hs = h_scratch[...].astype(jnp.float32)              # (Bp, 512)
        rows = jax.lax.broadcasted_iota(jnp.int32, (hs.shape[0], 1), 0)
        diff = jnp.where(rows < batch, hs - mu, 0.0)
        var = jnp.sum(diff * diff, axis=0, keepdims=True) * inv_n   # biased variance
        scale = p_ref[1:2, :] * jax.lax.rsqrt(var + eps)     # gamma * rsqrt(var+eps)
        shift = p_ref[2:3, :] - mu * scale                   # beta - mu*scale
        hn = jnp.maximum(hs * scale + shift, 0.0)            # BN + ReLU, f32
        # --- Linear(512, num_classes_padded): bf16 MXU matmul, f32 accumulation.
        logits = jnp.dot(hn.astype(jnp.bfloat16), w2_ref[...],
                         preferred_element_type=jnp.float32)
        out_ref[...] = logits + b2_ref[...]


def fine_tune_head(feat, w1, b1, gamma, beta, w2, b2, *, eps=BN_EPS):
    """Fused global-avg-pool + fc head of FineTuneModel.

    feat: backbone final feature maps.  Fast path: channels-last
    (B, Hf, Wf, C) bf16 (natural TPU conv output) -> zero extra HBM traffic.
    NCHW (B, C, Hf, Wf) is accepted but transposed here (one extra HBM round
    trip of feat).  Weights are (in, out), i.e. PyTorch Linear.weight.T.
    Returns (B, num_classes) f32 logits.
    """
    C = w1.shape[0]
    hidden = w1.shape[1]
    num_classes = w2.shape[1]

    if feat.ndim != 4:
        raise ValueError("feat must be (B, Hf, Wf, C) or (B, C, Hf, Wf)")
    if feat.shape[-1] == C:
        pass                                   # channels-last: free reshape below
    elif feat.shape[1] == C:
        # TODO(synk): NCHW fallback costs one extra HBM round trip of feat;
        # prefer emitting channels-last from the backbone.
        feat = jnp.transpose(feat, (0, 2, 3, 1))
    else:
        raise ValueError("feat channel dim does not match w1")

    B, H, W, _ = feat.shape
    HW = H * W
    feat = feat.reshape(B, HW, C)              # free (contiguous) reshape
    if feat.dtype != jnp.bfloat16:
        # One full cast of feat; avoided entirely when the backbone emits bf16.
        feat = feat.astype(jnp.bfloat16)

    # bf16 weights for the MXU; small per-channel params packed into one f32 ref.
    w1b = w1.astype(jnp.bfloat16)
    params = jnp.stack([b1.reshape(-1), gamma.reshape(-1), beta.reshape(-1)],
                       axis=0).astype(jnp.float32)          # (3, hidden)

    # Lane-pad num_classes to 128 (zero columns; sliced off afterward).
    NCP = _round_up(max(num_classes, 1), 128)
    w2p = jnp.zeros((hidden, NCP), jnp.bfloat16).at[:, :num_classes].set(
        w2.astype(jnp.bfloat16))
    b2p = jnp.zeros((1, NCP), jnp.float32).at[:, :num_classes].set(
        b2.reshape(1, -1).astype(jnp.float32))

    # --- generation-aware batch tiling & VMEM budget --------------------------
    try:
        vmem_cap = int(pltpu.get_tpu_info().vmem_capacity_bytes)
    except Exception:
        vmem_cap = 64 << 20                    # conservative (v7x-sized) fallback

    # v5e/v6e (128 MiB VMEM): TB=128 fills the MXU M-dim; v7x (64 MiB): TB<=64.
    target_tb = 128 if vmem_cap >= (100 << 20) else 64

    if B <= target_tb:
        TB = B                                 # single grid step, no partial block
    else:
        TB = target_tb                         # multiple of 8; last block may be partial

    # Bound h_scratch growth for very large batches (stats stay f32).
    h_dtype = jnp.float32 if B <= 4096 else jnp.bfloat16
    h_bytes = 4 if h_dtype == jnp.float32 else 2

    hw_pad = _round_up(HW, 16)                 # bf16 sublane tile padding (49 -> 64)

    def _footprint(tb):
        bp = pl.cdiv(B, tb) * tb
        return (2 * tb * hw_pad * C * 2        # feat block, double-buffered, bf16
                + 2 * C * hidden * 2           # w1 (2 pipeline buffers), bf16
                + 2 * hidden * NCP * 2         # w2, bf16
                + 2 * 8 * hidden * 4           # packed b1/gamma/beta (sublane-padded)
                + 2 * 8 * NCP * 4              # b2
                + 2 * bp * NCP * 4             # output block buffers, f32
                + bp * hidden * h_bytes        # h scratch
                + 8 * hidden * 4)              # sum scratch

    budget = int(0.72 * vmem_cap)
    while TB > 8 and TB % 8 == 0 and _footprint(TB) > budget:
        TB = max(8, TB // 2)

    nbt = pl.cdiv(B, TB)
    Bp = nbt * TB

    vmem_limit = int(min(max(_footprint(TB) + (2 << 20), 8 << 20), vmem_cap))

    kernel = functools.partial(head_kernel, batch=B, eps=eps)

    out = pl.pallas_call(
        kernel,
        out_shape=jax.ShapeDtypeStruct((Bp, NCP), jnp.float32),
        grid_spec=pltpu.PrefetchScalarGridSpec(
            num_scalar_prefetch=0,
            grid=(nbt,),
            in_specs=[
                pl.BlockSpec((TB, HW, C), lambda i: (i, 0, 0)),   # feat streams
                pl.BlockSpec((C, hidden), lambda i: (0, 0)),      # w1 resident
                pl.BlockSpec((3, hidden), lambda i: (0, 0)),      # b1/gamma/beta
                pl.BlockSpec((hidden, NCP), lambda i: (0, 0)),    # w2 resident
                pl.BlockSpec((1, NCP), lambda i: (0, 0)),         # b2
            ],
            out_specs=pl.BlockSpec((Bp, NCP), lambda i: (0, 0)),
            scratch_shapes=[
                pltpu.VMEM((Bp, hidden), h_dtype),    # pre-BN activations
                pltpu.VMEM((1, hidden), jnp.float32), # sum(h) over real batch
            ],
        ),
        compiler_params=pltpu.CompilerParams(
            # BN stats accumulate across the batch axis -> "arbitrary".
            dimension_semantics=("arbitrary",),
            vmem_limit_bytes=vmem_limit,
        ),
    )(feat, w1b, params, w2p, b2p)

    return out[:B, :num_classes]


def reference_head(feat_nhwc, w1, b1, gamma, beta, w2, b2, eps=BN_EPS):
    """Pure-JAX reference matching the PyTorch fc head (training-mode BN),
    mirroring the kernel's bf16 input precision for the two matmuls."""
    f32 = jnp.float32
    hp = jax.lax.Precision.HIGHEST
    feat = feat_nhwc.astype(jnp.bfloat16).astype(f32)
    pooled = jnp.mean(feat, axis=(1, 2))
    h = jnp.dot(pooled.astype(jnp.bfloat16).astype(f32),
                w1.astype(jnp.bfloat16).astype(f32), precision=hp)
    h = h + b1.reshape(1, -1)
    mu = jnp.mean(h, axis=0, keepdims=True)
    var = jnp.mean((h - mu) ** 2, axis=0, keepdims=True)
    h = (h - mu) * jax.lax.rsqrt(var + eps) * gamma.reshape(1, -1) + beta.reshape(1, -1)
    h = jnp.maximum(h, 0.0)
    logits = jnp.dot(h.astype(jnp.bfloat16).astype(f32),
                     w2.astype(jnp.bfloat16).astype(f32), precision=hp)
    return logits + b2.reshape(1, -1)


if __name__ == "__main__":
    B = 2            # batch
    C_FEAT = 2048    # resnet50 final feature channels (fixed by Linear(2048, 512))
    HF = WF = 4      # spatial extent of the final feature map (small test size)
    HIDDEN = 512
    NUM_CLASSES = 8

    key = jax.random.PRNGKey(0)
    k_feat, k_w1, k_b1, k_w2, k_b2 = jax.random.split(key, 5)

    # Synthetic backbone output, channels-last bf16 (the layout/dtype a TPU conv
    # backbone naturally emits -> the wrapper does no transpose/cast/pad of feat).
    feat = jax.random.normal(k_feat, (B, HF, WF, C_FEAT),
                             dtype=jnp.float32).astype(jnp.bfloat16)

    # Deterministic parameter init (weights stored as (in, out) == PyTorch W.T).
    w1 = jax.random.normal(k_w1, (C_FEAT, HIDDEN), dtype=jnp.float32) * 0.02
    b1 = jax.random.normal(k_b1, (1, HIDDEN), dtype=jnp.float32) * 0.02
    gamma = jnp.ones((1, HIDDEN), dtype=jnp.float32)      # BatchNorm1d weight
    beta = jnp.zeros((1, HIDDEN), dtype=jnp.float32)      # BatchNorm1d bias
    w2 = jax.random.normal(k_w2, (HIDDEN, NUM_CLASSES), dtype=jnp.float32) * 0.02
    b2 = jax.random.normal(k_b2, (1, NUM_CLASSES), dtype=jnp.float32) * 0.02

    logits = fine_tune_head(feat, w1, b1, gamma, beta, w2, b2)
    logits = jax.block_until_ready(logits)

    ref = reference_head(feat, w1, b1, gamma, beta, w2, b2)
    assert logits.shape == (B, NUM_CLASSES)
    assert jnp.allclose(logits, ref, atol=3e-3, rtol=3e-3), "mismatch vs reference"

    print("KERNEL_OK")
</pallas_src>

<mosaic_0001>
module attributes {stable_mosaic.version = 11 : i64} {
  func.func @head_kernel(%arg0: i32, %arg1: memref<2x16x2048xbf16, #tpu.memory_space<vmem>>, %arg2: memref<2048x512xbf16, #tpu.memory_space<vmem>>, %arg3: memref<3x512xf32, #tpu.memory_space<vmem>>, %arg4: memref<512x128xbf16, #tpu.memory_space<vmem>>, %arg5: memref<1x128xf32, #tpu.memory_space<vmem>>, %arg6: memref<2x128xf32, #tpu.memory_space<vmem>>, %arg7: memref<2x512xf32, #tpu.memory_space<vmem>>, %arg8: memref<1x512xf32, #tpu.memory_space<vmem>>) attributes {dimension_semantics = [#tpu.dimension_semantics<arbitrary>], iteration_bounds = array<i64: 1>, scalar_prefetch = 0 : i64, scratch_operands = 2 : i64, tpu.core_type = #tpu.core_type<tc>, window_params = [{transform_indices = @transform_0, window_bounds = array<i64: 2, 16, 2048>}, {pipeline_mode = #tpu.pipeline_mode<synchronous>, transform_indices = @transform_1, window_bounds = array<i64: 2048, 512>}, {pipeline_mode = #tpu.pipeline_mode<synchronous>, transform_indices = @transform_2, window_bounds = array<i64: 3, 512>}, {pipeline_mode = #tpu.pipeline_mode<synchronous>, transform_indices = @transform_3, window_bounds = array<i64: 512, 128>}, {pipeline_mode = #tpu.pipeline_mode<synchronous>, transform_indices = @transform_4, window_bounds = array<i64: 1, 128>}, {pipeline_mode = #tpu.pipeline_mode<synchronous>, transform_indices = @transform_5, window_bounds = array<i64: 2, 128>}]} {
    %c0_i32 = arith.constant 0 : i32
    %0 = arith.cmpi eq, %arg0, %c0_i32 : i32
    %1 = arith.extui %0 : i1 to i32
    %c0_i32_0 = arith.constant 0 : i32
    %2 = arith.cmpi ne, %1, %c0_i32_0 : i32
    scf.if %2 {
      %cst_20 = arith.constant 0.000000e+00 : f32
      %33 = vector.broadcast %cst_20 : f32 to vector<1x512xf32>
      %c0_21 = arith.constant 0 : index
      %c0_22 = arith.constant 0 : index
      %34 = vector.load %arg8[%c0_21, %c0_22] : memref<1x512xf32, #tpu.memory_space<vmem>>, vector<1x512xf32>
      tpu.vector_store %arg8[%c0_21, %c0_22], %33 {strides = array<i32>} : memref<1x512xf32, #tpu.memory_space<vmem>>, vector<1x512xf32>,
    } else {
    }
    %c0 = arith.constant 0 : index
    %c0_1 = arith.constant 0 : index
    %c0_2 = arith.constant 0 : index
    %3 = vector.load %arg1[%c0, %c0_1, %c0_2] : memref<2x16x2048xbf16, #tpu.memory_space<vmem>>, vector<2x16x2048xbf16>
    %4 = arith.extf %3 : vector<2x16x2048xbf16> to vector<2x16x2048xf32>
    %cst = arith.constant dense<0.000000e+00> : vector<2x2048xf32>
    %5 = vector.multi_reduction <add>, %4, %cst [1] : vector<2x16x2048xf32> to vector<2x2048xf32>
    %cst_3 = arith.constant 1.600000e+01 : f32
    %6 = vector.broadcast %cst_3 : f32 to vector<2x2048xf32>
    %7 = arith.divf %5, %6 : vector<2x2048xf32>
    %8 = arith.truncf %7 : vector<2x2048xf32> to vector<2x2048xbf16>
    %c0_4 = arith.constant 0 : index
    %c0_5 = arith.constant 0 : index
    %9 = vector.load %arg2[%c0_4, %c0_5] : memref<2048x512xbf16, #tpu.memory_space<vmem>>, vector<2048x512xbf16>
    %cst_6 = arith.constant dense<0.000000e+00> : vector<2x512xf32>
    %10 = tpu.matmul %8, %9, %cst_6 {dimension_numbers = #tpu.dot_dimension_numbers<[1], [0], [0], [1], [0, 0, 1, 1], [], []>} : vector<2x2048xbf16>, vector<2048x512xbf16>, vector<2x512xf32> -> vector<2x512xf32>
    %c0_7 = arith.constant 0 : index
    %c0_8 = arith.constant 0 : index
    %11 = vector.load %arg3[%c0_7, %c0_8] : memref<3x512xf32, #tpu.memory_space<vmem>>, vector<1x512xf32>
    %12 = vector.broadcast %11 : vector<1x512xf32> to vector<2x512xf32>
    %13 = arith.addf %10, %12 : vector<2x512xf32>
    %c2_i32 = arith.constant 2 : i32
    %14 = arith.muli %arg0, %c2_i32 : i32
    %15 = tpu.iota {dimensions = array<i32: 0>} : vector<2x1xi32>
    %16 = vector.broadcast %14 : i32 to vector<2x1xi32>
    %17 = arith.addi %16, %15 : vector<2x1xi32>
    %c2_i32_9 = arith.constant 2 : i32
    %18 = vector.broadcast %c2_i32_9 : i32 to vector<2x1xi32>
    %19 = arith.cmpi slt, %17, %18 : vector<2x1xi32>
    %cst_10 = arith.constant 0.000000e+00 : f32
    %20 = vector.shape_cast %19 : vector<2x1xi1> to vector<2x1xi1>
    %21 = vector.broadcast %20 : vector<2x1xi1> to vector<2x512xi1>
    %22 = vector.broadcast %cst_10 : f32 to vector<2x512xf32>
    %23 = arith.select %21, %13, %22 : vector<2x512xi1>, vector<2x512xf32>
    %c0_11 = arith.constant 0 : index
    %c0_12 = arith.constant 0 : index
    %24 = vector.load %arg8[%c0_11, %c0_12] : memref<1x512xf32, #tpu.memory_space<vmem>>, vector<1x512xf32>
    %cst_13 = arith.constant dense<0.000000e+00> : vector<512xf32>
    %25 = vector.multi_reduction <add>, %23, %cst_13 [0] : vector<2x512xf32> to vector<512xf32>
    %26 = vector.shape_cast %25 : vector<512xf32> to vector<1x512xf32>
    %27 = arith.addf %24, %26 : vector<1x512xf32>
    %c0_14 = arith.constant 0 : index
    %c0_15 = arith.constant 0 : index
    %28 = vector.load %arg8[%c0_14, %c0_15] : memref<1x512xf32, #tpu.memory_space<vmem>>, vector<1x512xf32>
    tpu.vector_store %arg8[%c0_14, %c0_15], %27 {strides = array<i32>} : memref<1x512xf32, #tpu.memory_space<vmem>>, vector<1x512xf32>,
    %c0_16 = arith.constant 0 : index
    %c0_17 = arith.constant 0 : index
    %29 = vector.load %arg7[%c0_16, %c0_17] : memref<2x512xf32, #tpu.memory_space<vmem>>, vector<2x512xf32>
    tpu.vector_store %arg7[%c0_16, %c0_17], %23 {strides = array<i32>} : memref<2x512xf32, #tpu.memory_space<vmem>>, vector<2x512xf32>,
    %c0_i32_18 = arith.constant 0 : i32
    %30 = arith.cmpi eq, %arg0, %c0_i32_18 : i32
    %31 = arith.extui %30 : i1 to i32
    %c0_i32_19 = arith.constant 0 : i32
    %32 = arith.cmpi ne, %31, %c0_i32_19 : i32
    scf.if %32 {
      %c0_20 = arith.constant 0 : index
      %c0_21 = arith.constant 0 : index
      %33 = vector.load %arg8[%c0_20, %c0_21] : memref<1x512xf32, #tpu.memory_space<vmem>>, vector<1x512xf32>
      %cst_22 = arith.constant 5.000000e-01 : f32
      %34 = vector.broadcast %cst_22 : f32 to vector<1x512xf32>
      %35 = arith.mulf %33, %34 : vector<1x512xf32>
      %c0_23 = arith.constant 0 : index
      %c0_24 = arith.constant 0 : index
      %36 = vector.load %arg7[%c0_23, %c0_24] : memref<2x512xf32, #tpu.memory_space<vmem>>, vector<2x512xf32>
      %37 = tpu.iota {dimensions = array<i32: 0>} : vector<2x1xi32>
      %c2_i32_25 = arith.constant 2 : i32
      %38 = vector.broadcast %c2_i32_25 : i32 to vector<2x1xi32>
      %39 = arith.cmpi slt, %37, %38 : vector<2x1xi32>
      %40 = vector.broadcast %35 : vector<1x512xf32> to vector<2x512xf32>
      %41 = arith.subf %36, %40 : vector<2x512xf32>
      %cst_26 = arith.constant 0.000000e+00 : f32
      %42 = vector.shape_cast %39 : vector<2x1xi1> to vector<2x1xi1>
      %43 = vector.broadcast %42 : vector<2x1xi1> to vector<2x512xi1>
      %44 = vector.broadcast %cst_26 : f32 to vector<2x512xf32>
      %45 = arith.select %43, %41, %44 : vector<2x512xi1>, vector<2x512xf32>
      %46 = arith.mulf %45, %45 : vector<2x512xf32>
      %cst_27 = arith.constant dense<0.000000e+00> : vector<512xf32>
      %47 = vector.multi_reduction <add>, %46, %cst_27 [0] : vector<2x512xf32> to vector<512xf32>
      %48 = vector.shape_cast %47 : vector<512xf32> to vector<1x512xf32>
      %cst_28 = arith.constant 5.000000e-01 : f32
      %49 = vector.broadcast %cst_28 : f32 to vector<1x512xf32>
      %50 = arith.mulf %48, %49 : vector<1x512xf32>
      %c1 = arith.constant 1 : index
      %c0_29 = arith.constant 0 : index
      %51 = vector.load %arg3[%c1, %c0_29] : memref<3x512xf32, #tpu.memory_space<vmem>>, vector<1x512xf32>
      %cst_30 = arith.constant 9.99999974E-6 : f32
      %52 = vector.broadcast %cst_30 : f32 to vector<1x512xf32>
      %53 = arith.addf %50, %52 : vector<1x512xf32>
      %54 = math.rsqrt %53 : vector<1x512xf32>
      %55 = arith.mulf %51, %54 : vector<1x512xf32>
      %c2 = arith.constant 2 : index
      %c0_31 = arith.constant 0 : index
      %56 = vector.load %arg3[%c2, %c0_31] : memref<3x512xf32, #tpu.memory_space<vmem>>, vector<1x512xf32>
      %57 = arith.mulf %35, %55 : vector<1x512xf32>
      %58 = arith.subf %56, %57 : vector<1x512xf32>
      %59 = vector.broadcast %55 : vector<1x512xf32> to vector<2x512xf32>
      %60 = arith.mulf %36, %59 : vector<2x512xf32>
      %61 = vector.broadcast %58 : vector<1x512xf32> to vector<2x512xf32>
      %62 = arith.addf %60, %61 : vector<2x512xf32>
      %cst_32 = arith.constant 0.000000e+00 : f32
      %63 = vector.broadcast %cst_32 : f32 to vector<2x512xf32>
      %64 = arith.maximumf %62, %63 : vector<2x512xf32>
      %65 = arith.truncf %64 : vector<2x512xf32> to vector<2x512xbf16>
      %c0_33 = arith.constant 0 : index
      %c0_34 = arith.constant 0 : index
      %66 = vector.load %arg4[%c0_33, %c0_34] : memref<512x128xbf16, #tpu.memory_space<vmem>>, vector<512x128xbf16>
      %cst_35 = arith.constant dense<0.000000e+00> : vector<2x128xf32>
      %67 = tpu.matmul %65, %66, %cst_35 {dimension_numbers = #tpu.dot_dimension_numbers<[1], [0], [0], [1], [0, 0, 1, 1], [], []>} : vector<2x512xbf16>, vector<512x128xbf16>, vector<2x128xf32> -> vector<2x128xf32>
      %c0_36 = arith.constant 0 : index
      %c0_37 = arith.constant 0 : index
      %68 = vector.load %arg5[%c0_36, %c0_37] : memref<1x128xf32, #tpu.memory_space<vmem>>, vector<1x128xf32>
      %69 = vector.broadcast %68 : vector<1x128xf32> to vector<2x128xf32>
      %70 = arith.addf %67, %69 : vector<2x128xf32>
      %c0_38 = arith.constant 0 : index
      %c0_39 = arith.constant 0 : index
      %71 = vector.load %arg6[%c0_38, %c0_39] : memref<2x128xf32, #tpu.memory_space<vmem>>, vector<2x128xf32>
      tpu.vector_store %arg6[%c0_38, %c0_39], %70 {strides = array<i32>} : memref<2x128xf32, #tpu.memory_space<vmem>>, vector<2x128xf32>,
    } else {
    }
    return
  }
  func.func @transform_0(%arg0: i32) -> (i32, i32, i32) {
    %c0_i32 = arith.constant 0 : i32
    %c0_i32_0 = arith.constant 0 : i32
    %c0_i32_1 = arith.constant 0 : i32
    return %arg0, %c0_i32, %c0_i32_0 : i32, i32, i32
  }
  func.func @transform_1(%arg0: i32) -> (i32, i32) {
    %c0_i32 = arith.constant 0 : i32
    %c0_i32_0 = arith.constant 0 : i32
    %c0_i32_1 = arith.constant 0 : i32
    return %c0_i32, %c0_i32_0 : i32, i32
  }
  func.func @transform_2(%arg0: i32) -> (i32, i32) {
    %c0_i32 = arith.constant 0 : i32
    %c0_i32_0 = arith.constant 0 : i32
    %c0_i32_1 = arith.constant 0 : i32
    return %c0_i32, %c0_i32_0 : i32, i32
  }
  func.func @transform_3(%arg0: i32) -> (i32, i32) {
    %c0_i32 = arith.constant 0 : i32
    %c0_i32_0 = arith.constant 0 : i32
    %c0_i32_1 = arith.constant 0 : i32
    return %c0_i32, %c0_i32_0 : i32, i32
  }
  func.func @transform_4(%arg0: i32) -> (i32, i32) {
    %c0_i32 = arith.constant 0 : i32
    %c0_i32_0 = arith.constant 0 : i32
    %c0_i32_1 = arith.constant 0 : i32
    return %c0_i32, %c0_i32_0 : i32, i32
  }
  func.func @transform_5(%arg0: i32) -> (i32, i32) {
    %c0_i32 = arith.constant 0 : i32
    %c0_i32_0 = arith.constant 0 : i32
    %c0_i32_1 = arith.constant 0 : i32
    return %c0_i32, %c0_i32_0 : i32, i32
  }
}

</mosaic_0001>

<bundles_post_ra>
// kernel: tpu_custom_call.1
= control target key start
LH: loop header
LB: loop body
LE: loop exit
PB: predicated region body
PF: predicated region fallthrough
CT: control target
= control target key end

     0   :  { %10 = vsyncpa [#allocation5], 0  ;;  %s6956_s0 = inlined_call_operand.hbm [shape: bf16[2,16,2048], index: 0, kind: input, shape index: {}]   ;;  %s6957_s1 = inlined_call_operand.hbm [shape: bf16[2048,512], index: 1, kind: input, shape index: {}]   ;;  %s6958_s2 = inlined_call_operand.hbm [shape: f32[3,512], index: 2, kind: input, shape index: {}]   ;;  %s6959_s3 = inlined_call_operand.hbm [shape: bf16[512,128], index: 3, kind: input, shape index: {}]   ;;  %s6960_s4 = inlined_call_operand.hbm [shape: f32[1,128], index: 4, kind: input, shape index: {}]   ;;  %s6961_s5 = inlined_call_operand.hbm [shape: f32[2,128], index: 5, kind: output, shape index: {}]  }
   0x1   :  { %11 = vsyncpa [#allocation8], 0 }
   0x2   :  { %12 = vsyncpa [#allocation11], 0 }
   0x3   :  { %13 = vsyncpa [#allocation6], 0  ;;  %s6594_s18 = smov [#allocation7]  }
   0x4   :  { %s31_s19 = sshll.u32 %s6594_s18, 4  ;;  %s32_s19 = int_to_ptr.vmem [resolvable:$true] %s31_s19 }
   0x5   :  { %s6474_s20 = scalar_lea.vmem %s32_s19, 65536  ;;  %p6479_p1 = scmp.lt.s32.totalorder %s32_s19, %s32_s19 }
   0x6   :  { %p6475_p0 = scmp.ne.s32.totalorder %s32_s19, %s6474_s20  ;;  %p6480_p2 = scmp.lt.s32.totalorder %s6474_s20, %s6474_s20 }
   0x8   :  { %p6481_p3 = por %p6480_p2, %p6479_p1 }
   0xa   :  { %p6482_p4 = pnand %p6481_p3, %p6475_p0 }
   0xc   :  { %6485 = shalt.err (!%p6482_p4)
}
   0xd   :  { %s6595_s21 = smov 256   ;;  %s6596_s22 = smov 16  }
   0xe   :  { %37 = dma.hbm_to_vmem [thread:$0]  %s6957_s1, 65536, %s32_s19, [#allocation8], %s6595_s21, %s6595_s21, %s6596_s22  }
   0xf   :  { %s6597_s25 = smov [#allocation10]   ;;  %s6598_s27 = smov [#allocation4]  }
  0x10   :  { %s53_s26 = sshll.u32 %s6597_s25, 4  ;;  %s19_s28 = sshll.u32 %s6598_s27, 4  ;;  %s54_s26 = int_to_ptr.vmem [resolvable:$true] %s53_s26  ;;  %s20_s28 = int_to_ptr.vmem [resolvable:$true] %s19_s28 }
  0x11   :  { %s6494_s29 = scalar_lea.vmem %s54_s26, 4096  ;;  %p6499_p6 = scmp.lt.s32.totalorder %s54_s26, %s54_s26 }
  0x12   :  { %p6495_p5 = scmp.ne.s32.totalorder %s54_s26, %s6494_s29  ;;  %p6500_p7 = scmp.lt.s32.totalorder %s6494_s29, %s6494_s29 }
  0x14   :  { %p6501_p8 = por %p6500_p7, %p6499_p6 }
  0x16   :  { %p6502_p9 = pnand %p6501_p8, %p6495_p5 }
  0x18   :  { %6505 = shalt.err (!%p6502_p9)
}
  0x19   :  { %s6599_s30 = smov 64   ;;  %s6600_s6 = smov 4  }
  0x1a   :  { %59 = dma.hbm_to_vmem [thread:$0]  %s6959_s3, 4096, %s54_s26, [#allocation11], %s6599_s30, %s6599_s30, %s6600_s6  }
  0x1b   :  { %s6514_s1 = scalar_lea.vmem %s20_s28, 4096  ;;  %p6519_p11 = scmp.lt.s32.totalorder %s20_s28, %s20_s28 }
  0x1c   :  { %p6515_p10 = scmp.ne.s32.totalorder %s20_s28, %s6514_s1  ;;  %p6520_p12 = scmp.lt.s32.totalorder %s6514_s1, %s6514_s1 }
  0x1e   :  { %p6521_p13 = por %p6520_p12, %p6519_p11 }
  0x20   :  { %p6522_p0 = pnand %p6521_p13, %p6515_p10 }
  0x22   :  { %6525 = shalt.err (!%p6522_p0)
}
  0x23   :  { %s6601_s9 = smov 1024   ;;  %s6602_s12 = smov [#allocation9]  }
  0x24   :  { %25 = dma.hbm_to_vmem [thread:$0]  %s6956_s0, 4096, %s20_s28, [#allocation5], %s6601_s9, %s6601_s9, %s6599_s30  }
  0x25   :  { %s44_s13 = sshll.u32 %s6602_s12, 4  ;;  %s6603_s14 = smov [#allocation12]   ;;  %s45_s13 = int_to_ptr.vmem [resolvable:$true] %s44_s13 }
  0x26   :  { %s66_s15 = sshll.u32 %s6603_s14, 4  ;;  %s6534_s3 = scalar_lea.vmem %s45_s13, 256  ;;  %s67_s15 = int_to_ptr.vmem [resolvable:$true] %s66_s15 }
  0x27   :  { %p6535_p1 = scmp.ne.s32.totalorder %s45_s13, %s6534_s3  ;;  %p6539_p2 = scmp.lt.s32.totalorder %s45_s13, %s45_s13 }
  0x28   :  { %p6540_p3 = scmp.lt.s32.totalorder %s6534_s3, %s6534_s3 }
  0x2a   :  { %p6541_p4 = por %p6540_p3, %p6539_p2 }
  0x2c   :  { %p6542_p5 = pnand %p6541_p4, %p6535_p1 }
  0x2e   :  { %6545 = shalt.err (!%p6542_p5)
}
  0x2f   :  { %47 = dma.hbm_to_vmem [thread:$0]  %s6958_s2, 256, %s45_s13, [#allocation8]  }
  0x30   :  { %s6554_s18 = scalar_lea.vmem %s67_s15, 16  ;;  %s6558_s0 = scalar_lea.vmem %s67_s15, 32 }
  0x31   :  { %p6555_p6 = scmp.ne.s32.totalorder %s67_s15, %s6554_s18  ;;  %p6559_p7 = scmp.lt.s32.totalorder %s67_s15, %s67_s15 }
  0x32   :  { %p6560_p8 = scmp.lt.s32.totalorder %s6558_s0, %s6554_s18 }
  0x34   :  { %p6561_p9 = por %p6560_p8, %p6559_p7 }
  0x36   :  { %p6562_p10 = pnand %p6561_p9, %p6555_p6 }
  0x38   :  { %6565 = shalt.err (!%p6562_p10)
}
  0x39   :  { %69 = dma.hbm_to_vmem [thread:$0]  %s6960_s4, 16, %s67_s15, [#allocation11]  }
  0x3a   :  { %6586 = dma.done.wait [#allocation5], 4096  }
  0x3b   :  { %6587 = vsyncadd [#allocation5], 4294963200 }
  0x3c   :  { %6588 = dma.done.wait [#allocation8], 65792  }
  0x3d   :  { %6589 = vsyncadd [#allocation8], 4294901504 }
  0x3e   :  { %6590 = dma.done.wait [#allocation11], 4112  }
  0x3f   :  { %6591 = vsyncadd [#allocation11], 4294963184  ;;  %v5657_v0 = vld [vmem:[#allocation7 + $0xe4] ss:$16 sps:$4 sm:$0xff]   ;;  %v5661_v2 = vld [vmem:[#allocation7 + $0xe0] ss:$16 sps:$4 sm:$0xff]  }
  0x40   :  { %v5659_v1 = vld [vmem:[#allocation7 + $0x2e4] ss:$16 sps:$4 sm:$0xff]   ;;  %3687 = vmatprep.subr.bf16.mxu0 %v5657_v0  ;;  %v5662_v3 = vld [vmem:[#allocation7 + $0x2e0] ss:$16 sps:$4 sm:$0xff]   ;;  %v96_v60 = vld [vmem:[#allocation4 + $0x8] sm:$0xff]  ;;  %vm1078_vm0 = vcmask 1041409  }
  0x41   :  { %3728 = vmatprep.subr.bf16.mxu1 %v5659_v1  ;;  %v5663_v4 = vld [vmem:[#allocation7 + $0xc4] ss:$16 sps:$4 sm:$0xff]   ;;  %3688 = vmatpush1.bf16.msra.mxu0 %v5661_v2  ;;  %v5667_v6 = vld [vmem:[#allocation7 + $0xc0] ss:$16 sps:$4 sm:$0xff]   ;;  %v104_v61 = vld [vmem:[#allocation4 + $0x48] sm:$0xff]  ;;  %v129_v2 = vunpack.c.l.bf16 %v96_v60  ;;  %vm4356_vm2 = vcmask 1041408  }
  0x42   :  { %3729 = vmatpush1.bf16.msra.mxu1 %v5662_v3  ;;  %v5665_v5 = vld [vmem:[#allocation7 + $0x2c4] ss:$16 sps:$4 sm:$0xff]   ;;  %3689 = vmatprep.subr.bf16.mxu0 %v5663_v4  ;;  %v5668_v7 = vld [vmem:[#allocation7 + $0x2c0] ss:$16 sps:$4 sm:$0xff]   ;;  %v112_v62 = vld [vmem:[#allocation4 + $0x88] sm:$0xff]  ;;  %v130_v3 = vunpack.c.h.bf16 %v96_v60  ;;  %s6607_s2 = smov [#allocation13]  }
  0x43   :  { %3730 = vmatprep.subr.bf16.mxu1 %v5665_v5  ;;  %v5669_v8 = vld [vmem:[#allocation7 + $0xa4] ss:$16 sps:$4 sm:$0xff]   ;;  %v5673_v10 = vld [vmem:[#allocation7 + $0xa0] ss:$16 sps:$4 sm:$0xff]   ;;  %v120_v1 = vld [vmem:[#allocation4 + $0xc8] sm:$0xff]  ;;  %v145_v5 = vunpack.c.l.bf16 %v104_v61  ;;  %s5043_s4 = sshll.u32 %s6607_s2, 4  ;;  %s5044_s4 = int_to_ptr.vmem [resolvable:$true] %s5043_s4 }
  0x44   :  { %v5671_v9 = vld [vmem:[#allocation7 + $0x2a4] ss:$16 sps:$4 sm:$0xff]   ;;  %v5674_v11 = vld [vmem:[#allocation7 + $0x2a0] ss:$16 sps:$4 sm:$0xff]   ;;  %s6566_s21 = scalar_lea.vmem %s5044_s4, 32  ;;  %p6571_p12 = scmp.lt.s32.totalorder %s5044_s4, %s5044_s4 }
  0x45   :  { %3690 = vmatpush1.bf16.msra.mxu0 %v5667_v6  ;;  %v5675_v12 = vld [vmem:[#allocation7 + $0x84] ss:$16 sps:$4 sm:$0xff]   ;;  %v5679_v14 = vld [vmem:[#allocation7 + $0x80] ss:$16 sps:$4 sm:$0xff]   ;;  %v146_v6 = vunpack.c.h.bf16 %v104_v61  ;;  %p6567_p11 = scmp.ne.s32.totalorder %s5044_s4, %s6566_s21  ;;  %p6572_p13 = scmp.lt.s32.totalorder %s6566_s21, %s6566_s21 }
  0x46   :  { %3731 = vmatpush1.bf16.msra.mxu1 %v5668_v7  ;;  %3691 = vmatprep.subr.bf16.mxu0 %v5669_v8  ;;  %v5677_v13 = vld [vmem:[#allocation7 + $0x284] ss:$16 sps:$4 sm:$0xff]   ;;  %v5680_v15 = vld [vmem:[#allocation7 + $0x280] ss:$16 sps:$4 sm:$0xff]   ;;  %v161_v7 = vunpack.c.l.bf16 %v112_v62 }
  0x47   :  { %3732 = vmatprep.subr.bf16.mxu1 %v5671_v9  ;;  %v5681_v16 = vld [vmem:[#allocation7 + $0x64] ss:$16 sps:$4 sm:$0xff]   ;;  %v5685_v18 = vld [vmem:[#allocation7 + $0x60] ss:$16 sps:$4 sm:$0xff]   ;;  %p6573_p0 = por %p6572_p13, %p6571_p12 }
  0x48   :  { %v5683_v17 = vld [vmem:[#allocation7 + $0x264] ss:$16 sps:$4 sm:$0xff]   ;;  %v5686_v19 = vld [vmem:[#allocation7 + $0x260] ss:$16 sps:$4 sm:$0xff]  }
  0x49   :  { %3692 = vmatpush1.bf16.msra.mxu0 %v5673_v10  ;;  %v5687_v20 = vld [vmem:[#allocation7 + $0x44] ss:$16 sps:$4 sm:$0xff]   ;;  %v5691_v22 = vld [vmem:[#allocation7 + $0x40] ss:$16 sps:$4 sm:$0xff]   ;;  %p6574_p1 = pnand %p6573_p0, %p6567_p11 }
  0x4a   :  { %3733 = vmatpush1.bf16.msra.mxu1 %v5674_v11  ;;  %3693 = vmatprep.subr.bf16.mxu0 %v5675_v12  ;;  %v5689_v21 = vld [vmem:[#allocation7 + $0x244] ss:$16 sps:$4 sm:$0xff]   ;;  %v5692_v23 = vld [vmem:[#allocation7 + $0x240] ss:$16 sps:$4 sm:$0xff]   ;;  %v162_v11 = vunpack.c.h.bf16 %v112_v62  ;;  %v177_v12 = vunpack.c.l.bf16 %v120_v1 }
  0x4b   :  { %3734 = vmatprep.subr.bf16.mxu1 %v5677_v13  ;;  %v5693_v24 = vld [vmem:[#allocation7 + $0x24] ss:$16 sps:$4 sm:$0xff]   ;;  %v5697_v26 = vld [vmem:[#allocation7 + $0x20] ss:$16 sps:$4 sm:$0xff]   ;;  %v178_v13 = vunpack.c.h.bf16 %v120_v1 }
  0x4c   :  { %v5695_v25 = vld [vmem:[#allocation7 + $0x224] ss:$16 sps:$4 sm:$0xff]   ;;  %v5698_v27 = vld [vmem:[#allocation7 + $0x220] ss:$16 sps:$4 sm:$0xff]  }
  0x4d   :  { %3694 = vmatpush1.bf16.msra.mxu0 %v5679_v14  ;;  %v5699_v28 = vld [vmem:[#allocation7 + $0x4] ss:$16 sps:$4 sm:$0xff]   ;;  %v5703_v30 = vld [vmem:[#allocation7] ss:$16 sps:$4 sm:$0xff]  }
  0x4e   :  { %3735 = vmatpush1.bf16.msra.mxu1 %v5680_v15  ;;  %3695 = vmatprep.subr.bf16.mxu0 %v5681_v16  ;;  %v5701_v29 = vld [vmem:[#allocation7 + $0x204] ss:$16 sps:$4 sm:$0xff]   ;;  %v5704_v31 = vld [vmem:[#allocation7 + $0x200] ss:$16 sps:$4 sm:$0xff]   ;;  %v212_v16 = vadd.f32 %v146_v6, %v130_v3 }
  0x4f   :  { %3736 = vmatprep.subr.bf16.mxu1 %v5683_v17  ;;  %v5705_v32 = vld [vmem:[#allocation7 + $0x1e4] ss:$16 sps:$4 sm:$0xff]   ;;  %v5709_v34 = vld [vmem:[#allocation7 + $0x1e0] ss:$16 sps:$4 sm:$0xff]  }
  0x50   :  { %v5707_v33 = vld [vmem:[#allocation7 + $0x3e4] ss:$16 sps:$4 sm:$0xff]   ;;  %v5710_v35 = vld [vmem:[#allocation7 + $0x3e0] ss:$16 sps:$4 sm:$0xff]  }
  0x51   :  { %3696 = vmatpush1.bf16.msra.mxu0 %v5685_v18  ;;  %v5711_v36 = vld [vmem:[#allocation7 + $0x1c4] ss:$16 sps:$4 sm:$0xff]   ;;  %v5715_v38 = vld [vmem:[#allocation7 + $0x1c0] ss:$16 sps:$4 sm:$0xff]  }
  0x52   :  { %3737 = vmatpush1.bf16.msra.mxu1 %v5686_v19  ;;  %3697 = vmatprep.subr.bf16.mxu0 %v5687_v20  ;;  %v5713_v37 = vld [vmem:[#allocation7 + $0x3c4] ss:$16 sps:$4 sm:$0xff]   ;;  %v5716_v39 = vld [vmem:[#allocation7 + $0x3c0] ss:$16 sps:$4 sm:$0xff]  }
  0x53   :  { %3738 = vmatprep.subr.bf16.mxu1 %v5689_v21  ;;  %v5717_v40 = vld [vmem:[#allocation7 + $0x1a4] ss:$16 sps:$4 sm:$0xff]   ;;  %v5721_v42 = vld [vmem:[#allocation7 + $0x1a0] ss:$16 sps:$4 sm:$0xff]   ;;  %v324_v21 = vadd.f32 %v178_v13, %v162_v11 }
  0x54   :  { %v5719_v41 = vld [vmem:[#allocation7 + $0x3a4] ss:$16 sps:$4 sm:$0xff]   ;;  %v5722_v43 = vld [vmem:[#allocation7 + $0x3a0] ss:$16 sps:$4 sm:$0xff]  }
  0x55   :  { %3698 = vmatpush1.bf16.msra.mxu0 %v5691_v22  ;;  %v5723_v44 = vld [vmem:[#allocation7 + $0x184] ss:$16 sps:$4 sm:$0xff]   ;;  %v5727_v46 = vld [vmem:[#allocation7 + $0x180] ss:$16 sps:$4 sm:$0xff]   ;;  %v205_v22 = vadd.f32 %v145_v5, %v129_v2 }
  0x56   :  { %3739 = vmatpush1.bf16.msra.mxu1 %v5692_v23  ;;  %3699 = vmatprep.subr.bf16.mxu0 %v5693_v24  ;;  %v5725_v45 = vld [vmem:[#allocation7 + $0x384] ss:$16 sps:$4 sm:$0xff]   ;;  %v5728_v47 = vld [vmem:[#allocation7 + $0x380] ss:$16 sps:$4 sm:$0xff]   ;;  %v317_v23 = vadd.f32 %v177_v12, %v161_v7 }
  0x57   :  { %3740 = vmatprep.subr.bf16.mxu1 %v5695_v25  ;;  %v95_v48 = vld [vmem:[#allocation4] sm:$0xff]  ;;  %v213_v25 = vrot.slane %v212_v16, 4 }
  0x58   :  { %v5729_v49 = vld [vmem:[#allocation7 + $0x164] ss:$16 sps:$4 sm:$0xff]   ;;  %v127_v54 = vunpack.c.l.bf16 %v95_v48  ;;  %v128_v55 = vunpack.c.h.bf16 %v95_v48  ;;  %v5733_v8 = vld [vmem:[#allocation7 + $0x160] ss:$16 sps:$4 sm:$0xff]  }
  0x59   :  { %3700 = vmatpush1.bf16.msra.mxu0 %v5697_v26  ;;  %v5731_v50 = vld [vmem:[#allocation7 + $0x364] ss:$16 sps:$4 sm:$0xff]   ;;  %v5734_v9 = vld [vmem:[#allocation7 + $0x360] ss:$16 sps:$4 sm:$0xff]  }
  0x5a   :  { %3741 = vmatpush1.bf16.msra.mxu1 %v5698_v27  ;;  %3701 = vmatprep.subr.bf16.mxu0 %v5699_v28  ;;  %v103_v51 = vld [vmem:[#allocation4 + $0x40] sm:$0xff] }
  0x5b   :  { %3742 = vmatprep.subr.bf16.mxu1 %v5701_v29  ;;  %v111_v52 = vld [vmem:[#allocation4 + $0x80] sm:$0xff]  ;;  %v143_v56 = vunpack.c.l.bf16 %v103_v51  ;;  %v144_v57 = vunpack.c.h.bf16 %v103_v51  ;;  %v325_v29 = vrot.slane %v324_v21, 4 }
  0x5c   :  { %v119_v53 = vld [vmem:[#allocation4 + $0xc0] sm:$0xff]  ;;  %v159_v58 = vunpack.c.l.bf16 %v111_v52  ;;  %v160_v59 = vunpack.c.h.bf16 %v111_v52 }
  0x5d   :  { %3702 = vmatpush1.bf16.msra.mxu0 %v5703_v30  ;;  %v175_v63 = vunpack.c.l.bf16 %v119_v53  ;;  %v176_v0 = vunpack.c.h.bf16 %v119_v53  ;;  %v198_v4 = vadd.f32 %v144_v57, %v128_v55  ;;  %v5735_v14 = vld [vmem:[#allocation7 + $0x144] ss:$16 sps:$4 sm:$0xff]   ;;  %v191_v17 = vadd.f32 %v143_v56, %v127_v54  ;;  %v5745_v52 = vld [vmem:[#allocation7 + $0x120] ss:$16 sps:$4 sm:$0xff]  }
  0x5e   :  { %3743 = vmatpush1.bf16.msra.mxu1 %v5704_v31  ;;  %3703 = vmatprep.subr.bf16.mxu0 %v5705_v32  ;;  %v5737_v19 = vld [vmem:[#allocation7 + $0x344] ss:$16 sps:$4 sm:$0xff]   ;;  %v206_v30 = vrot.slane %v205_v22, 4  ;;  %v318_v31 = vrot.slane %v317_v23, 4  ;;  %v5739_v32 = vld [vmem:[#allocation7 + $0x140] ss:$16 sps:$4 sm:$0xff]  }
  0x5f   :  { %3744 = vmatprep.subr.bf16.mxu1 %v5707_v33  ;;  %v310_v10 = vadd.f32 %v176_v0, %v160_v59  ;;  %v199_v15 = vrot.slane %v198_v4, 4  ;;  %v303_v18 = vadd.f32 %v175_v63, %v159_v58  ;;  %v192_v26 = vrot.slane %v191_v17, 4  ;;  %v5740_v33 = vld [vmem:[#allocation7 + $0x340] ss:$16 sps:$4 sm:$0xff]   ;;  %v5747_v58 = vld [vmem:[#allocation7 + $0x104] ss:$16 sps:$4 sm:$0xff]  }
  0x60   :  { %v5746_v53 = vld [vmem:[#allocation7 + $0x320] ss:$16 sps:$4 sm:$0xff]   ;;  %v5749_v59 = vld [vmem:[#allocation7 + $0x304] ss:$16 sps:$4 sm:$0xff]  }
  0x61   :  { %3704 = vmatpush2.bf16.msra.mxu0 %v5709_v34  ;;  %v311_v20 = vrot.slane %v310_v10, 4  ;;  %v200_v24 = vadd.f32 %v199_v15, %v198_v4  ;;  %v304_v27 = vrot.slane %v303_v18, 4  ;;  %v5751_v4 = vld [vmem:[#allocation7 + $0x100] ss:$16 sps:$4 sm:$0xff]  }
  0x62   :  { %3745 = vmatpush2.bf16.msra.mxu1 %v5710_v35  ;;  %3705 = vmatprep.subr.bf16.mxu0 %v5711_v36  ;;  %v214_v35 = vadd.f32 %v213_v25, %v212_v16  ;;  %v193_v36 = vadd.f32 %v192_v26, %v191_v17 }
  0x63   :  { %3746 = vmatprep.subr.bf16.mxu1 %v5713_v37  ;;  %v312_v28 = vadd.f32 %v311_v20, %v310_v10  ;;  %v201_v34 = vrot.slane %v200_v24, 2  ;;  %v305_v37 = vadd.f32 %v304_v27, %v303_v18  ;;  %v5755_v18 = vld [vmem:[#allocation7 + $0x4e4] ss:$16 sps:$4 sm:$0xff]  }
  0x65   :  { %3706 = vmatpush2.bf16.msra.mxu0 %v5715_v38  ;;  %v5741_v38 = vld [vmem:[#allocation7 + $0x124] ss:$16 sps:$4 sm:$0xff]  }
  0x66   :  { %3747 = vmatpush2.bf16.msra.mxu1 %v5716_v39  ;;  %3707 = vmatprep.subr.bf16.mxu0 %v5717_v40  ;;  %v5743_v39 = vld [vmem:[#allocation7 + $0x324] ss:$16 sps:$4 sm:$0xff]   ;;  %v313_v40 = vrot.slane %v312_v28, 2 }
  0x67   :  { %3748 = vmatprep.subr.bf16.mxu1 %v5719_v41  ;;  %v326_v41 = vadd.f32 %v325_v29, %v324_v21 }
  0x68   :  { %v314_v48 = vadd.f32 %v313_v40, %v312_v28 }
  0x69   :  { %3708 = vmatpush2.bf16.msra.mxu0 %v5721_v42  ;;  %v207_v42 = vadd.f32 %v206_v30, %v205_v22 }
  0x6a   :  { %3749 = vmatpush2.bf16.msra.mxu1 %v5722_v43  ;;  %3709 = vmatprep.subr.bf16.mxu0 %v5723_v44  ;;  %v319_v43 = vadd.f32 %v318_v31, %v317_v23  ;;  %v202_v44 = vadd.f32 %v201_v34, %v200_v24  ;;  %v315_v60 = vrot.slane %v314_v48, 1 }
  0x6b   :  { %3750 = vmatprep.subr.bf16.mxu1 %v5725_v45  ;;  %v215_v45 = vrot.slane %v214_v35, 2 }
  0x6c   :  { %v320_v51 = vrot.slane %v319_v43, 2  ;;  %v203_v54 = vrot.slane %v202_v44, 1  ;;  %v316_v5 = vadd.f32 %v315_v60, %v314_v48  ;;  %v5768_v60 = vld [vmem:[#allocation7 + $0x6a0] ss:$16 sps:$4 sm:$0xff]  }
  0x6d   :  { %3710 = vmatpush2.bf16.msra.mxu0 %v5727_v46  ;;  %v194_v46 = vrot.slane %v193_v36, 2  ;;  %v216_v55 = vadd.f32 %v215_v45, %v214_v35  ;;  %v5753_v45 = vld [vmem:[#allocation7 + $0x4e0] ss:$16 sps:$4 sm:$0xff]  }
  0x6e   :  { %3751 = vmatpush2.bf16.msra.mxu1 %v5728_v47  ;;  %3711 = vmatprep.subr.bf16.mxu0 %v5729_v49  ;;  %v306_v47 = vrot.slane %v305_v37, 2  ;;  %v327_v49 = vrot.slane %v326_v41, 2  ;;  %v321_v63 = vadd.f32 %v320_v51, %v319_v43  ;;  %v204_v0 = vadd.f32 %v203_v54, %v202_v44  ;;  %v5759_v54 = vld [vmem:[#allocation7 + $0x4c0] ss:$16 sps:$4 sm:$0xff]  }
  0x6f   :  { %3752 = vmatprep.subr.bf16.mxu1 %v5731_v50  ;;  %v208_v50 = vrot.slane %v207_v42, 2  ;;  %v195_v56 = vadd.f32 %v194_v46, %v193_v36  ;;  %v217_v1 = vrot.slane %v216_v55, 1 }
  0x70   :  { %v307_v57 = vadd.f32 %v306_v47, %v305_v37  ;;  %v328_v61 = vadd.f32 %v327_v49, %v326_v41  ;;  %v417_v10 = vmul.f32 0.0625, %v204_v0  ;;  %v5761_v49 = vld [vmem:[#allocation7 + $0x4c4] ss:$16 sps:$4 sm:$0xff]   ;;  %v5774_v0 = vld [vmem:[#allocation7 + $0x680] ss:$16 sps:$4 sm:$0xff]  }
  0x71   :  { %3712 = vmatpush2.bf16.msra.mxu0 %v5733_v8  ;;  %v209_v62 = vadd.f32 %v208_v50, %v207_v42  ;;  %v196_v2 = vrot.slane %v195_v56, 1  ;;  %v322_v8 = vrot.slane %v321_v63, 1  ;;  %v218_v11 = vadd.f32 %v217_v1, %v216_v55  ;;  %v5767_v55 = vld [vmem:[#allocation7 + $0x4a4] ss:$16 sps:$4 sm:$0xff]  }
  0x72   :  { %3753 = vmatpush2.bf16.msra.mxu1 %v5734_v9  ;;  %3713 = vmatprep.subr.bf16.mxu0 %v5735_v14  ;;  %v308_v3 = vrot.slane %v307_v57, 1  ;;  %v329_v6 = vrot.slane %v328_v61, 1  ;;  %v5752_v9 = vld [vmem:[#allocation7 + $0x300] ss:$16 sps:$4 sm:$0xff]   ;;  %v433_v14 = vmul.f32 0.0625, %v316_v5  ;;  %v449_v20 = vpack.c.bf16 %v417_v10, %v417_v10 }
  0x73   :  { %3754 = vmatprep.subr.bf16.mxu1 %v5737_v19  ;;  %v210_v7 = vrot.slane %v209_v62, 1  ;;  %v197_v12 = vadd.f32 %v196_v2, %v195_v56  ;;  %v323_v17 = vadd.f32 %v322_v8, %v321_v63  ;;  %v5758_v19 = vld [vmem:[#allocation7 + $0x6e4] ss:$16 sps:$4 sm:$0xff]   ;;  %v419_v21 = vmul.f32 0.0625, %v218_v11  ;;  %v5762_v56 = vld [vmem:[#allocation7 + $0x6c0] ss:$16 sps:$4 sm:$0xff]  }
  0x74   :  { %v309_v13 = vadd.f32 %v308_v3, %v307_v57  ;;  %v330_v15 = vadd.f32 %v329_v6, %v328_v61  ;;  %v465_v24 = vpack.c.bf16 %v433_v14, %v433_v14  ;;  %v1047_v28 = vunpack.c.l.b16 %v449_v20  ;;  %v5770_v57 = vld [vmem:[#allocation7 + $0x6a4] ss:$16 sps:$4 sm:$0xff]   ;;  %v5777_v2 = vld [vmem:[#allocation7 + $0x460] ss:$16 sps:$4 sm:$0xff]  }
  0x75   :  { %3714 = vmatpush2.bf16.msra.mxu0 %v5739_v32  ;;  %v211_v16 = vadd.f32 %v210_v7, %v209_v62  ;;  %v416_v22 = vmul.f32 0.0625, %v197_v12  ;;  %v434_v27 = vmul.f32 0.0625, %v323_v17  ;;  %v451_v29 = vpack.c.bf16 %v419_v21, %v419_v21  ;;  %v5776_v61 = vld [vmem:[#allocation7 + $0x684] ss:$16 sps:$4 sm:$0xff]   ;;  %v5771_v62 = vld [vmem:[#allocation7 + $0x480] ss:$16 sps:$4 sm:$0xff]  }
  0x76   :  { %3755 = vmatpush2.bf16.msra.mxu1 %v5740_v33  ;;  %3715 = vmatprep.subr.bf16.mxu0 %v5741_v38  ;;  %v432_v23 = vmul.f32 0.0625, %v309_v13  ;;  %v435_v25 = vmul.f32 0.0625, %v330_v15  ;;  %v1063_v32 = vunpack.c.l.b16 %v465_v24  ;;  %v5779_v63 = vld [vmem:[#allocation7 + $0x464] ss:$16 sps:$4 sm:$0xff]   ;;  %v5783_v6 = vld [vmem:[#allocation7 + $0x440] ss:$16 sps:$4 sm:$0xff]  }
  0x77   :  { %3756 = vmatprep.subr.bf16.mxu1 %v5743_v39  ;;  %v418_v26 = vmul.f32 0.0625, %v211_v16  ;;  %v448_v30 = vpack.c.bf16 %v416_v22, %v416_v22  ;;  %v466_v35 = vpack.c.bf16 %v434_v27, %v434_v27  ;;  %v1049_v36 = vunpack.c.l.b16 %v451_v29  ;;  %v5782_v1 = vld [vmem:[#allocation7 + $0x664] ss:$16 sps:$4 sm:$0xff]   ;;  %v5786_v7 = vld [vmem:[#allocation7 + $0x640] ss:$16 sps:$4 sm:$0xff]   ;;  %v106_v24 = vld [vmem:[#allocation4 + $0x58] sm:$0xff] }
  0x78   :  { %v464_v31 = vpack.c.bf16 %v432_v23, %v432_v23  ;;  %v467_v33 = vpack.c.bf16 %v435_v25, %v435_v25  ;;  %v1080_v39 = vsel %vm1078_vm0, %v1063_v32, %v1047_v28  ;;  %v5785_v3 = vld [vmem:[#allocation7 + $0x444] ss:$16 sps:$4 sm:$0xff]   ;;  %v114_v25 = vld [vmem:[#allocation4 + $0x98] sm:$0xff]  ;;  %v5792_v32 = vld [vmem:[#allocation7 + $0x620] ss:$16 sps:$4 sm:$0xff]  }
  0x79   :  { %3716 = vmatpush2.bf16.msra.mxu0 %v5745_v52  ;;  %v450_v34 = vpack.c.bf16 %v418_v26, %v418_v26  ;;  %v1046_v37 = vunpack.c.l.b16 %v448_v30  ;;  %v1064_v42 = vunpack.c.l.b16 %v466_v35  ;;  %v6654_v43 = vpack.c.b16 %v1080_v39, %v1080_v39  ;;  %v5756_v52 = vld [vmem:[#allocation7 + $0x6e0] ss:$16 sps:$4 sm:$0xff]   ;;  %v5788_v5 = vld [vmem:[#allocation7 + $0x644] ss:$16 sps:$4 sm:$0xff]   ;;  %v122_v26 = vld [vmem:[#allocation4 + $0xd8] sm:$0xff] }
  0x7a   :  { %3757 = vmatpush2.bf16.msra.mxu1 %v5746_v53  ;;  %3717 = vmatprep.subr.bf16.mxu0 %v5747_v58  ;;  %v1062_v38 = vunpack.c.l.b16 %v464_v31  ;;  %v1065_v40 = vunpack.c.l.b16 %v467_v33  ;;  %v5764_v53 = vld [vmem:[#allocation7 + $0x6c4] ss:$16 sps:$4 sm:$0xff]   ;;  %v5765_v58 = vld [vmem:[#allocation7 + $0x4a0] ss:$16 sps:$4 sm:$0xff]   ;;  %v149_v31 = vunpack.c.l.bf16 %v106_v24  ;;  %v165_v35 = vunpack.c.l.bf16 %v114_v25 }
  0x7b   :  { %3758 = vmatprep.subr.bf16.mxu1 %v5749_v59  ;;  %v1048_v41 = vunpack.c.l.b16 %v450_v34  ;;  %3719 = vmatprep.mubr.bf16.mxu0 %v6654_v43  ;;  %v5773_v59 = vld [vmem:[#allocation7 + $0x484] ss:$16 sps:$4 sm:$0xff]   ;;  %v150_v34 = vunpack.c.h.bf16 %v106_v24  ;;  %v181_v39 = vunpack.c.l.bf16 %v122_v26 }
  0x7c   :  { %v1079_v44 = vsel %vm1078_vm0, %v1062_v38, %v1046_v37  ;;  %v1082_v46 = vsel %vm1078_vm0, %v1065_v40, %v1049_v36  ;;  %v5791_v8 = vld [vmem:[#allocation7 + $0x424] ss:$16 sps:$4 sm:$0xff]   ;;  %v166_v36 = vunpack.c.h.bf16 %v114_v25  ;;  %v182_v40 = vunpack.c.h.bf16 %v122_v26 }
  0x7d   :  { %3718 = vmatpush2.bf16.msra.mxu0 %v5751_v4  ;;  %v6658_v47 = vpack.c.b16 %v1079_v44, %v1079_v44  ;;  %v1081_v48 = vsel %vm1078_vm0, %v1064_v42, %v1048_v41  ;;  %v6662_v50 = vpack.c.b16 %v1082_v46, %v1082_v46  ;;  %v5780_v4 = vld [vmem:[#allocation7 + $0x660] ss:$16 sps:$4 sm:$0xff]   ;;  %v5794_v10 = vld [vmem:[#allocation7 + $0x624] ss:$16 sps:$4 sm:$0xff]  }
  0x7e   :  { %3759 = vmatpush2.bf16.msra.mxu1 %v5752_v9  ;;  %3769 = vmatprep.subr.bf16.mxu0 %v5755_v18  ;;  %v6664_v51 = vpack.c.b16 %v1081_v48, %v1081_v48  ;;  %v5789_v9 = vld [vmem:[#allocation7 + $0x420] ss:$16 sps:$4 sm:$0xff]   ;;  %v5797_v27 = vld [vmem:[#allocation7 + $0x404] ss:$16 sps:$4 sm:$0xff]  }
  0x7f   :  { %3810 = vmatprep.subr.bf16.mxu1 %v5758_v19  ;;  %3760 = vmatprep.mubr.bf16.mxu1 %v6662_v50  ;;  %v97_v11 = vld [vmem:[#allocation4 + $0x10] sm:$0xff]  ;;  %v98_v19 = vld [vmem:[#allocation4 + $0x18] sm:$0xff] }
  0x80   :  { %3720 = vmatmul.mubr.bf16.vlgmr.msra.gmra.mxu0 %v6658_v47  ;;  %v105_v12 = vld [vmem:[#allocation4 + $0x50] sm:$0xff]  ;;  %v131_v15 = vunpack.c.l.bf16 %v97_v11  ;;  %v132_v16 = vunpack.c.h.bf16 %v97_v11  ;;  %v133_v29 = vunpack.c.l.bf16 %v98_v19  ;;  %v134_v30 = vunpack.c.h.bf16 %v98_v19 }
  0x81   :  { %3770 = vmatpush1.bf16.msra.mxu0 %v5753_v45  ;;  %3761 = vmatmul.mubr.bf16.vlgmr.msra.gmra.mxu1 %v6664_v51  ;;  %v113_v13 = vld [vmem:[#allocation4 + $0x90] sm:$0xff]  ;;  %v147_v17 = vunpack.c.l.bf16 %v105_v12  ;;  %v148_v18 = vunpack.c.h.bf16 %v105_v12 }
  0x82   :  { %3771 = vmatprep.subr.bf16.mxu0 %v5761_v49  ;;  %3811 = vmatpush1.bf16.msra.mxu1 %v5756_v52  ;;  %v121_v14 = vld [vmem:[#allocation4 + $0xd0] sm:$0xff]  ;;  %v163_v20 = vunpack.c.l.bf16 %v113_v13  ;;  %v164_v21 = vunpack.c.h.bf16 %v113_v13  ;;  %v240_v45 = vadd.f32 %v150_v34, %v134_v30  ;;  %v233_v48 = vadd.f32 %v149_v31, %v133_v29 }
  0x83   :  { %3812 = vmatprep.subr.bf16.mxu1 %v5764_v53  ;;  %v179_v22 = vunpack.c.l.bf16 %v121_v14  ;;  %v180_v23 = vunpack.c.h.bf16 %v121_v14  ;;  %v226_v28 = vadd.f32 %v148_v18, %v132_v16  ;;  %v5800_v37 = vld [vmem:[#allocation7 + $0x604] ss:$16 sps:$4 sm:$0xff]   ;;  %v219_v41 = vadd.f32 %v147_v17, %v131_v15  ;;  %v5795_v42 = vld [vmem:[#allocation7 + $0x400] ss:$16 sps:$4 sm:$0xff]  }
  0x84   :  { %v5803_v49 = vld [vmem:[#allocation7 + $0x5e4] ss:$16 sps:$4 sm:$0xff]   ;;  %v352_v53 = vadd.f32 %v182_v40, %v166_v36  ;;  %v5804_v12 = vld [vmem:[#allocation7 + $0x7e0] ss:$16 sps:$4 sm:$0xff]  }
  0x85   :  { %3772 = vmatpush1.bf16.msra.mxu0 %v5759_v54  ;;  %v338_v33 = vadd.f32 %v180_v23, %v164_v21  ;;  %v227_v38 = vrot.slane %v226_v28, 4  ;;  %v331_v46 = vadd.f32 %v179_v22, %v163_v20  ;;  %v220_v54 = vrot.slane %v219_v41, 4  ;;  %v5812_v17 = vld [vmem:[#allocation7 + $0x7c4] ss:$16 sps:$4 sm:$0xff]   ;;  %v5807_v21 = vld [vmem:[#allocation7 + $0x5c0] ss:$16 sps:$4 sm:$0xff]  }
  0x86   :  { %3773 = vmatprep.subr.bf16.mxu0 %v5767_v55  ;;  %3813 = vmatpush1.bf16.msra.mxu1 %v5762_v56  ;;  %v345_v55 = vadd.f32 %v181_v39, %v165_v35  ;;  %v5798_v56 = vld [vmem:[#allocation7 + $0x600] ss:$16 sps:$4 sm:$0xff]   ;;  %v5815_v26 = vld [vmem:[#allocation7 + $0x5a4] ss:$16 sps:$4 sm:$0xff]  }
  0x87   :  { %3814 = vmatprep.subr.bf16.mxu1 %v5770_v57  ;;  %v339_v44 = vrot.slane %v338_v33, 4  ;;  %v228_v52 = vadd.f32 %v227_v38, %v226_v28  ;;  %v5810_v29 = vld [vmem:[#allocation7 + $0x7c0] ss:$16 sps:$4 sm:$0xff]   ;;  %v5818_v35 = vld [vmem:[#allocation7 + $0x7a4] ss:$16 sps:$4 sm:$0xff]  }
  0x88   :  { %v5813_v30 = vld [vmem:[#allocation7 + $0x5a0] ss:$16 sps:$4 sm:$0xff]  }
  0x89   :  { %3774 = vmatpush1.bf16.msra.mxu0 %v5765_v58  ;;  %v340_v57 = vadd.f32 %v339_v44, %v338_v33  ;;  %v241_v58 = vrot.slane %v240_v45, 4 }
  0x8a   :  { %3775 = vmatprep.subr.bf16.mxu0 %v5773_v59  ;;  %3815 = vmatpush1.bf16.msra.mxu1 %v5768_v60  ;;  %v332_v59 = vrot.slane %v331_v46, 4  ;;  %v234_v60 = vrot.slane %v233_v48, 4 }
  0x8b   :  { %3816 = vmatprep.subr.bf16.mxu1 %v5776_v61  ;;  %v5806_v61 = vld [vmem:[#allocation7 + $0x7e4] ss:$16 sps:$4 sm:$0xff]  }
  0x8d   :  { %3776 = vmatpush1.bf16.msra.mxu0 %v5771_v62  ;;  %v229_v62 = vrot.slane %v228_v52, 2 }
  0x8e   :  { %3777 = vmatprep.subr.bf16.mxu0 %v5779_v63  ;;  %3817 = vmatpush1.bf16.msra.mxu1 %v5774_v0  ;;  %v353_v63 = vrot.slane %v352_v53, 4  ;;  %v221_v0 = vadd.f32 %v220_v54, %v219_v41  ;;  %v5824_v54 = vld [vmem:[#allocation7 + $0x784] ss:$16 sps:$4 sm:$0xff]  }
  0x8f   :  { %3818 = vmatprep.subr.bf16.mxu1 %v5782_v1  ;;  %v346_v1 = vrot.slane %v345_v55, 4 }
  0x91   :  { %3778 = vmatpush1.bf16.msra.mxu0 %v5777_v2  ;;  %v5801_v2 = vld [vmem:[#allocation7 + $0x5e0] ss:$16 sps:$4 sm:$0xff]   ;;  %v347_v11 = vadd.f32 %v346_v1, %v345_v55 }
  0x92   :  { %3779 = vmatprep.subr.bf16.mxu0 %v5785_v3  ;;  %3819 = vmatpush1.bf16.msra.mxu1 %v5780_v4  ;;  %v341_v3 = vrot.slane %v340_v57, 2  ;;  %v242_v4 = vadd.f32 %v241_v58, %v240_v45 }
  0x93   :  { %3820 = vmatprep.subr.bf16.mxu1 %v5788_v5  ;;  %v333_v5 = vadd.f32 %v332_v59, %v331_v46  ;;  %v348_v20 = vrot.slane %v347_v11, 2  ;;  %v5816_v46 = vld [vmem:[#allocation7 + $0x7a0] ss:$16 sps:$4 sm:$0xff]  }
  0x94   :  { %v342_v13 = vadd.f32 %v341_v3, %v340_v57  ;;  %v243_v14 = vrot.slane %v242_v4, 2  ;;  %v5819_v57 = vld [vmem:[#allocation7 + $0x580] ss:$16 sps:$4 sm:$0xff]  }
  0x95   :  { %3780 = vmatpush1.bf16.msra.mxu0 %v5783_v6  ;;  %v235_v6 = vadd.f32 %v234_v60, %v233_v48  ;;  %v334_v15 = vrot.slane %v333_v5, 2  ;;  %v349_v34 = vadd.f32 %v348_v20, %v347_v11  ;;  %v5833_v11 = vld [vmem:[#allocation7 + $0x544] ss:$16 sps:$4 sm:$0xff]  }
  0x96   :  { %3781 = vmatprep.subr.bf16.mxu0 %v5791_v8  ;;  %3821 = vmatpush1.bf16.msra.mxu1 %v5786_v7  ;;  %v5809_v7 = vld [vmem:[#allocation7 + $0x5c4] ss:$16 sps:$4 sm:$0xff]   ;;  %v230_v8 = vadd.f32 %v229_v62, %v228_v52  ;;  %v343_v22 = vrot.slane %v342_v13, 1  ;;  %v244_v23 = vadd.f32 %v243_v14, %v242_v4 }
  0x97   :  { %3822 = vmatprep.subr.bf16.mxu1 %v5794_v10  ;;  %v222_v10 = vrot.slane %v221_v0, 2  ;;  %v236_v16 = vrot.slane %v235_v6, 2  ;;  %v335_v25 = vadd.f32 %v334_v15, %v333_v5  ;;  %v5827_v62 = vld [vmem:[#allocation7 + $0x564] ss:$16 sps:$4 sm:$0xff]  }
  0x98   :  { %v231_v18 = vrot.slane %v230_v8, 1  ;;  %v344_v31 = vadd.f32 %v343_v22, %v342_v13  ;;  %v5830_v5 = vld [vmem:[#allocation7 + $0x764] ss:$16 sps:$4 sm:$0xff]   ;;  %v5828_v13 = vld [vmem:[#allocation7 + $0x760] ss:$16 sps:$4 sm:$0xff]  }
  0x99   :  { %3782 = vmatpush1.bf16.msra.mxu0 %v5789_v9  ;;  %v354_v9 = vadd.f32 %v353_v63, %v352_v53  ;;  %v223_v24 = vadd.f32 %v222_v10, %v221_v0  ;;  %v237_v33 = vadd.f32 %v236_v16, %v235_v6  ;;  %v336_v41 = vrot.slane %v335_v25, 1  ;;  %v5822_v0 = vld [vmem:[#allocation7 + $0x780] ss:$16 sps:$4 sm:$0xff]  }
  0x9a   :  { %3783 = vmatprep.subr.bf16.mxu0 %v5797_v27  ;;  %3823 = vmatpush1.bf16.msra.mxu1 %v5792_v32  ;;  %v232_v27 = vadd.f32 %v231_v18, %v230_v8  ;;  %v245_v32 = vrot.slane %v244_v23, 1  ;;  %v437_v38 = vmul.f32 0.0625, %v344_v31  ;;  %v350_v53 = vrot.slane %v349_v34, 1  ;;  %v5825_v8 = vld [vmem:[#allocation7 + $0x560] ss:$16 sps:$4 sm:$0xff]  }
  0x9b   :  { %3824 = vmatprep.subr.bf16.mxu1 %v5800_v37  ;;  %v355_v19 = vrot.slane %v354_v9, 2  ;;  %v224_v40 = vrot.slane %v223_v24, 1  ;;  %v238_v52 = vrot.slane %v237_v33, 1  ;;  %v5831_v18 = vld [vmem:[#allocation7 + $0x540] ss:$16 sps:$4 sm:$0xff]  }
  0x9c   :  { %v421_v36 = vmul.f32 0.0625, %v232_v27  ;;  %v246_v39 = vadd.f32 %v245_v32, %v244_v23  ;;  %v469_v48 = vpack.c.bf16 %v437_v38, %v437_v38  ;;  %v351_v4 = vadd.f32 %v350_v53, %v349_v34  ;;  %v5834_v22 = vld [vmem:[#allocation7 + $0x740] ss:$16 sps:$4 sm:$0xff]   ;;  %v5866_v53 = vld [vmem:[#allocation7 + $0xaa4] ss:$16 sps:$4 sm:$0xff]  }
  0x9d   :  { %3784 = vmatpush1.bf16.msra.mxu0 %v5795_v42  ;;  %v356_v28 = vadd.f32 %v355_v19, %v354_v9  ;;  %v5821_v42 = vld [vmem:[#allocation7 + $0x584] ss:$16 sps:$4 sm:$0xff]   ;;  %v225_v60 = vadd.f32 %v224_v40, %v223_v24  ;;  %v239_v3 = vadd.f32 %v238_v52, %v237_v33  ;;  %v5843_v34 = vld [vmem:[#allocation7 + $0x500] ss:$16 sps:$4 sm:$0xff]  }
  0x9e   :  { %3785 = vmatprep.subr.bf16.mxu0 %v5803_v49  ;;  %3825 = vmatpush1.bf16.msra.mxu1 %v5798_v56  ;;  %v453_v44 = vpack.c.bf16 %v421_v36, %v421_v36  ;;  %v423_v49 = vmul.f32 0.0625, %v246_v39  ;;  %v1067_v58 = vunpack.c.l.b16 %v469_v48  ;;  %v438_v16 = vmul.f32 0.0625, %v351_v4  ;;  %v5848_v33 = vld [vmem:[#allocation7 + $0x704] ss:$16 sps:$4 sm:$0xff]   ;;  %v5855_v48 = vld [vmem:[#allocation7 + $0x8c0] ss:$16 sps:$4 sm:$0xff]  }
  0x9f   :  { %3826 = vmatprep.subr.bf16.mxu1 %v5806_v61  ;;  %v357_v37 = vrot.slane %v356_v28, 1  ;;  %v337_v61 = vadd.f32 %v336_v41, %v335_v25  ;;  %v420_v9 = vmul.f32 0.0625, %v225_v60  ;;  %v422_v15 = vmul.f32 0.0625, %v239_v3  ;;  %v5842_v25 = vld [vmem:[#allocation7 + $0x724] ss:$16 sps:$4 sm:$0xff]  }
  0xa0   :  { %v1051_v55 = vunpack.c.l.b16 %v453_v44  ;;  %v455_v59 = vpack.c.bf16 %v423_v49, %v423_v49  ;;  %v470_v24 = vpack.c.bf16 %v438_v16, %v438_v16  ;;  %v5851_v36 = vld [vmem:[#allocation7 + $0x8e4] ss:$16 sps:$4 sm:$0xff]   ;;  %v5849_v41 = vld [vmem:[#allocation7 + $0x8e0] ss:$16 sps:$4 sm:$0xff]  }
  0xa1   :  { %3786 = vmatpush2.bf16.msra.mxu0 %v5801_v2  ;;  %v358_v45 = vadd.f32 %v357_v37, %v356_v28  ;;  %v436_v10 = vmul.f32 0.0625, %v337_v61  ;;  %v452_v19 = vpack.c.bf16 %v420_v9, %v420_v9  ;;  %v454_v23 = vpack.c.bf16 %v422_v15, %v422_v15  ;;  %v5846_v37 = vld [vmem:[#allocation7 + $0x700] ss:$16 sps:$4 sm:$0xff]   ;;  %v5854_v40 = vld [vmem:[#allocation7 + $0xae4] ss:$16 sps:$4 sm:$0xff]   ;;  %v6695_v61 = vld [vmem:[#allocation4 + $0x28] sm:$0xff] }
  0xa2   :  { %3787 = vmatprep.subr.bf16.mxu0 %v5809_v7  ;;  %3827 = vmatpush2.bf16.msra.mxu1 %v5804_v12  ;;  %v1084_v1 = vsel %vm1078_vm0, %v1067_v58, %v1051_v55  ;;  %v1053_v2 = vunpack.c.l.b16 %v455_v59  ;;  %v1068_v32 = vunpack.c.l.b16 %v470_v24  ;;  %v5857_v44 = vld [vmem:[#allocation7 + $0x8c4] ss:$16 sps:$4 sm:$0xff]   ;;  %v5858_v49 = vld [vmem:[#allocation7 + $0xac0] ss:$16 sps:$4 sm:$0xff]  }
  0xa3   :  { %3828 = vmatprep.subr.bf16.mxu1 %v5812_v17  ;;  %v439_v56 = vmul.f32 0.0625, %v358_v45  ;;  %v6670_v6 = vpack.c.b16 %v1084_v1, %v1084_v1  ;;  %v5836_v17 = vld [vmem:[#allocation7 + $0x744] ss:$16 sps:$4 sm:$0xff]   ;;  %v468_v20 = vpack.c.bf16 %v436_v10, %v436_v10  ;;  %v1050_v27 = vunpack.c.l.b16 %v452_v19  ;;  %v5852_v45 = vld [vmem:[#allocation7 + $0xae0] ss:$16 sps:$4 sm:$0xff]   ;;  %v6701_v1 = vld [vmem:[#allocation4 + $0xa8] sm:$0xff] }
  0xa4   :  { %v1052_v31 = vunpack.c.l.b16 %v454_v23  ;;  %v5863_v52 = vld [vmem:[#allocation7 + $0x8a4] ss:$16 sps:$4 sm:$0xff]   ;;  %v170_v10 = vunpack.c.h.bf16 %v6701_v1  ;;  %v5867_v15 = vld [vmem:[#allocation7 + $0x880] ss:$16 sps:$4 sm:$0xff]  }
  0xa5   :  { %3788 = vmatpush2.bf16.msra.mxu0 %v5807_v21  ;;  %v471_v63 = vpack.c.bf16 %v439_v56, %v439_v56  ;;  %3801 = vmatprep.mubr.bf16.mxu0 %v6670_v6  ;;  %v5839_v21 = vld [vmem:[#allocation7 + $0x524] ss:$16 sps:$4 sm:$0xff]   ;;  %v1066_v28 = vunpack.c.l.b16 %v468_v20 }
  0xa6   :  { %3789 = vmatprep.subr.bf16.mxu0 %v5815_v26  ;;  %3829 = vmatpush2.bf16.msra.mxu1 %v5810_v29  ;;  %v5837_v26 = vld [vmem:[#allocation7 + $0x520] ss:$16 sps:$4 sm:$0xff]   ;;  %v5845_v29 = vld [vmem:[#allocation7 + $0x504] ss:$16 sps:$4 sm:$0xff]   ;;  %v1085_v38 = vsel %vm1078_vm0, %v1068_v32, %v1052_v31 }
  0xa7   :  { %3830 = vmatprep.subr.bf16.mxu1 %v5818_v35  ;;  %v1069_v7 = vunpack.c.l.b16 %v471_v63  ;;  %v1083_v35 = vsel %vm1078_vm0, %v1066_v28, %v1050_v27  ;;  %v6685_v55 = vld [vmem:[#allocation4 + $0x20] sm:$0xff] }
  0xa8   :  { %v6679_v39 = vpack.c.b16 %v1083_v35, %v1083_v35  ;;  %v6687_v56 = vld [vmem:[#allocation4 + $0x60] sm:$0xff]  ;;  %v136_v59 = vunpack.c.h.bf16 %v6685_v55 }
  0xa9   :  { %3790 = vmatpush2.bf16.msra.mxu0 %v5813_v30  ;;  %v1086_v12 = vsel %vm1078_vm0, %v1069_v7, %v1053_v2  ;;  %v5840_v30 = vld [vmem:[#allocation7 + $0x720] ss:$16 sps:$4 sm:$0xff]   ;;  %v152_v60 = vunpack.c.h.bf16 %v6687_v56  ;;  %v6703_v2 = vld [vmem:[#allocation4 + $0xe8] sm:$0xff]  ;;  %v5869_v3 = vld [vmem:[#allocation7 + $0x884] ss:$16 sps:$4 sm:$0xff]  }
  0xaa   :  { %3791 = vmatprep.subr.bf16.mxu0 %v5821_v42  ;;  %3831 = vmatpush2.bf16.msra.mxu1 %v5816_v46  ;;  %v6674_v14 = vpack.c.b16 %v1086_v12, %v1086_v12  ;;  %v6681_v42 = vpack.c.b16 %v1085_v38, %v1085_v38  ;;  %v5860_v46 = vld [vmem:[#allocation7 + $0xac4] ss:$16 sps:$4 sm:$0xff]   ;;  %v5864_v7 = vld [vmem:[#allocation7 + $0xaa0] ss:$16 sps:$4 sm:$0xff]  }
  0xab   :  { %3832 = vmatprep.subr.bf16.mxu1 %v5824_v54  ;;  %v5861_v54 = vld [vmem:[#allocation7 + $0x8a0] ss:$16 sps:$4 sm:$0xff]   ;;  %v254_v4 = vadd.f32 %v152_v60, %v136_v59  ;;  %v5875_v19 = vld [vmem:[#allocation7 + $0x864] ss:$16 sps:$4 sm:$0xff]  }
  0xac   :  { %3842 = vmatprep.mubr.bf16.mxu1 %v6674_v14  ;;  %v6691_v58 = vld [vmem:[#allocation4 + $0xe0] sm:$0xff] }
  0xad   :  { %3792 = vmatpush2.bf16.msra.mxu0 %v5819_v57  ;;  %v6689_v57 = vld [vmem:[#allocation4 + $0xa0] sm:$0xff]  ;;  %v255_v12 = vrot.slane %v254_v4, 4  ;;  %v183_v31 = vunpack.c.l.bf16 %v6691_v58 }
  0xae   :  { %3793 = vmatprep.subr.bf16.mxu0 %v5827_v62  ;;  %3833 = vmatpush2.bf16.msra.mxu1 %v5822_v0  ;;  %v6697_v62 = vld [vmem:[#allocation4 + $0x68] sm:$0xff]  ;;  %v168_v63 = vunpack.c.h.bf16 %v6689_v57  ;;  %v184_v0 = vunpack.c.h.bf16 %v6691_v58  ;;  %v5878_v24 = vld [vmem:[#allocation7 + $0xa64] ss:$16 sps:$4 sm:$0xff]  }
  0xaf   :  { %3834 = vmatprep.subr.bf16.mxu1 %v5830_v5  ;;  %v138_v5 = vunpack.c.h.bf16 %v6695_v61  ;;  %v154_v9 = vunpack.c.h.bf16 %v6697_v62  ;;  %v256_v20 = vadd.f32 %v255_v12, %v254_v4  ;;  %v5887_v58 = vld [vmem:[#allocation7 + $0x824] ss:$16 sps:$4 sm:$0xff]  }
  0xb1   :  { %3794 = vmatpush2.bf16.msra.mxu0 %v5825_v8  ;;  %v366_v8 = vadd.f32 %v184_v0, %v168_v63  ;;  %v257_v27 = vrot.slane %v256_v20, 2 }
  0xb2   :  { %3795 = vmatprep.subr.bf16.mxu0 %v5833_v11  ;;  %3835 = vmatpush2.bf16.msra.mxu1 %v5828_v13  ;;  %v5872_v11 = vld [vmem:[#allocation7 + $0xa84] ss:$16 sps:$4 sm:$0xff]   ;;  %v186_v13 = vunpack.c.h.bf16 %v6703_v2 }
  0xb3   :  { %3836 = vmatprep.subr.bf16.mxu1 %v5836_v17  ;;  %v367_v16 = vrot.slane %v366_v8, 4  ;;  %v268_v17 = vadd.f32 %v154_v9, %v138_v5  ;;  %v258_v35 = vadd.f32 %v257_v27, %v256_v20  ;;  %v5885_v5 = vld [vmem:[#allocation7 + $0x820] ss:$16 sps:$4 sm:$0xff]   ;;  %v5896_v20 = vld [vmem:[#allocation7 + $0xa04] ss:$16 sps:$4 sm:$0xff]  }
  0xb5   :  { %3796 = vmatpush2.bf16.msra.mxu0 %v5831_v18  ;;  %v5870_v18 = vld [vmem:[#allocation7 + $0xa80] ss:$16 sps:$4 sm:$0xff]   ;;  %v269_v23 = vrot.slane %v268_v17, 4 }
  0xb6   :  { %3797 = vmatprep.subr.bf16.mxu0 %v5839_v21  ;;  %3837 = vmatpush2.bf16.msra.mxu1 %v5834_v22  ;;  %v380_v21 = vadd.f32 %v186_v13, %v170_v10  ;;  %v368_v22 = vadd.f32 %v367_v16, %v366_v8 }
  0xb7   :  { %3838 = vmatprep.subr.bf16.mxu1 %v5842_v25  ;;  %v135_v25 = vunpack.c.l.bf16 %v6685_v55 }
  0xb8   :  { %v381_v28 = vrot.slane %v380_v21, 4  ;;  %v369_v32 = vrot.slane %v368_v22, 2 }
  0xb9   :  { %3798 = vmatpush2.bf16.msra.mxu0 %v5837_v26  ;;  %v151_v26 = vunpack.c.l.bf16 %v6687_v56 }
  0xba   :  { %3799 = vmatprep.subr.bf16.mxu0 %v5845_v29  ;;  %3839 = vmatpush2.bf16.msra.mxu1 %v5840_v30  ;;  %v5873_v29 = vld [vmem:[#allocation7 + $0x860] ss:$16 sps:$4 sm:$0xff]   ;;  %v167_v30 = vunpack.c.l.bf16 %v6689_v57  ;;  %v382_v38 = vadd.f32 %v381_v28, %v380_v21  ;;  %v5899_v28 = vld [vmem:[#allocation7 + $0x9e4] ss:$16 sps:$4 sm:$0xff]  }
  0xbb   :  { %3840 = vmatprep.subr.bf16.mxu1 %v5848_v33  ;;  %v270_v33 = vadd.f32 %v269_v23, %v268_v17  ;;  %v247_v56 = vadd.f32 %v151_v26, %v135_v25  ;;  %v5891_v23 = vld [vmem:[#allocation7 + $0x800] ss:$16 sps:$4 sm:$0xff]  }
  0xbc   :  { %v359_v57 = vadd.f32 %v183_v31, %v167_v30  ;;  %v5894_v30 = vld [vmem:[#allocation7 + $0xa00] ss:$16 sps:$4 sm:$0xff]  }
  0xbd   :  { %3800 = vmatpush2.bf16.msra.mxu0 %v5843_v34  ;;  %v5881_v34 = vld [vmem:[#allocation7 + $0x844] ss:$16 sps:$4 sm:$0xff]   ;;  %v248_v9 = vrot.slane %v247_v56, 4 }
  0xbe   :  { %3851 = vmatprep.subr.bf16.mxu0 %v5851_v36  ;;  %3841 = vmatpush2.bf16.msra.mxu1 %v5846_v37  ;;  %v137_v36 = vunpack.c.l.bf16 %v6695_v61  ;;  %v153_v37 = vunpack.c.l.bf16 %v6697_v62  ;;  %v5882_v61 = vld [vmem:[#allocation7 + $0xa40] ss:$16 sps:$4 sm:$0xff]   ;;  %v360_v10 = vrot.slane %v359_v57, 4 }
  0xbf   :  { %3892 = vmatprep.subr.bf16.mxu1 %v5854_v40  ;;  %v5876_v40 = vld [vmem:[#allocation7 + $0xa60] ss:$16 sps:$4 sm:$0xff]   ;;  %v249_v26 = vadd.f32 %v248_v9, %v247_v56 }
  0xc0   :  { %3802 = vmatmul.mubr.bf16.vlgmr.msra.gmra.mxu0 %v6679_v39  ;;  %v261_v0 = vadd.f32 %v153_v37, %v137_v36  ;;  %v361_v27 = vadd.f32 %v360_v10, %v359_v57  ;;  %v5911_v57 = vld [vmem:[#allocation7 + $0x9a4] ss:$16 sps:$4 sm:$0xff]  }
  0xc1   :  { %3852 = vmatpush1.bf16.msra.mxu0 %v5849_v41  ;;  %3843 = vmatmul.mubr.bf16.vlgmr.msra.gmra.mxu1 %v6681_v42  ;;  %v370_v41 = vadd.f32 %v369_v32, %v368_v22  ;;  %v5923_v10 = vld [vmem:[#allocation7 + $0x964] ss:$16 sps:$4 sm:$0xff]  }
  0xc2   :  { %3853 = vmatprep.subr.bf16.mxu0 %v5857_v44  ;;  %3893 = vmatpush1.bf16.msra.mxu1 %v5852_v45  ;;  %v169_v44 = vunpack.c.l.bf16 %v6701_v1  ;;  %v185_v45 = vunpack.c.l.bf16 %v6703_v2  ;;  %v5890_v2 = vld [vmem:[#allocation7 + $0xa24] ss:$16 sps:$4 sm:$0xff]  }
  0xc3   :  { %3894 = vmatprep.subr.bf16.mxu1 %v5860_v46  ;;  %v271_v46 = vrot.slane %v270_v33, 2 }
  0xc4   :  { %v373_v1 = vadd.f32 %v185_v45, %v169_v44  ;;  %v5905_v44 = vld [vmem:[#allocation7 + $0x9c4] ss:$16 sps:$4 sm:$0xff]  }
  0xc5   :  { %3854 = vmatpush1.bf16.msra.mxu0 %v5855_v48  ;;  %v5884_v48 = vld [vmem:[#allocation7 + $0xa44] ss:$16 sps:$4 sm:$0xff]   ;;  %v272_v55 = vadd.f32 %v271_v46, %v270_v33  ;;  %v5900_v46 = vld [vmem:[#allocation7 + $0xbe0] ss:$16 sps:$4 sm:$0xff]  }
  0xc6   :  { %3855 = vmatprep.subr.bf16.mxu0 %v5863_v52  ;;  %3895 = vmatpush1.bf16.msra.mxu1 %v5858_v49  ;;  %v259_v49 = vrot.slane %v258_v35, 1  ;;  %v383_v52 = vrot.slane %v382_v38, 2 }
  0xc7   :  { %3896 = vmatprep.subr.bf16.mxu1 %v5866_v53  ;;  %v5879_v53 = vld [vmem:[#allocation7 + $0x840] ss:$16 sps:$4 sm:$0xff]   ;;  %v273_v63 = vrot.slane %v272_v55, 1 }
  0xc8   :  { %v260_v59 = vadd.f32 %v259_v49, %v258_v35  ;;  %v384_v60 = vadd.f32 %v383_v52, %v382_v38  ;;  %v5902_v35 = vld [vmem:[#allocation7 + $0xbe4] ss:$16 sps:$4 sm:$0xff]   ;;  %v5897_v38 = vld [vmem:[#allocation7 + $0x9e0] ss:$16 sps:$4 sm:$0xff]  }
  0xc9   :  { %3856 = vmatpush1.bf16.msra.mxu0 %v5861_v54  ;;  %v371_v54 = vrot.slane %v370_v41, 1  ;;  %v274_v8 = vadd.f32 %v273_v63, %v272_v55 }
  0xca   :  { %3857 = vmatprep.subr.bf16.mxu0 %v5869_v3  ;;  %3897 = vmatpush1.bf16.msra.mxu1 %v5864_v7  ;;  %v425_v3 = vmul.f32 0.0625, %v260_v59  ;;  %v385_v4 = vrot.slane %v384_v60, 1 }
  0xcb   :  { %3898 = vmatprep.subr.bf16.mxu1 %v5872_v11  ;;  %v372_v62 = vadd.f32 %v371_v54, %v370_v41  ;;  %v5893_v11 = vld [vmem:[#allocation7 + $0x804] ss:$16 sps:$4 sm:$0xff]   ;;  %v427_v17 = vmul.f32 0.0625, %v274_v8  ;;  %v362_v41 = vrot.slane %v361_v27, 2  ;;  %v5903_v54 = vld [vmem:[#allocation7 + $0x9c0] ss:$16 sps:$4 sm:$0xff]  }
  0xcc   :  { %v457_v12 = vpack.c.bf16 %v425_v3, %v425_v3  ;;  %v386_v13 = vadd.f32 %v385_v4, %v384_v60 }
  0xcd   :  { %3858 = vmatpush1.bf16.msra.mxu0 %v5867_v15  ;;  %v441_v7 = vmul.f32 0.0625, %v372_v62  ;;  %v5888_v15 = vld [vmem:[#allocation7 + $0xa20] ss:$16 sps:$4 sm:$0xff]   ;;  %v459_v25 = vpack.c.bf16 %v427_v17, %v427_v17  ;;  %v363_v56 = vadd.f32 %v362_v41, %v361_v27 }
  0xce   :  { %3859 = vmatprep.subr.bf16.mxu0 %v5875_v19  ;;  %3899 = vmatpush1.bf16.msra.mxu1 %v5870_v18  ;;  %v262_v18 = vrot.slane %v261_v0, 4  ;;  %v374_v19 = vrot.slane %v373_v1, 4  ;;  %v1055_v21 = vunpack.c.l.b16 %v457_v12  ;;  %v443_v22 = vmul.f32 0.0625, %v386_v13  ;;  %v5909_v62 = vld [vmem:[#allocation7 + $0x9a0] ss:$16 sps:$4 sm:$0xff]  }
  0xcf   :  { %3900 = vmatprep.subr.bf16.mxu1 %v5878_v24  ;;  %v473_v16 = vpack.c.bf16 %v441_v7, %v441_v7  ;;  %v1057_v32 = vunpack.c.l.b16 %v459_v25  ;;  %v5915_v7 = vld [vmem:[#allocation7 + $0x980] ss:$16 sps:$4 sm:$0xff]  }
  0xd0   :  { %v263_v33 = vadd.f32 %v262_v18, %v261_v0  ;;  %v364_v0 = vrot.slane %v363_v56, 1  ;;  %v5930_v25 = vld [vmem:[#allocation7 + $0xb40] ss:$16 sps:$4 sm:$0xff]  }
  0xd1   :  { %3860 = vmatpush1.bf16.msra.mxu0 %v5873_v29  ;;  %v1071_v24 = vunpack.c.l.b16 %v473_v16  ;;  %v475_v29 = vpack.c.bf16 %v443_v22, %v443_v22  ;;  %v5921_v16 = vld [vmem:[#allocation7 + $0x960] ss:$16 sps:$4 sm:$0xff]  }
  0xd2   :  { %3861 = vmatprep.subr.bf16.mxu0 %v5881_v34  ;;  %3901 = vmatpush1.bf16.msra.mxu1 %v5876_v40  ;;  %v375_v34 = vadd.f32 %v374_v19, %v373_v1  ;;  %v250_v40 = vrot.slane %v249_v26, 2  ;;  %v264_v49 = vrot.slane %v263_v33, 2  ;;  %v5917_v1 = vld [vmem:[#allocation7 + $0x984] ss:$16 sps:$4 sm:$0xff]   ;;  %v365_v9 = vadd.f32 %v364_v0, %v363_v56 }
  0xd3   :  { %3902 = vmatprep.subr.bf16.mxu1 %v5884_v48  ;;  %v1088_v31 = vsel %vm1078_vm0, %v1071_v24, %v1055_v21  ;;  %v1073_v37 = vunpack.c.l.b16 %v475_v29  ;;  %v5929_v19 = vld [vmem:[#allocation7 + $0x944] ss:$16 sps:$4 sm:$0xff]  }
  0xd4   :  { %v6718_v36 = vpack.c.b16 %v1088_v31, %v1088_v31  ;;  %v376_v52 = vrot.slane %v375_v34, 2  ;;  %v251_v55 = vadd.f32 %v250_v40, %v249_v26  ;;  %v265_v59 = vadd.f32 %v264_v49, %v263_v33  ;;  %v5932_v24 = vld [vmem:[#allocation7 + $0xb44] ss:$16 sps:$4 sm:$0xff]   ;;  %v6735_v40 = vld [vmem:[#allocation4 + $0x38] sm:$0xff] }
  0xd5   :  { %3862 = vmatpush1.bf16.msra.mxu0 %v5879_v53  ;;  %v1090_v45 = vsel %vm1078_vm0, %v1073_v37, %v1057_v32  ;;  %v5908_v53 = vld [vmem:[#allocation7 + $0xbc4] ss:$16 sps:$4 sm:$0xff]   ;;  %v440_v18 = vmul.f32 0.0625, %v365_v9  ;;  %v6743_v49 = vld [vmem:[#allocation4 + $0xf8] sm:$0xff]  ;;  %v142_v56 = vunpack.c.h.bf16 %v6735_v40 }
  0xd6   :  { %3863 = vmatprep.subr.bf16.mxu0 %v5887_v58  ;;  %3903 = vmatpush1.bf16.msra.mxu1 %v5882_v61  ;;  %v6722_v48 = vpack.c.b16 %v1090_v45, %v1090_v45  ;;  %v5906_v58 = vld [vmem:[#allocation7 + $0xbc0] ss:$16 sps:$4 sm:$0xff]   ;;  %v377_v60 = vadd.f32 %v376_v52, %v375_v34  ;;  %v5914_v61 = vld [vmem:[#allocation7 + $0xba4] ss:$16 sps:$4 sm:$0xff]   ;;  %v252_v63 = vrot.slane %v251_v55, 1  ;;  %v266_v3 = vrot.slane %v265_v59, 1 }
  0xd7   :  { %3904 = vmatprep.subr.bf16.mxu1 %v5890_v2  ;;  %3883 = vmatprep.mubr.bf16.mxu0 %v6718_v36  ;;  %v5912_v2 = vld [vmem:[#allocation7 + $0xba0] ss:$16 sps:$4 sm:$0xff]   ;;  %v5935_v26 = vld [vmem:[#allocation7 + $0x924] ss:$16 sps:$4 sm:$0xff]   ;;  %v6739_v45 = vld [vmem:[#allocation4 + $0x78] sm:$0xff] }
  0xd8   :  { %3924 = vmatprep.mubr.bf16.mxu1 %v6722_v48  ;;  %v378_v4 = vrot.slane %v377_v60, 1  ;;  %v253_v8 = vadd.f32 %v252_v63, %v251_v55  ;;  %v267_v12 = vadd.f32 %v266_v3, %v265_v59  ;;  %v5938_v29 = vld [vmem:[#allocation7 + $0xb24] ss:$16 sps:$4 sm:$0xff]   ;;  %v5933_v52 = vld [vmem:[#allocation7 + $0x920] ss:$16 sps:$4 sm:$0xff]   ;;  %v158_v59 = vunpack.c.h.bf16 %v6739_v45 }
  0xd9   :  { %3864 = vmatpush1.bf16.msra.mxu0 %v5885_v5  ;;  %v5920_v5 = vld [vmem:[#allocation7 + $0xb84] ss:$16 sps:$4 sm:$0xff]  }
  0xda   :  { %3865 = vmatprep.subr.bf16.mxu0 %v5893_v11  ;;  %3905 = vmatpush1.bf16.msra.mxu1 %v5888_v15  ;;  %v5918_v11 = vld [vmem:[#allocation7 + $0xb80] ss:$16 sps:$4 sm:$0xff]   ;;  %v379_v13 = vadd.f32 %v378_v4, %v377_v60  ;;  %v5926_v15 = vld [vmem:[#allocation7 + $0xb64] ss:$16 sps:$4 sm:$0xff]   ;;  %v424_v17 = vmul.f32 0.0625, %v253_v8  ;;  %v426_v21 = vmul.f32 0.0625, %v267_v12  ;;  %v296_v4 = vadd.f32 %v158_v59, %v142_v56 }
  0xdb   :  { %3906 = vmatprep.subr.bf16.mxu1 %v5896_v20  ;;  %v5924_v20 = vld [vmem:[#allocation7 + $0xb60] ss:$16 sps:$4 sm:$0xff]  }
  0xdc   :  { %v442_v22 = vmul.f32 0.0625, %v379_v13  ;;  %v456_v27 = vpack.c.bf16 %v424_v17, %v424_v17  ;;  %v6727_v31 = vld [vmem:[#allocation4 + $0x70] sm:$0xff]  ;;  %v458_v32 = vpack.c.bf16 %v426_v21, %v426_v21  ;;  %v297_v12 = vrot.slane %v296_v4, 4 }
  0xdd   :  { %3866 = vmatpush1.bf16.msra.mxu0 %v5891_v23  ;;  %v5927_v23 = vld [vmem:[#allocation7 + $0x940] ss:$16 sps:$4 sm:$0xff]  }
  0xde   :  { %3867 = vmatprep.subr.bf16.mxu0 %v5899_v28  ;;  %3907 = vmatpush1.bf16.msra.mxu1 %v5894_v30  ;;  %v472_v28 = vpack.c.bf16 %v440_v18, %v440_v18  ;;  %v6725_v30 = vld [vmem:[#allocation4 + $0x30] sm:$0xff]  ;;  %v474_v33 = vpack.c.bf16 %v442_v22, %v442_v22  ;;  %v298_v21 = vadd.f32 %v297_v12, %v296_v4 }
  0xdf   :  { %3908 = vmatprep.subr.bf16.mxu1 %v5902_v35  ;;  %v6729_v34 = vld [vmem:[#allocation4 + $0xb0] sm:$0xff]  ;;  %v140_v37 = vunpack.c.h.bf16 %v6725_v30 }
  0xe0   :  { %v6731_v35 = vld [vmem:[#allocation4 + $0xf0] sm:$0xff]  ;;  %v172_v41 = vunpack.c.h.bf16 %v6729_v34  ;;  %v1072_v63 = vunpack.c.l.b16 %v474_v33 }
  0xe1   :  { %3868 = vmatpush2.bf16.msra.mxu0 %v5897_v38  ;;  %v156_v38 = vunpack.c.h.bf16 %v6727_v31  ;;  %v5942_v13 = vld [vmem:[#allocation7 + $0xb00] ss:$16 sps:$4 sm:$0xff]  }
  0xe2   :  { %3869 = vmatprep.subr.bf16.mxu0 %v5905_v44  ;;  %3909 = vmatpush2.bf16.msra.mxu1 %v5900_v46  ;;  %v188_v44 = vunpack.c.h.bf16 %v6731_v35  ;;  %v6741_v46 = vld [vmem:[#allocation4 + $0xb8] sm:$0xff]  ;;  %v5945_v22 = vld [vmem:[#allocation7 + $0xce0] ss:$16 sps:$4 sm:$0xff]  }
  0xe3   :  { %3910 = vmatprep.subr.bf16.mxu1 %v5908_v53  ;;  %v1054_v53 = vunpack.c.l.b16 %v456_v27  ;;  %v282_v55 = vadd.f32 %v156_v38, %v140_v37  ;;  %v174_v60 = vunpack.c.h.bf16 %v6741_v46  ;;  %v5956_v37 = vld [vmem:[#allocation7 + $0xec4] ss:$16 sps:$4 sm:$0xff]   ;;  %v5963_v12 = vld [vmem:[#allocation7 + $0xc80] ss:$16 sps:$4 sm:$0xff]  }
  0xe5   :  { %3870 = vmatpush2.bf16.msra.mxu0 %v5903_v54  ;;  %v1070_v54 = vunpack.c.l.b16 %v472_v28  ;;  %v283_v0 = vrot.slane %v282_v55, 4  ;;  %v299_v28 = vrot.slane %v298_v21, 2 }
  0xe6   :  { %3871 = vmatprep.subr.bf16.mxu0 %v5911_v57  ;;  %3911 = vmatpush2.bf16.msra.mxu1 %v5906_v58  ;;  %v5941_v57 = vld [vmem:[#allocation7 + $0x904] ss:$16 sps:$4 sm:$0xff]   ;;  %v394_v58 = vadd.f32 %v188_v44, %v172_v41  ;;  %v5951_v44 = vld [vmem:[#allocation7 + $0xcc0] ss:$16 sps:$4 sm:$0xff]  }
  0xe7   :  { %3912 = vmatprep.subr.bf16.mxu1 %v5914_v61  ;;  %v5936_v61 = vld [vmem:[#allocation7 + $0xb20] ss:$16 sps:$4 sm:$0xff]   ;;  %v284_v8 = vadd.f32 %v283_v0, %v282_v55  ;;  %v300_v41 = vadd.f32 %v299_v28, %v298_v21  ;;  %v187_v28 = vunpack.c.l.bf16 %v6731_v35  ;;  %v5980_v35 = vld [vmem:[#allocation7 + $0xe44] ss:$16 sps:$4 sm:$0xff]  }
  0xe8   :  { %v395_v3 = vrot.slane %v394_v58, 4 }
  0xe9   :  { %3872 = vmatpush2.bf16.msra.mxu0 %v5909_v62  ;;  %v1056_v62 = vunpack.c.l.b16 %v458_v32  ;;  %v301_v56 = vrot.slane %v300_v41, 1 }
  0xea   :  { %3873 = vmatprep.subr.bf16.mxu0 %v5917_v1  ;;  %3913 = vmatpush2.bf16.msra.mxu1 %v5912_v2  ;;  %v190_v1 = vunpack.c.h.bf16 %v6743_v49  ;;  %v5944_v2 = vld [vmem:[#allocation7 + $0xb04] ss:$16 sps:$4 sm:$0xff]  }
  0xeb   :  { %3914 = vmatprep.subr.bf16.mxu1 %v5920_v5  ;;  %v5939_v5 = vld [vmem:[#allocation7 + $0x900] ss:$16 sps:$4 sm:$0xff]  }
  0xec   :  { %v408_v9 = vadd.f32 %v190_v1, %v174_v60  ;;  %v5962_v60 = vld [vmem:[#allocation7 + $0xea4] ss:$16 sps:$4 sm:$0xff]  }
  0xed   :  { %3874 = vmatpush2.bf16.msra.mxu0 %v5915_v7  ;;  %v1087_v7 = vsel %vm1078_vm0, %v1070_v54, %v1054_v53  ;;  %v5959_v54 = vld [vmem:[#allocation7 + $0xca4] ss:$16 sps:$4 sm:$0xff]  }
  0xee   :  { %3875 = vmatprep.subr.bf16.mxu0 %v5923_v10  ;;  %3915 = vmatpush2.bf16.msra.mxu1 %v5918_v11  ;;  %v5947_v10 = vld [vmem:[#allocation7 + $0xce4] ss:$16 sps:$4 sm:$0xff]   ;;  %v396_v11 = vadd.f32 %v395_v3, %v394_v58  ;;  %v409_v17 = vrot.slane %v408_v9, 4  ;;  %v6751_v18 = vpack.c.b16 %v1087_v7, %v1087_v7 }
  0xef   :  { %3916 = vmatprep.subr.bf16.mxu1 %v5926_v15  ;;  %v1089_v15 = vsel %vm1078_vm0, %v1072_v63, %v1056_v62  ;;  %v302_v62 = vadd.f32 %v301_v56, %v300_v41  ;;  %v5957_v63 = vld [vmem:[#allocation7 + $0xca0] ss:$16 sps:$4 sm:$0xff]  }
  0xf0   :  { %v5975_v41 = vld [vmem:[#allocation7 + $0xc40] ss:$16 sps:$4 sm:$0xff]  }
  0xf1   :  { %3876 = vmatpush2.bf16.msra.mxu0 %v5921_v16  ;;  %v285_v16 = vrot.slane %v284_v8, 2  ;;  %v431_v4 = vmul.f32 0.0625, %v302_v62  ;;  %v5987_v62 = vld [vmem:[#allocation7 + $0xc00] ss:$16 sps:$4 sm:$0xff]  }
  0xf2   :  { %3877 = vmatprep.subr.bf16.mxu0 %v5929_v19  ;;  %3917 = vmatpush2.bf16.msra.mxu1 %v5924_v20  ;;  %v5950_v19 = vld [vmem:[#allocation7 + $0xee4] ss:$16 sps:$4 sm:$0xff]   ;;  %v397_v20 = vrot.slane %v396_v11, 2 }
  0xf3   :  { %3918 = vmatprep.subr.bf16.mxu1 %v5932_v24  ;;  %v410_v24 = vadd.f32 %v409_v17, %v408_v9  ;;  %v5968_v9 = vld [vmem:[#allocation7 + $0xe84] ss:$16 sps:$4 sm:$0xff]  }
  0xf4   :  { %v398_v27 = vadd.f32 %v397_v20, %v396_v11  ;;  %v463_v11 = vpack.c.bf16 %v431_v4, %v431_v4 }
  0xf5   :  { %3878 = vmatpush2.bf16.msra.mxu0 %v5927_v23  ;;  %v286_v23 = vadd.f32 %v285_v16, %v284_v8  ;;  %v411_v33 = vrot.slane %v410_v24, 2 }
  0xf6   :  { %3879 = vmatprep.subr.bf16.mxu0 %v5935_v26  ;;  %3919 = vmatpush2.bf16.msra.mxu1 %v5930_v25  ;;  %v6753_v25 = vpack.c.b16 %v1089_v15, %v1089_v15  ;;  %v5953_v26 = vld [vmem:[#allocation7 + $0xcc4] ss:$16 sps:$4 sm:$0xff]   ;;  %v399_v38 = vrot.slane %v398_v27, 1  ;;  %v1061_v17 = vunpack.c.l.b16 %v463_v11  ;;  %v5996_v11 = vld [vmem:[#allocation7 + $0xfe0] ss:$16 sps:$4 sm:$0xff]  }
  0xf7   :  { %3920 = vmatprep.subr.bf16.mxu1 %v5938_v29  ;;  %v5948_v29 = vld [vmem:[#allocation7 + $0xee0] ss:$16 sps:$4 sm:$0xff]   ;;  %v287_v32 = vrot.slane %v286_v23, 1  ;;  %v412_v53 = vadd.f32 %v411_v33, %v410_v24  ;;  %v5971_v15 = vld [vmem:[#allocation7 + $0xc64] ss:$16 sps:$4 sm:$0xff]  }
  0xf8   :  { %v400_v55 = vadd.f32 %v399_v38, %v398_v27  ;;  %v5969_v24 = vld [vmem:[#allocation7 + $0xc60] ss:$16 sps:$4 sm:$0xff]   ;;  %v171_v27 = vunpack.c.l.bf16 %v6729_v34  ;;  %v157_v38 = vunpack.c.l.bf16 %v6739_v45  ;;  %v189_v34 = vunpack.c.l.bf16 %v6743_v49  ;;  %v5986_v45 = vld [vmem:[#allocation7 + $0xe24] ss:$16 sps:$4 sm:$0xff]  }
  0xf9   :  { %3880 = vmatpush2.bf16.msra.mxu0 %v5933_v52  ;;  %v288_v52 = vadd.f32 %v287_v32, %v286_v23  ;;  %v413_v59 = vrot.slane %v412_v53, 1  ;;  %v139_v23 = vunpack.c.l.bf16 %v6725_v30  ;;  %v5977_v32 = vld [vmem:[#allocation7 + $0xc44] ss:$16 sps:$4 sm:$0xff]   ;;  %v141_v30 = vunpack.c.l.bf16 %v6735_v40 }
  0xfa   :  { %3881 = vmatprep.subr.bf16.mxu0 %v5941_v57  ;;  %3921 = vmatpush2.bf16.msra.mxu1 %v5936_v61  ;;  %v5954_v57 = vld [vmem:[#allocation7 + $0xec0] ss:$16 sps:$4 sm:$0xff]   ;;  %v445_v61 = vmul.f32 0.0625, %v400_v55 }
  0xfb   :  { %3922 = vmatprep.subr.bf16.mxu1 %v5944_v2  ;;  %v429_v58 = vmul.f32 0.0625, %v288_v52  ;;  %v414_v1 = vadd.f32 %v413_v59, %v412_v53  ;;  %v5965_v2 = vld [vmem:[#allocation7 + $0xc84] ss:$16 sps:$4 sm:$0xff]   ;;  %v387_v52 = vadd.f32 %v187_v28, %v171_v27  ;;  %v289_v55 = vadd.f32 %v157_v38, %v141_v30  ;;  %v6005_v27 = vld [vmem:[#allocation7 + $0xda0] ss:$16 sps:$4 sm:$0xff]  }
  0xfc   :  { %v477_v3 = vpack.c.bf16 %v445_v61, %v445_v61  ;;  %v5983_v53 = vld [vmem:[#allocation7 + $0xc24] ss:$16 sps:$4 sm:$0xff]  }
  0xfd   :  { %3882 = vmatpush2.bf16.msra.mxu0 %v5939_v5  ;;  %v461_v0 = vpack.c.bf16 %v429_v58, %v429_v58  ;;  %v5960_v5 = vld [vmem:[#allocation7 + $0xea0] ss:$16 sps:$4 sm:$0xff]   ;;  %v447_v8 = vmul.f32 0.0625, %v414_v1  ;;  %v388_v49 = vrot.slane %v387_v52, 4  ;;  %v290_v59 = vrot.slane %v289_v55, 4 }
  0xfe   :  { %3933 = vmatprep.subr.bf16.mxu0 %v5947_v10  ;;  %3923 = vmatpush2.bf16.msra.mxu1 %v5942_v13  ;;  %v1075_v10 = vunpack.c.l.b16 %v477_v3  ;;  %v5984_v58 = vld [vmem:[#allocation7 + $0xe20] ss:$16 sps:$4 sm:$0xff]   ;;  %v5992_v61 = vld [vmem:[#allocation7 + $0xe04] ss:$16 sps:$4 sm:$0xff]  }
  0xff   :  { %3974 = vmatprep.subr.bf16.mxu1 %v5950_v19  ;;  %v1059_v7 = vunpack.c.l.b16 %v461_v0  ;;  %v479_v13 = vpack.c.bf16 %v447_v8, %v447_v8  ;;  %v5966_v19 = vld [vmem:[#allocation7 + $0xe80] ss:$16 sps:$4 sm:$0xff]   ;;  %v389_v0 = vadd.f32 %v388_v49, %v387_v52  ;;  %v5995_v1 = vld [vmem:[#allocation7 + $0xde4] ss:$16 sps:$4 sm:$0xff]   ;;  %v291_v3 = vadd.f32 %v290_v59, %v289_v55 }
 0x100   :  { %3884 = vmatmul.mubr.bf16.vlgmr.msra.gmra.mxu0 %v6751_v18  ;;  %v6014_v52 = vld [vmem:[#allocation7 + $0xf80] ss:$16 sps:$4 sm:$0xff]   ;;  %v6022_v55 = vld [vmem:[#allocation7 + $0xf64] ss:$16 sps:$4 sm:$0xff]  }
 0x101   :  { %3934 = vmatpush1.bf16.msra.mxu0 %v5945_v22  ;;  %3925 = vmatmul.mubr.bf16.vlgmr.msra.gmra.mxu1 %v6753_v25  ;;  %v1092_v16 = vsel %vm1078_vm0, %v1075_v10, %v1059_v7  ;;  %v1077_v21 = vunpack.c.l.b16 %v479_v13  ;;  %v5974_v22 = vld [vmem:[#allocation7 + $0xe64] ss:$16 sps:$4 sm:$0xff]   ;;  %v5993_v7 = vld [vmem:[#allocation7 + $0xde0] ss:$16 sps:$4 sm:$0xff]  }
 0x102   :  { %3935 = vmatprep.subr.bf16.mxu0 %v5953_v26  ;;  %3975 = vmatpush1.bf16.msra.mxu1 %v5948_v29  ;;  %v6758_v20 = vpack.c.b16 %v1092_v16, %v1092_v16  ;;  %v155_v26 = vunpack.c.l.bf16 %v6727_v31  ;;  %v173_v31 = vunpack.c.l.bf16 %v6741_v46  ;;  %v5981_v46 = vld [vmem:[#allocation7 + $0xc20] ss:$16 sps:$4 sm:$0xff]   ;;  %v6001_v10 = vld [vmem:[#allocation7 + $0xdc4] ss:$16 sps:$4 sm:$0xff]  }
 0x103   :  { %3976 = vmatprep.subr.bf16.mxu1 %v5956_v37  ;;  %v1094_v29 = vsel %vm1078_vm0, %v1077_v21, %v1061_v17  ;;  %v5972_v37 = vld [vmem:[#allocation7 + $0xe60] ss:$16 sps:$4 sm:$0xff]   ;;  %v6007_v21 = vld [vmem:[#allocation7 + $0xda4] ss:$16 sps:$4 sm:$0xff]  }
 0x104   :  { %3965 = vmatprep.mubr.bf16.mxu0 %v6758_v20  ;;  %v6766_v33 = vpack.c.b16 %v1094_v29, %v1094_v29  ;;  %v401_v40 = vadd.f32 %v189_v34, %v173_v31  ;;  %v5999_v16 = vld [vmem:[#allocation7 + $0xdc0] ss:$16 sps:$4 sm:$0xff]   ;;  %v6016_v31 = vld [vmem:[#allocation7 + $0xf84] ss:$16 sps:$4 sm:$0xff]  }
 0x105   :  { %3936 = vmatpush1.bf16.msra.mxu0 %v5951_v44  ;;  %v275_v44 = vadd.f32 %v155_v26, %v139_v23  ;;  %v6010_v26 = vld [vmem:[#allocation7 + $0xfa4] ss:$16 sps:$4 sm:$0xff]   ;;  %v6011_v34 = vld [vmem:[#allocation7 + $0xd80] ss:$16 sps:$4 sm:$0xff]  }
 0x106   :  { %3937 = vmatprep.subr.bf16.mxu0 %v5959_v54  ;;  %3977 = vmatpush1.bf16.msra.mxu1 %v5954_v57  ;;  %v5978_v54 = vld [vmem:[#allocation7 + $0xe40] ss:$16 sps:$4 sm:$0xff]   ;;  %v5989_v57 = vld [vmem:[#allocation7 + $0xc04] ss:$16 sps:$4 sm:$0xff]  }
 0x107   :  { %3978 = vmatprep.subr.bf16.mxu1 %v5962_v60  ;;  %4006 = vmatprep.mubr.bf16.mxu1 %v6766_v33  ;;  %v276_v56 = vrot.slane %v275_v44, 4  ;;  %v402_v60 = vrot.slane %v401_v40, 4  ;;  %v6020_v49 = vld [vmem:[#allocation7 + $0xf60] ss:$16 sps:$4 sm:$0xff]   ;;  %v6028_v59 = vld [vmem:[#allocation7 + $0xf44] ss:$16 sps:$4 sm:$0xff]  }
 0x109   :  { %3938 = vmatpush1.bf16.msra.mxu0 %v5957_v63  ;;  %v277_v63 = vadd.f32 %v276_v56, %v275_v44  ;;  %v403_v4 = vadd.f32 %v402_v60, %v401_v40  ;;  %v6019_v44 = vld [vmem:[#allocation7 + $0xd64] ss:$16 sps:$4 sm:$0xff]   ;;  %v6017_v40 = vld [vmem:[#allocation7 + $0xd60] ss:$16 sps:$4 sm:$0xff]   ;;  %v90_v60 = vlaneseq }
 0x10a   :  { %3939 = vmatprep.subr.bf16.mxu0 %v5965_v2  ;;  %3979 = vmatpush1.bf16.msra.mxu1 %v5960_v5  ;;  %v5990_v2 = vld [vmem:[#allocation7 + $0xe00] ss:$16 sps:$4 sm:$0xff]   ;;  %v5998_v5 = vld [vmem:[#allocation7 + $0xfe4] ss:$16 sps:$4 sm:$0xff]  }
 0x10b   :  { %3980 = vmatprep.subr.bf16.mxu1 %v5968_v9  ;;  %v278_v8 = vrot.slane %v277_v63, 2  ;;  %v390_v9 = vrot.slane %v389_v0, 2  ;;  %v404_v13 = vrot.slane %v403_v4, 2  ;;  %v6025_v56 = vld [vmem:[#allocation7 + $0xd44] ss:$16 sps:$4 sm:$0xff]   ;;  %vm6860_vm3 = vcmp.lt.s32.totalorder %v90_v60, 512 }
 0x10d   :  { %3940 = vmatpush1.bf16.msra.mxu0 %v5963_v12  ;;  %v292_v12 = vrot.slane %v291_v3, 2  ;;  %v279_v17 = vadd.f32 %v278_v8, %v277_v63 }
 0x10e   :  { %3941 = vmatprep.subr.bf16.mxu0 %v5971_v15  ;;  %3981 = vmatpush1.bf16.msra.mxu1 %v5966_v19  ;;  %v6004_v15 = vld [vmem:[#allocation7 + $0xfc4] ss:$16 sps:$4 sm:$0xff]   ;;  %v391_v19 = vadd.f32 %v390_v9, %v389_v0 }
 0x10f   :  { %3982 = vmatprep.subr.bf16.mxu1 %v5974_v22  ;;  %v6002_v22 = vld [vmem:[#allocation7 + $0xfc0] ss:$16 sps:$4 sm:$0xff]   ;;  %v293_v23 = vadd.f32 %v292_v12, %v291_v3  ;;  %v280_v28 = vrot.slane %v279_v17, 1  ;;  %v6031_v0 = vld [vmem:[#allocation7 + $0xd24] ss:$16 sps:$4 sm:$0xff]  }
 0x110   :  { %v392_v29 = vrot.slane %v391_v19, 1 }
 0x111   :  { %3942 = vmatpush1.bf16.msra.mxu0 %v5969_v24  ;;  %v405_v24 = vadd.f32 %v404_v13, %v403_v4  ;;  %v294_v30 = vrot.slane %v293_v23, 1  ;;  %v6034_v4 = vld [vmem:[#allocation7 + $0xf24] ss:$16 sps:$4 sm:$0xff]  }
 0x112   :  { %3943 = vmatprep.subr.bf16.mxu0 %v5977_v32  ;;  %3983 = vmatpush1.bf16.msra.mxu1 %v5972_v37  ;;  %v6013_v32 = vld [vmem:[#allocation7 + $0xd84] ss:$16 sps:$4 sm:$0xff]   ;;  %v6008_v37 = vld [vmem:[#allocation7 + $0xfa0] ss:$16 sps:$4 sm:$0xff]  }
 0x113   :  { %3984 = vmatprep.subr.bf16.mxu1 %v5980_v35  ;;  %v406_v38 = vrot.slane %v405_v24, 1  ;;  %v281_v35 = vadd.f32 %v280_v28, %v279_v17  ;;  %v6035_v17 = vld [vmem:[#allocation7 + $0xd00] ss:$16 sps:$4 sm:$0xff]   ;;  %v6046_v28 = vld [vmem:[#allocation7 + $0x2ec] ss:$16 sps:$4 sm:$0xff]  }
 0x115   :  { %3944 = vmatpush1.bf16.msra.mxu0 %v5975_v41  ;;  %v393_v41 = vadd.f32 %v392_v29, %v391_v19  ;;  %v992_v19 = vld [vmem:[#allocation9] ss:$4 sm:$0xf] }
 0x116   :  { %3945 = vmatprep.subr.bf16.mxu0 %v5983_v53  ;;  %3985 = vmatpush1.bf16.msra.mxu1 %v5978_v54  ;;  %v295_v53 = vadd.f32 %v294_v30, %v293_v23  ;;  %v407_v54 = vadd.f32 %v406_v38, %v405_v24  ;;  %v6038_v23 = vld [vmem:[#allocation7 + $0xf00] ss:$16 sps:$4 sm:$0xff]   ;;  %v6049_v30 = vld [vmem:[#allocation7 + $0xcc] ss:$16 sps:$4 sm:$0xff]   ;;  %v6044_v38 = vld [vmem:[#allocation7 + $0x2e8] ss:$16 sps:$4 sm:$0xff]  }
 0x117   :  { %3986 = vmatprep.subr.bf16.mxu1 %v5986_v45  ;;  %v428_v45 = vmul.f32 0.0625, %v281_v35  ;;  %v6052_v35 = vld [vmem:[#allocation7 + $0x2cc] ss:$16 sps:$4 sm:$0xff]  }
 0x119   :  { %3946 = vmatpush1.bf16.msra.mxu0 %v5981_v46  ;;  %v444_v46 = vmul.f32 0.0625, %v393_v41 }
 0x11a   :  { %3947 = vmatprep.subr.bf16.mxu0 %v5989_v57  ;;  %3987 = vmatpush1.bf16.msra.mxu1 %v5984_v58  ;;  %v430_v57 = vmul.f32 0.0625, %v295_v53  ;;  %v446_v58 = vmul.f32 0.0625, %v407_v54  ;;  %v6055_v54 = vld [vmem:[#allocation7 + $0xac] ss:$16 sps:$4 sm:$0xff]  }
 0x11b   :  { %3988 = vmatprep.subr.bf16.mxu1 %v5992_v61  ;;  %v6023_v61 = vld [vmem:[#allocation7 + $0xd40] ss:$16 sps:$4 sm:$0xff]   ;;  %v476_v63 = vpack.c.bf16 %v444_v46, %v444_v46 }
 0x11c   :  { %v478_v3 = vpack.c.bf16 %v446_v58, %v446_v58 }
 0x11d   :  { %3948 = vmatpush1.bf16.msra.mxu0 %v5987_v62  ;;  %v460_v62 = vpack.c.bf16 %v428_v45, %v428_v45  ;;  %v1074_v9 = vunpack.c.l.b16 %v476_v63  ;;  %v6050_v45 = vld [vmem:[#allocation7 + $0x2c8] ss:$16 sps:$4 sm:$0xff]  }
 0x11e   :  { %3949 = vmatprep.subr.bf16.mxu0 %v5995_v1  ;;  %3989 = vmatpush1.bf16.msra.mxu1 %v5990_v2  ;;  %v6026_v1 = vld [vmem:[#allocation7 + $0xf40] ss:$16 sps:$4 sm:$0xff]   ;;  %v462_v2 = vpack.c.bf16 %v430_v57, %v430_v57  ;;  %v1076_v13 = vunpack.c.l.b16 %v478_v3  ;;  %v6070_v3 = vld [vmem:[#allocation7 + $0x26c] ss:$16 sps:$4 sm:$0xff]  }
 0x11f   :  { %3990 = vmatprep.subr.bf16.mxu1 %v5998_v5  ;;  %v6774_v5 = vshrl.u32 %v90_v60, 7  ;;  %v1058_v8 = vunpack.c.l.b16 %v460_v62  ;;  %v6056_v62 = vld [vmem:[#allocation7 + $0x2a8] ss:$16 sps:$4 sm:$0xff]  }
 0x120   :  { %v1060_v12 = vunpack.c.l.b16 %v462_v2  ;;  %v6062_v2 = vld [vmem:[#allocation7 + $0x288] ss:$16 sps:$4 sm:$0xff]  }
 0x121   :  { %3950 = vmatpush2.bf16.msra.mxu0 %v5993_v7  ;;  %v6029_v7 = vld [vmem:[#allocation7 + $0xd20] ss:$16 sps:$4 sm:$0xff]   ;;  %vm4348_vm1 = vcmp.lt.s32.totalorder %v6774_v5, 2  ;;  %v6425_v60 = vld [vmem:[#allocation10 + $0x78] sm:$0xff]  }
 0x122   :  { %3951 = vmatprep.subr.bf16.mxu0 %v6001_v10  ;;  %3991 = vmatpush2.bf16.msra.mxu1 %v5996_v11  ;;  %v6037_v10 = vld [vmem:[#allocation7 + $0xd04] ss:$16 sps:$4 sm:$0xff]   ;;  %v6032_v11 = vld [vmem:[#allocation7 + $0xf20] ss:$16 sps:$4 sm:$0xff]   ;;  %v1093_v24 = vsel %vm1078_vm0, %v1076_v13, %v1060_v12  ;;  %v6074_v12 = vld [vmem:[#allocation7 + $0x248] ss:$16 sps:$4 sm:$0xff]  }
 0x123   :  { %3992 = vmatprep.subr.bf16.mxu1 %v6004_v15  ;;  %v6040_v15 = vld [vmem:[#allocation7 + $0xf04] ss:$16 sps:$4 sm:$0xff]   ;;  %v6082_v13 = vld [vmem:[#allocation7 + $0x22c] ss:$16 sps:$4 sm:$0xff]  }
 0x125   :  { %3952 = vmatpush2.bf16.msra.mxu0 %v5999_v16  ;;  %v6777_v16 = vsub.s32 0, %v6774_v5 }
 0x126   :  { %3953 = vmatprep.subr.bf16.mxu0 %v6007_v21  ;;  %3993 = vmatpush2.bf16.msra.mxu1 %v6002_v22  ;;  %v1091_v21 = vsel %vm1078_vm0, %v1074_v9, %v1058_v8  ;;  %v6043_v22 = vld [vmem:[#allocation7 + $0xec] ss:$16 sps:$4 sm:$0xff]   ;;  %v6068_v8 = vld [vmem:[#allocation7 + $0x268] ss:$16 sps:$4 sm:$0xff]  }
 0x127   :  { %3994 = vmatprep.subr.bf16.mxu1 %v6010_v26  ;;  %v6782_v26 = vsub.s32 1, %v6774_v5  ;;  %v997_v29 = vrot.slane %v992_v19, %v6777_v16  ;;  %v6076_v9 = vld [vmem:[#allocation7 + $0x24c] ss:$16 sps:$4 sm:$0xff]  }
 0x129   :  { %3954 = vmatpush2.bf16.msra.mxu0 %v6005_v27  ;;  %v6784_v27 = vpack.c.b16 %v1091_v21, %v1091_v21  ;;  %v6088_v21 = vld [vmem:[#allocation7 + $0x20c] ss:$16 sps:$4 sm:$0xff]  }
 0x12a   :  { %3955 = vmatprep.subr.bf16.mxu0 %v6013_v32  ;;  %3995 = vmatpush2.bf16.msra.mxu1 %v6008_v37  ;;  %v6041_v32 = vld [vmem:[#allocation7 + $0xe8] ss:$16 sps:$4 sm:$0xff]   ;;  %v6787_v37 = vpack.c.b16 %v1093_v24, %v1093_v24 }
 0x12b   :  { %3996 = vmatprep.subr.bf16.mxu1 %v6016_v31  ;;  %v1001_v31 = vrot.slane %v992_v19, %v6782_v26  ;;  %v6080_v19 = vld [vmem:[#allocation7 + $0x228] ss:$16 sps:$4 sm:$0xff]  }
 0x12c   :  { %v6086_v24 = vld [vmem:[#allocation7 + $0x208] ss:$16 sps:$4 sm:$0xff]  }
 0x12d   :  { %3956 = vmatpush2.bf16.msra.mxu0 %v6011_v34 }
 0x12e   :  { %3957 = vmatprep.subr.bf16.mxu0 %v6019_v44  ;;  %3997 = vmatpush2.bf16.msra.mxu1 %v6014_v52  ;;  %v6047_v44 = vld [vmem:[#allocation7 + $0xc8] ss:$16 sps:$4 sm:$0xff]  }
 0x12f   :  { %3998 = vmatprep.subr.bf16.mxu1 %v6022_v55 }
 0x131   :  { %3958 = vmatpush2.bf16.msra.mxu0 %v6017_v40 }
 0x132   :  { %3959 = vmatprep.subr.bf16.mxu0 %v6025_v56  ;;  %3999 = vmatpush2.bf16.msra.mxu1 %v6020_v49  ;;  %v6058_v49 = vld [vmem:[#allocation7 + $0x2ac] ss:$16 sps:$4 sm:$0xff]  }
 0x133   :  { %4000 = vmatprep.subr.bf16.mxu1 %v6028_v59 }
 0x135   :  { %3960 = vmatpush2.bf16.msra.mxu0 %v6023_v61  ;;  %v6061_v61 = vld [vmem:[#allocation7 + $0x8c] ss:$16 sps:$4 sm:$0xff]  }
 0x136   :  { %3961 = vmatprep.subr.bf16.mxu0 %v6031_v0  ;;  %4001 = vmatpush2.bf16.msra.mxu1 %v6026_v1  ;;  %v6064_v0 = vld [vmem:[#allocation7 + $0x28c] ss:$16 sps:$4 sm:$0xff]   ;;  %v6059_v1 = vld [vmem:[#allocation7 + $0x88] ss:$16 sps:$4 sm:$0xff]  }
 0x137   :  { %4002 = vmatprep.subr.bf16.mxu1 %v6034_v4  ;;  %v6065_v4 = vld [vmem:[#allocation7 + $0x68] ss:$16 sps:$4 sm:$0xff]  }
 0x139   :  { %3962 = vmatpush2.bf16.msra.mxu0 %v6029_v7  ;;  %v6073_v7 = vld [vmem:[#allocation7 + $0x4c] ss:$16 sps:$4 sm:$0xff]  }
 0x13a   :  { %3963 = vmatprep.subr.bf16.mxu0 %v6037_v10  ;;  %4003 = vmatpush2.bf16.msra.mxu1 %v6032_v11  ;;  %v6071_v10 = vld [vmem:[#allocation7 + $0x48] ss:$16 sps:$4 sm:$0xff]   ;;  %v6079_v11 = vld [vmem:[#allocation7 + $0x2c] ss:$16 sps:$4 sm:$0xff]  }
 0x13b   :  { %4004 = vmatprep.subr.bf16.mxu1 %v6040_v15  ;;  %v6077_v15 = vld [vmem:[#allocation7 + $0x28] ss:$16 sps:$4 sm:$0xff]  }
 0x13d   :  { %3964 = vmatpush2.bf16.msra.mxu0 %v6035_v17  ;;  %v6085_v17 = vld [vmem:[#allocation7 + $0xc] ss:$16 sps:$4 sm:$0xff]  }
 0x13e   :  { %4015 = vmatprep.subr.bf16.mxu0 %v6043_v22  ;;  %4005 = vmatpush2.bf16.msra.mxu1 %v6038_v23  ;;  %v6083_v22 = vld [vmem:[#allocation7 + $0x8] ss:$16 sps:$4 sm:$0xff]   ;;  %v6091_v23 = vld [vmem:[#allocation7 + $0x1ec] ss:$16 sps:$4 sm:$0xff]  }
 0x13f   :  { %4056 = vmatprep.subr.bf16.mxu1 %v6046_v28  ;;  %v6094_v28 = vld [vmem:[#allocation7 + $0x3ec] ss:$16 sps:$4 sm:$0xff]  }
 0x140   :  { %v3721_v34 = vpop.f32.mrf.mxu0  ;;  %3966 = vmatmul.mubr.bf16.vlgmr.msra.gmra.mxu0 %v6784_v27 }
 0x141   :  { %v3722_v41 = vadd.f32 %v3721_v34, %v997_v29  ;;  %4016 = vmatpush1.bf16.msra.mxu0 %v6041_v32  ;;  %4047 = vmatprep.mubr.bf16.mxu0 %v6654_v43  ;;  %v3762_v52 = vpop.f32.mrf.mxu1  ;;  %v6053_v43 = vld [vmem:[#allocation7 + $0xa8] ss:$16 sps:$4 sm:$0xff]   ;;  %v6097_v32 = vld [vmem:[#allocation7 + $0x1cc] ss:$16 sps:$4 sm:$0xff]  }
 0x142   :  { %4007 = vmatmul.mubr.bf16.vlgmr.msra.gmra.mxu1 %v6787_v37  ;;  %v3723_v53 = vpop.f32.mrf.mxu0  ;;  %4017 = vmatprep.subr.bf16.mxu0 %v6049_v30  ;;  %v6089_v29 = vld [vmem:[#allocation7 + $0x1e8] ss:$16 sps:$4 sm:$0xff]   ;;  %v6103_v34 = vld [vmem:[#allocation7 + $0x1ac] ss:$16 sps:$4 sm:$0xff]  }
 0x143   :  { %v6793_v55 = vadd.f32 %v3762_v52, %v3722_v41  ;;  %4057 = vmatpush1.bf16.msra.mxu1 %v6044_v38  ;;  %v3724_v40 = vadd.f32 %v3723_v53, %v1001_v31  ;;  %4088 = vmatprep.mubr.bf16.mxu1 %v6662_v50  ;;  %v3764_v46 = vpop.f32.mrf.mxu1  ;;  %v6067_v50 = vld [vmem:[#allocation7 + $0x6c] ss:$16 sps:$4 sm:$0xff]   ;;  %v6092_v30 = vld [vmem:[#allocation7 + $0x3e8] ss:$16 sps:$4 sm:$0xff]  }
 0x144   :  { %v3725_v56 = vpop.f32.mrf.mxu0  ;;  %4058 = vmatprep.subr.bf16.mxu1 %v6052_v35  ;;  %v6100_v38 = vld [vmem:[#allocation7 + $0x3cc] ss:$16 sps:$4 sm:$0xff]   ;;  %v6095_v31 = vld [vmem:[#allocation7 + $0x1c8] ss:$16 sps:$4 sm:$0xff]  }
 0x145   :  { %v6796_v57 = vadd.f32 %v3764_v46, %v3724_v40  ;;  %4018 = vmatpush1.bf16.msra.mxu0 %v6047_v44  ;;  %v3766_v58 = vpop.f32.mrf.mxu1  ;;  %v6098_v35 = vld [vmem:[#allocation7 + $0x3c8] ss:$16 sps:$4 sm:$0xff]   ;;  %v6106_v41 = vld [vmem:[#allocation7 + $0x3ac] ss:$16 sps:$4 sm:$0xff]  }
 0x146   :  { %v3726_v59 = vpop.f32.mrf.mxu0  ;;  %4019 = vmatprep.subr.bf16.mxu0 %v6055_v54  ;;  %v6101_v44 = vld [vmem:[#allocation7 + $0x1a8] ss:$16 sps:$4 sm:$0xff]   ;;  %v6109_v52 = vld [vmem:[#allocation7 + $0x18c] ss:$16 sps:$4 sm:$0xff]  }
 0x147   :  { %4059 = vmatpush1.bf16.msra.mxu1 %v6050_v45  ;;  %v3767_v63 = vpop.f32.mrf.mxu1  ;;  %v6104_v53 = vld [vmem:[#allocation7 + $0x3a8] ss:$16 sps:$4 sm:$0xff]   ;;  %v6112_v54 = vld [vmem:[#allocation7 + $0x38c] ss:$16 sps:$4 sm:$0xff]  }
 0x148   :  { %4060 = vmatprep.subr.bf16.mxu1 %v6058_v49  ;;  %v6107_v40 = vld [vmem:[#allocation7 + $0x188] ss:$16 sps:$4 sm:$0xff]   ;;  %v6115_v45 = vld [vmem:[#allocation7 + $0x16c] ss:$16 sps:$4 sm:$0xff]  }
 0x149   :  { %4020 = vmatpush1.bf16.msra.mxu0 %v6053_v43  ;;  %v6110_v46 = vld [vmem:[#allocation7 + $0x388] ss:$16 sps:$4 sm:$0xff]   ;;  %v6118_v56 = vld [vmem:[#allocation7 + $0x36c] ss:$16 sps:$4 sm:$0xff]  }
 0x14a   :  { %4021 = vmatprep.subr.bf16.mxu0 %v6061_v61  ;;  %v6113_v49 = vld [vmem:[#allocation7 + $0x168] ss:$16 sps:$4 sm:$0xff]   ;;  %v6121_v43 = vld [vmem:[#allocation7 + $0x14c] ss:$16 sps:$4 sm:$0xff]  }
 0x14b   :  { %4061 = vmatpush1.bf16.msra.mxu1 %v6056_v62  ;;  %v6116_v58 = vld [vmem:[#allocation7 + $0x368] ss:$16 sps:$4 sm:$0xff]   ;;  %v6124_v61 = vld [vmem:[#allocation7 + $0x34c] ss:$16 sps:$4 sm:$0xff]  }
 0x14c   :  { %4062 = vmatprep.subr.bf16.mxu1 %v6064_v0  ;;  %v6119_v59 = vld [vmem:[#allocation7 + $0x148] ss:$16 sps:$4 sm:$0xff]   ;;  %v6127_v62 = vld [vmem:[#allocation7 + $0x12c] ss:$16 sps:$4 sm:$0xff]  }
 0x14d   :  { %4022 = vmatpush1.bf16.msra.mxu0 %v6059_v1  ;;  %v6122_v63 = vld [vmem:[#allocation7 + $0x348] ss:$16 sps:$4 sm:$0xff]   ;;  %v6130_v1 = vld [vmem:[#allocation7 + $0x32c] ss:$16 sps:$4 sm:$0xff]  }
 0x14e   :  { %4023 = vmatprep.subr.bf16.mxu0 %v6067_v50  ;;  %v6125_v0 = vld [vmem:[#allocation7 + $0x128] ss:$16 sps:$4 sm:$0xff]   ;;  %v6133_v50 = vld [vmem:[#allocation7 + $0x10c] ss:$16 sps:$4 sm:$0xff]  }
 0x14f   :  { %4063 = vmatpush1.bf16.msra.mxu1 %v6062_v2  ;;  %v6128_v2 = vld [vmem:[#allocation7 + $0x328] ss:$16 sps:$4 sm:$0xff]  }
 0x150   :  { %4064 = vmatprep.subr.bf16.mxu1 %v6070_v3  ;;  %v6131_v3 = vld [vmem:[#allocation7 + $0x108] ss:$16 sps:$4 sm:$0xff]  }
 0x151   :  { %4024 = vmatpush1.bf16.msra.mxu0 %v6065_v4  ;;  %v6136_v4 = vld [vmem:[#allocation7 + $0x30c] ss:$16 sps:$4 sm:$0xff]  }
 0x152   :  { %4025 = vmatprep.subr.bf16.mxu0 %v6073_v7  ;;  %v6139_v7 = vld [vmem:[#allocation7 + $0x4ec] ss:$16 sps:$4 sm:$0xff]  }
 0x153   :  { %4065 = vmatpush1.bf16.msra.mxu1 %v6068_v8  ;;  %v6134_v8 = vld [vmem:[#allocation7 + $0x308] ss:$16 sps:$4 sm:$0xff]  }
 0x154   :  { %4066 = vmatprep.subr.bf16.mxu1 %v6076_v9  ;;  %v6137_v9 = vld [vmem:[#allocation7 + $0x4e8] ss:$16 sps:$4 sm:$0xff]  }
 0x155   :  { %4026 = vmatpush1.bf16.msra.mxu0 %v6071_v10  ;;  %v6142_v10 = vld [vmem:[#allocation7 + $0x6ec] ss:$16 sps:$4 sm:$0xff]  }
 0x156   :  { %4027 = vmatprep.subr.bf16.mxu0 %v6079_v11  ;;  %v6145_v11 = vld [vmem:[#allocation7 + $0x4cc] ss:$16 sps:$4 sm:$0xff]  }
 0x157   :  { %4067 = vmatpush1.bf16.msra.mxu1 %v6074_v12  ;;  %v6140_v12 = vld [vmem:[#allocation7 + $0x6e8] ss:$16 sps:$4 sm:$0xff]  }
 0x158   :  { %4068 = vmatprep.subr.bf16.mxu1 %v6082_v13 }
 0x159   :  { %4028 = vmatpush1.bf16.msra.mxu0 %v6077_v15  ;;  %v6143_v15 = vld [vmem:[#allocation7 + $0x4c8] ss:$16 sps:$4 sm:$0xff]  }
 0x15a   :  { %4029 = vmatprep.subr.bf16.mxu0 %v6085_v17  ;;  %v6148_v17 = vld [vmem:[#allocation7 + $0x6cc] ss:$16 sps:$4 sm:$0xff]  }
 0x15b   :  { %4069 = vmatpush1.bf16.msra.mxu1 %v6080_v19 }
 0x15c   :  { %4070 = vmatprep.subr.bf16.mxu1 %v6088_v21  ;;  %v6146_v21 = vld [vmem:[#allocation7 + $0x6c8] ss:$16 sps:$4 sm:$0xff]  }
 0x15d   :  { %4030 = vmatpush1.bf16.msra.mxu0 %v6083_v22  ;;  %v6151_v22 = vld [vmem:[#allocation7 + $0x4ac] ss:$16 sps:$4 sm:$0xff]  }
 0x15e   :  { %4031 = vmatprep.subr.bf16.mxu0 %v6091_v23 }
 0x15f   :  { %4071 = vmatpush1.bf16.msra.mxu1 %v6086_v24 }
 0x160   :  { %4072 = vmatprep.subr.bf16.mxu1 %v6094_v28 }
 0x161   :  { %4032 = vmatpush2.bf16.msra.mxu0 %v6089_v29 }
 0x162   :  { %4033 = vmatprep.subr.bf16.mxu0 %v6097_v32 }
 0x163   :  { %4073 = vmatpush2.bf16.msra.mxu1 %v6092_v30 }
 0x164   :  { %4074 = vmatprep.subr.bf16.mxu1 %v6100_v38  ;;  %v6152_v38 = vld [vmem:[#allocation7 + $0x6a8] ss:$16 sps:$4 sm:$0xff]  }
 0x165   :  { %4034 = vmatpush2.bf16.msra.mxu0 %v6095_v31 }
 0x166   :  { %4035 = vmatprep.subr.bf16.mxu0 %v6103_v34  ;;  %v6157_v34 = vld [vmem:[#allocation7 + $0x48c] ss:$16 sps:$4 sm:$0xff]  }
 0x167   :  { %4075 = vmatpush2.bf16.msra.mxu1 %v6098_v35 }
 0x168   :  { %4076 = vmatprep.subr.bf16.mxu1 %v6106_v41  ;;  %v6155_v41 = vld [vmem:[#allocation7 + $0x488] ss:$16 sps:$4 sm:$0xff]  }
 0x169   :  { %4036 = vmatpush2.bf16.msra.mxu0 %v6101_v44  ;;  %v6163_v44 = vld [vmem:[#allocation7 + $0x46c] ss:$16 sps:$4 sm:$0xff]  }
 0x16a   :  { %4037 = vmatprep.subr.bf16.mxu0 %v6109_v52  ;;  %v6161_v52 = vld [vmem:[#allocation7 + $0x468] ss:$16 sps:$4 sm:$0xff]  }
 0x16b   :  { %4077 = vmatpush2.bf16.msra.mxu1 %v6104_v53  ;;  %v6166_v53 = vld [vmem:[#allocation7 + $0x66c] ss:$16 sps:$4 sm:$0xff]  }
 0x16c   :  { %4078 = vmatprep.subr.bf16.mxu1 %v6112_v54  ;;  %v6164_v54 = vld [vmem:[#allocation7 + $0x668] ss:$16 sps:$4 sm:$0xff]  }
 0x16d   :  { %4038 = vmatpush2.bf16.msra.mxu0 %v6107_v40  ;;  %v6169_v40 = vld [vmem:[#allocation7 + $0x44c] ss:$16 sps:$4 sm:$0xff]  }
 0x16e   :  { %4039 = vmatprep.subr.bf16.mxu0 %v6115_v45  ;;  %v6167_v45 = vld [vmem:[#allocation7 + $0x448] ss:$16 sps:$4 sm:$0xff]  }
 0x16f   :  { %4079 = vmatpush2.bf16.msra.mxu1 %v6110_v46  ;;  %v6172_v46 = vld [vmem:[#allocation7 + $0x64c] ss:$16 sps:$4 sm:$0xff]  }
 0x170   :  { %4080 = vmatprep.subr.bf16.mxu1 %v6118_v56  ;;  %v6170_v56 = vld [vmem:[#allocation7 + $0x648] ss:$16 sps:$4 sm:$0xff]  }
 0x171   :  { %4040 = vmatpush2.bf16.msra.mxu0 %v6113_v49  ;;  %v6175_v49 = vld [vmem:[#allocation7 + $0x42c] ss:$16 sps:$4 sm:$0xff]  }
 0x172   :  { %4041 = vmatprep.subr.bf16.mxu0 %v6121_v43  ;;  %v6178_v43 = vld [vmem:[#allocation7 + $0x62c] ss:$16 sps:$4 sm:$0xff]  }
 0x173   :  { %4081 = vmatpush2.bf16.msra.mxu1 %v6116_v58  ;;  %v6173_v58 = vld [vmem:[#allocation7 + $0x428] ss:$16 sps:$4 sm:$0xff]  }
 0x174   :  { %4082 = vmatprep.subr.bf16.mxu1 %v6124_v61  ;;  %v6176_v61 = vld [vmem:[#allocation7 + $0x628] ss:$16 sps:$4 sm:$0xff]  }
 0x175   :  { %4042 = vmatpush2.bf16.msra.mxu0 %v6119_v59  ;;  %v6181_v59 = vld [vmem:[#allocation7 + $0x40c] ss:$16 sps:$4 sm:$0xff]  }
 0x176   :  { %4043 = vmatprep.subr.bf16.mxu0 %v6127_v62  ;;  %v6179_v62 = vld [vmem:[#allocation7 + $0x408] ss:$16 sps:$4 sm:$0xff]  }
 0x177   :  { %4083 = vmatpush2.bf16.msra.mxu1 %v6122_v63  ;;  %v6184_v63 = vld [vmem:[#allocation7 + $0x60c] ss:$16 sps:$4 sm:$0xff]  }
 0x178   :  { %4084 = vmatprep.subr.bf16.mxu1 %v6130_v1  ;;  %v6182_v1 = vld [vmem:[#allocation7 + $0x608] ss:$16 sps:$4 sm:$0xff]  }
 0x179   :  { %4044 = vmatpush2.bf16.msra.mxu0 %v6125_v0  ;;  %v6187_v0 = vld [vmem:[#allocation7 + $0x5ec] ss:$16 sps:$4 sm:$0xff]  }
 0x17a   :  { %4045 = vmatprep.subr.bf16.mxu0 %v6133_v50  ;;  %v6185_v50 = vld [vmem:[#allocation7 + $0x5e8] ss:$16 sps:$4 sm:$0xff]  }
 0x17b   :  { %4085 = vmatpush2.bf16.msra.mxu1 %v6128_v2  ;;  %v6190_v2 = vld [vmem:[#allocation7 + $0x7ec] ss:$16 sps:$4 sm:$0xff]  }
 0x17c   :  { %4086 = vmatprep.subr.bf16.mxu1 %v6136_v4  ;;  %v6188_v4 = vld [vmem:[#allocation7 + $0x7e8] ss:$16 sps:$4 sm:$0xff]  }
 0x17d   :  { %4046 = vmatpush2.bf16.msra.mxu0 %v6131_v3  ;;  %v6193_v3 = vld [vmem:[#allocation7 + $0x5cc] ss:$16 sps:$4 sm:$0xff]  }
 0x17e   :  { %4097 = vmatprep.subr.bf16.mxu0 %v6139_v7  ;;  %v6191_v7 = vld [vmem:[#allocation7 + $0x5c8] ss:$16 sps:$4 sm:$0xff]  }
 0x17f   :  { %4087 = vmatpush2.bf16.msra.mxu1 %v6134_v8  ;;  %v6196_v8 = vld [vmem:[#allocation7 + $0x7cc] ss:$16 sps:$4 sm:$0xff]  }
 0x180   :  { %v3803_v13 = vpop.f32.mrf.mxu0  ;;  %4048 = vmatmul.mubr.bf16.vlgmr.msra.gmra.mxu0 %v6658_v47  ;;  %4138 = vmatprep.subr.bf16.mxu1 %v6142_v10  ;;  %v6194_v10 = vld [vmem:[#allocation7 + $0x7c8] ss:$16 sps:$4 sm:$0xff]  }
 0x181   :  { %v3804_v19 = vadd.f32 %v3803_v13, %v6793_v55  ;;  %4098 = vmatpush1.bf16.msra.mxu0 %v6137_v9  ;;  %4129 = vmatprep.mubr.bf16.mxu0 %v6670_v6  ;;  %v3844_v23 = vpop.f32.mrf.mxu1  ;;  %v6154_v55 = vld [vmem:[#allocation7 + $0x6ac] ss:$16 sps:$4 sm:$0xff]   ;;  %v6149_v6 = vld [vmem:[#allocation7 + $0x4a8] ss:$16 sps:$4 sm:$0xff]  }
 0x182   :  { %4089 = vmatmul.mubr.bf16.vlgmr.msra.gmra.mxu1 %v6664_v51  ;;  %v3805_v24 = vpop.f32.mrf.mxu0  ;;  %4099 = vmatprep.subr.bf16.mxu0 %v6145_v11  ;;  %v6199_v9 = vld [vmem:[#allocation7 + $0x5ac] ss:$16 sps:$4 sm:$0xff]   ;;  %v6197_v11 = vld [vmem:[#allocation7 + $0x5a8] ss:$16 sps:$4 sm:$0xff]  }
 0x183   :  { %v6802_v28 = vadd.f32 %v3844_v23, %v3804_v19  ;;  %4139 = vmatpush1.bf16.msra.mxu1 %v6140_v12  ;;  %v3806_v47 = vadd.f32 %v3805_v24, %v6796_v57  ;;  %4170 = vmatprep.mubr.bf16.mxu1 %v6674_v14  ;;  %v3846_v29 = vpop.f32.mrf.mxu1  ;;  %v6160_v57 = vld [vmem:[#allocation7 + $0x68c] ss:$16 sps:$4 sm:$0xff]   ;;  %v6158_v14 = vld [vmem:[#allocation7 + $0x688] ss:$16 sps:$4 sm:$0xff]  }
 0x184   :  { %v3807_v32 = vpop.f32.mrf.mxu0  ;;  %4140 = vmatprep.subr.bf16.mxu1 %v6148_v17  ;;  %v6202_v12 = vld [vmem:[#allocation7 + $0x7ac] ss:$16 sps:$4 sm:$0xff]   ;;  %v6203_v17 = vld [vmem:[#allocation7 + $0x588] ss:$16 sps:$4 sm:$0xff]  }
 0x185   :  { %v6806_v30 = vadd.f32 %v3846_v29, %v3806_v47  ;;  %4100 = vmatpush1.bf16.msra.mxu0 %v6143_v15  ;;  %v3848_v31 = vpop.f32.mrf.mxu1  ;;  %v6205_v13 = vld [vmem:[#allocation7 + $0x58c] ss:$16 sps:$4 sm:$0xff]   ;;  %v6200_v15 = vld [vmem:[#allocation7 + $0x7a8] ss:$16 sps:$4 sm:$0xff]  }
 0x186   :  { %v3808_v51 = vpop.f32.mrf.mxu0  ;;  %4101 = vmatprep.subr.bf16.mxu0 %v6151_v22  ;;  %v6208_v19 = vld [vmem:[#allocation7 + $0x78c] ss:$16 sps:$4 sm:$0xff]   ;;  %v6206_v22 = vld [vmem:[#allocation7 + $0x788] ss:$16 sps:$4 sm:$0xff]  }
 0x187   :  { %4141 = vmatpush1.bf16.msra.mxu1 %v6146_v21  ;;  %v3849_v35 = vpop.f32.mrf.mxu1  ;;  %v6211_v21 = vld [vmem:[#allocation7 + $0x56c] ss:$16 sps:$4 sm:$0xff]   ;;  %v6209_v23 = vld [vmem:[#allocation7 + $0x568] ss:$16 sps:$4 sm:$0xff]  }
 0x188   :  { %4142 = vmatprep.subr.bf16.mxu1 %v6154_v55  ;;  %v6214_v24 = vld [vmem:[#allocation7 + $0x76c] ss:$16 sps:$4 sm:$0xff]   ;;  %v6212_v29 = vld [vmem:[#allocation7 + $0x768] ss:$16 sps:$4 sm:$0xff]  }
 0x189   :  { %4102 = vmatpush1.bf16.msra.mxu0 %v6149_v6  ;;  %v6217_v47 = vld [vmem:[#allocation7 + $0x54c] ss:$16 sps:$4 sm:$0xff]   ;;  %v6215_v32 = vld [vmem:[#allocation7 + $0x548] ss:$16 sps:$4 sm:$0xff]  }
 0x18a   :  { %4103 = vmatprep.subr.bf16.mxu0 %v6157_v34  ;;  %v6220_v55 = vld [vmem:[#allocation7 + $0x74c] ss:$16 sps:$4 sm:$0xff]   ;;  %v6221_v31 = vld [vmem:[#allocation7 + $0x528] ss:$16 sps:$4 sm:$0xff]  }
 0x18b   :  { %4143 = vmatpush1.bf16.msra.mxu1 %v6152_v38  ;;  %v6223_v6 = vld [vmem:[#allocation7 + $0x52c] ss:$16 sps:$4 sm:$0xff]   ;;  %v6218_v38 = vld [vmem:[#allocation7 + $0x748] ss:$16 sps:$4 sm:$0xff]  }
 0x18c   :  { %4144 = vmatprep.subr.bf16.mxu1 %v6160_v57  ;;  %v6226_v51 = vld [vmem:[#allocation7 + $0x72c] ss:$16 sps:$4 sm:$0xff]   ;;  %v6224_v35 = vld [vmem:[#allocation7 + $0x728] ss:$16 sps:$4 sm:$0xff]  }
 0x18d   :  { %4104 = vmatpush1.bf16.msra.mxu0 %v6155_v41  ;;  %v6229_v34 = vld [vmem:[#allocation7 + $0x50c] ss:$16 sps:$4 sm:$0xff]   ;;  %v6227_v57 = vld [vmem:[#allocation7 + $0x508] ss:$16 sps:$4 sm:$0xff]  }
 0x18e   :  { %4105 = vmatprep.subr.bf16.mxu0 %v6163_v44  ;;  %v6232_v41 = vld [vmem:[#allocation7 + $0x70c] ss:$16 sps:$4 sm:$0xff]   ;;  %v6230_v44 = vld [vmem:[#allocation7 + $0x708] ss:$16 sps:$4 sm:$0xff]  }
 0x18f   :  { %4145 = vmatpush1.bf16.msra.mxu1 %v6158_v14  ;;  %v6235_v14 = vld [vmem:[#allocation7 + $0x8ec] ss:$16 sps:$4 sm:$0xff]  }
 0x190   :  { %4146 = vmatprep.subr.bf16.mxu1 %v6166_v53  ;;  %v6233_v53 = vld [vmem:[#allocation7 + $0x8e8] ss:$16 sps:$4 sm:$0xff]  }
 0x191   :  { %4106 = vmatpush1.bf16.msra.mxu0 %v6161_v52  ;;  %v6238_v52 = vld [vmem:[#allocation7 + $0xaec] ss:$16 sps:$4 sm:$0xff]  }
 0x192   :  { %4107 = vmatprep.subr.bf16.mxu0 %v6169_v40  ;;  %v6236_v40 = vld [vmem:[#allocation7 + $0xae8] ss:$16 sps:$4 sm:$0xff]  }
 0x193   :  { %4147 = vmatpush1.bf16.msra.mxu1 %v6164_v54  ;;  %v6241_v54 = vld [vmem:[#allocation7 + $0x8cc] ss:$16 sps:$4 sm:$0xff]  }
 0x194   :  { %4148 = vmatprep.subr.bf16.mxu1 %v6172_v46  ;;  %v6244_v46 = vld [vmem:[#allocation7 + $0xacc] ss:$16 sps:$4 sm:$0xff]  }
 0x195   :  { %4108 = vmatpush1.bf16.msra.mxu0 %v6167_v45 }
 0x196   :  { %4109 = vmatprep.subr.bf16.mxu0 %v6175_v49  ;;  %v6239_v49 = vld [vmem:[#allocation7 + $0x8c8] ss:$16 sps:$4 sm:$0xff]  }
 0x197   :  { %4149 = vmatpush1.bf16.msra.mxu1 %v6170_v56 }
 0x198   :  { %4150 = vmatprep.subr.bf16.mxu1 %v6178_v43 }
 0x199   :  { %4110 = vmatpush1.bf16.msra.mxu0 %v6173_v58 }
 0x19a   :  { %4111 = vmatprep.subr.bf16.mxu0 %v6181_v59  ;;  %v6247_v59 = vld [vmem:[#allocation7 + $0x8ac] ss:$16 sps:$4 sm:$0xff]  }
 0x19b   :  { %4151 = vmatpush1.bf16.msra.mxu1 %v6176_v61 }
 0x19c   :  { %4152 = vmatprep.subr.bf16.mxu1 %v6184_v63 }
 0x19d   :  { %4112 = vmatpush1.bf16.msra.mxu0 %v6179_v62 }
 0x19e   :  { %4113 = vmatprep.subr.bf16.mxu0 %v6187_v0  ;;  %v6250_v0 = vld [vmem:[#allocation7 + $0xaac] ss:$16 sps:$4 sm:$0xff]  }
 0x19f   :  { %4153 = vmatpush1.bf16.msra.mxu1 %v6182_v1 }
 0x1a0   :  { %4154 = vmatprep.subr.bf16.mxu1 %v6190_v2  ;;  %v6253_v2 = vld [vmem:[#allocation7 + $0x88c] ss:$16 sps:$4 sm:$0xff]  }
 0x1a1   :  { %4114 = vmatpush2.bf16.msra.mxu0 %v6185_v50 }
 0x1a2   :  { %4115 = vmatprep.subr.bf16.mxu0 %v6193_v3  ;;  %v6248_v3 = vld [vmem:[#allocation7 + $0xaa8] ss:$16 sps:$4 sm:$0xff]  }
 0x1a3   :  { %4155 = vmatpush2.bf16.msra.mxu1 %v6188_v4 }
 0x1a4   :  { %4156 = vmatprep.subr.bf16.mxu1 %v6196_v8  ;;  %v6254_v8 = vld [vmem:[#allocation7 + $0xa88] ss:$16 sps:$4 sm:$0xff]  }
 0x1a5   :  { %4116 = vmatpush2.bf16.msra.mxu0 %v6191_v7  ;;  %v6251_v7 = vld [vmem:[#allocation7 + $0x888] ss:$16 sps:$4 sm:$0xff]  }
 0x1a6   :  { %4117 = vmatprep.subr.bf16.mxu0 %v6199_v9  ;;  %v6262_v9 = vld [vmem:[#allocation7 + $0xa6c] ss:$16 sps:$4 sm:$0xff]  }
 0x1a7   :  { %4157 = vmatpush2.bf16.msra.mxu1 %v6194_v10  ;;  %v6257_v10 = vld [vmem:[#allocation7 + $0x868] ss:$16 sps:$4 sm:$0xff]  }
 0x1a8   :  { %4158 = vmatprep.subr.bf16.mxu1 %v6202_v12  ;;  %v6260_v12 = vld [vmem:[#allocation7 + $0xa68] ss:$16 sps:$4 sm:$0xff]  }
 0x1a9   :  { %4118 = vmatpush2.bf16.msra.mxu0 %v6197_v11  ;;  %v6265_v11 = vld [vmem:[#allocation7 + $0x84c] ss:$16 sps:$4 sm:$0xff]  }
 0x1aa   :  { %4119 = vmatprep.subr.bf16.mxu0 %v6205_v13  ;;  %v6268_v13 = vld [vmem:[#allocation7 + $0xa4c] ss:$16 sps:$4 sm:$0xff]  }
 0x1ab   :  { %4159 = vmatpush2.bf16.msra.mxu1 %v6200_v15  ;;  %v6263_v15 = vld [vmem:[#allocation7 + $0x848] ss:$16 sps:$4 sm:$0xff]  }
 0x1ac   :  { %4160 = vmatprep.subr.bf16.mxu1 %v6208_v19  ;;  %v6266_v19 = vld [vmem:[#allocation7 + $0xa48] ss:$16 sps:$4 sm:$0xff]  }
 0x1ad   :  { %4120 = vmatpush2.bf16.msra.mxu0 %v6203_v17  ;;  %v6271_v17 = vld [vmem:[#allocation7 + $0x82c] ss:$16 sps:$4 sm:$0xff]  }
 0x1ae   :  { %4121 = vmatprep.subr.bf16.mxu0 %v6211_v21  ;;  %v6274_v21 = vld [vmem:[#allocation7 + $0xa2c] ss:$16 sps:$4 sm:$0xff]  }
 0x1af   :  { %4161 = vmatpush2.bf16.msra.mxu1 %v6206_v22  ;;  %v6269_v22 = vld [vmem:[#allocation7 + $0x828] ss:$16 sps:$4 sm:$0xff]  }
 0x1b0   :  { %4162 = vmatprep.subr.bf16.mxu1 %v6214_v24  ;;  %v6272_v24 = vld [vmem:[#allocation7 + $0xa28] ss:$16 sps:$4 sm:$0xff]  }
 0x1b1   :  { %4122 = vmatpush2.bf16.msra.mxu0 %v6209_v23  ;;  %v6277_v23 = vld [vmem:[#allocation7 + $0x80c] ss:$16 sps:$4 sm:$0xff]  }
 0x1b2   :  { %4123 = vmatprep.subr.bf16.mxu0 %v6217_v47  ;;  %v6280_v47 = vld [vmem:[#allocation7 + $0xa0c] ss:$16 sps:$4 sm:$0xff]  }
 0x1b3   :  { %4163 = vmatpush2.bf16.msra.mxu1 %v6212_v29  ;;  %v6275_v29 = vld [vmem:[#allocation7 + $0x808] ss:$16 sps:$4 sm:$0xff]  }
 0x1b4   :  { %4164 = vmatprep.subr.bf16.mxu1 %v6220_v55  ;;  %v6278_v55 = vld [vmem:[#allocation7 + $0xa08] ss:$16 sps:$4 sm:$0xff]  }
 0x1b5   :  { %4124 = vmatpush2.bf16.msra.mxu0 %v6215_v32  ;;  %v6283_v32 = vld [vmem:[#allocation7 + $0x9ec] ss:$16 sps:$4 sm:$0xff]  }
 0x1b6   :  { %4125 = vmatprep.subr.bf16.mxu0 %v6223_v6  ;;  %v6286_v6 = vld [vmem:[#allocation7 + $0xbec] ss:$16 sps:$4 sm:$0xff]  }
 0x1b7   :  { %4165 = vmatpush2.bf16.msra.mxu1 %v6218_v38  ;;  %v6281_v38 = vld [vmem:[#allocation7 + $0x9e8] ss:$16 sps:$4 sm:$0xff]  }
 0x1b8   :  { %4166 = vmatprep.subr.bf16.mxu1 %v6226_v51  ;;  %v6284_v51 = vld [vmem:[#allocation7 + $0xbe8] ss:$16 sps:$4 sm:$0xff]  }
 0x1b9   :  { %4126 = vmatpush2.bf16.msra.mxu0 %v6221_v31  ;;  %v6289_v31 = vld [vmem:[#allocation7 + $0x9cc] ss:$16 sps:$4 sm:$0xff]  }
 0x1ba   :  { %4127 = vmatprep.subr.bf16.mxu0 %v6229_v34  ;;  %v6292_v34 = vld [vmem:[#allocation7 + $0xbcc] ss:$16 sps:$4 sm:$0xff]  }
 0x1bb   :  { %4167 = vmatpush2.bf16.msra.mxu1 %v6224_v35  ;;  %v6287_v35 = vld [vmem:[#allocation7 + $0x9c8] ss:$16 sps:$4 sm:$0xff]  }
 0x1bc   :  { %4168 = vmatprep.subr.bf16.mxu1 %v6232_v41  ;;  %v6295_v41 = vld [vmem:[#allocation7 + $0x9ac] ss:$16 sps:$4 sm:$0xff]  }
 0x1bd   :  { %4128 = vmatpush2.bf16.msra.mxu0 %v6227_v57  ;;  %v6290_v57 = vld [vmem:[#allocation7 + $0xbc8] ss:$16 sps:$4 sm:$0xff]  }
 0x1be   :  { %4179 = vmatprep.subr.bf16.mxu0 %v6235_v14  ;;  %v6298_v14 = vld [vmem:[#allocation7 + $0xbac] ss:$16 sps:$4 sm:$0xff]  }
 0x1bf   :  { %4169 = vmatpush2.bf16.msra.mxu1 %v6230_v44  ;;  %v6293_v44 = vld [vmem:[#allocation7 + $0x9a8] ss:$16 sps:$4 sm:$0xff]  }
 0x1c0   :  { %v3885_v45 = vpop.f32.mrf.mxu0  ;;  %4130 = vmatmul.mubr.bf16.vlgmr.msra.gmra.mxu0 %v6679_v39  ;;  %4220 = vmatprep.subr.bf16.mxu1 %v6238_v52  ;;  %v6242_v39 = vld [vmem:[#allocation7 + $0xac8] ss:$16 sps:$4 sm:$0xff]   ;;  %v6301_v52 = vld [vmem:[#allocation7 + $0x98c] ss:$16 sps:$4 sm:$0xff]  }
 0x1c1   :  { %v3886_v56 = vadd.f32 %v3885_v45, %v6802_v28  ;;  %4180 = vmatpush1.bf16.msra.mxu0 %v6233_v53  ;;  %4211 = vmatprep.mubr.bf16.mxu0 %v6718_v36  ;;  %v3926_v43 = vpop.f32.mrf.mxu1  ;;  %v6245_v36 = vld [vmem:[#allocation7 + $0x8a8] ss:$16 sps:$4 sm:$0xff]   ;;  %v6307_v45 = vld [vmem:[#allocation7 + $0x96c] ss:$16 sps:$4 sm:$0xff]  }
 0x1c2   :  { %4171 = vmatmul.mubr.bf16.vlgmr.msra.gmra.mxu1 %v6681_v42  ;;  %v3887_v58 = vpop.f32.mrf.mxu0  ;;  %4181 = vmatprep.subr.bf16.mxu0 %v6241_v54  ;;  %v6296_v53 = vld [vmem:[#allocation7 + $0xba8] ss:$16 sps:$4 sm:$0xff]   ;;  %v6304_v54 = vld [vmem:[#allocation7 + $0xb8c] ss:$16 sps:$4 sm:$0xff]  }
 0x1c3   :  { %v6812_v61 = vadd.f32 %v3926_v43, %v3886_v56  ;;  %4221 = vmatpush1.bf16.msra.mxu1 %v6236_v40  ;;  %v3888_v62 = vadd.f32 %v3887_v58, %v6806_v30  ;;  %4252 = vmatprep.mubr.bf16.mxu1 %v6722_v48  ;;  %v3928_v63 = vpop.f32.mrf.mxu1  ;;  %v6256_v30 = vld [vmem:[#allocation7 + $0xa8c] ss:$16 sps:$4 sm:$0xff]   ;;  %v6299_v40 = vld [vmem:[#allocation7 + $0x988] ss:$16 sps:$4 sm:$0xff]  }
 0x1c4   :  { %v3889_v28 = vpop.f32.mrf.mxu0  ;;  %4222 = vmatprep.subr.bf16.mxu1 %v6244_v46  ;;  %v6259_v48 = vld [vmem:[#allocation7 + $0x86c] ss:$16 sps:$4 sm:$0xff]   ;;  %v6302_v46 = vld [vmem:[#allocation7 + $0xb88] ss:$16 sps:$4 sm:$0xff]  }
 0x1c5   :  { %v6816_v1 = vadd.f32 %v3928_v63, %v3888_v62  ;;  %4182 = vmatpush1.bf16.msra.mxu0 %v6239_v49  ;;  %v3930_v42 = vpop.f32.mrf.mxu1  ;;  %v6310_v56 = vld [vmem:[#allocation7 + $0xb6c] ss:$16 sps:$4 sm:$0xff]   ;;  %v6305_v49 = vld [vmem:[#allocation7 + $0x968] ss:$16 sps:$4 sm:$0xff]  }
 0x1c6   :  { %v3890_v50 = vpop.f32.mrf.mxu0  ;;  %4183 = vmatprep.subr.bf16.mxu0 %v6247_v59  ;;  %v6313_v43 = vld [vmem:[#allocation7 + $0x94c] ss:$16 sps:$4 sm:$0xff]   ;;  %v6308_v58 = vld [vmem:[#allocation7 + $0xb68] ss:$16 sps:$4 sm:$0xff]  }
 0x1c7   :  { %4223 = vmatpush1.bf16.msra.mxu1 %v6242_v39  ;;  %v3931_v4 = vpop.f32.mrf.mxu1  ;;  %v6316_v59 = vld [vmem:[#allocation7 + $0xb4c] ss:$16 sps:$4 sm:$0xff]   ;;  %v6311_v62 = vld [vmem:[#allocation7 + $0x948] ss:$16 sps:$4 sm:$0xff]  }
 0x1c8   :  { %4224 = vmatprep.subr.bf16.mxu1 %v6250_v0  ;;  %v6319_v39 = vld [vmem:[#allocation7 + $0x92c] ss:$16 sps:$4 sm:$0xff]   ;;  %v6314_v63 = vld [vmem:[#allocation7 + $0xb48] ss:$16 sps:$4 sm:$0xff]  }
 0x1c9   :  { %4184 = vmatpush1.bf16.msra.mxu0 %v6245_v36  ;;  %v6322_v28 = vld [vmem:[#allocation7 + $0xb2c] ss:$16 sps:$4 sm:$0xff]   ;;  %v6317_v0 = vld [vmem:[#allocation7 + $0x928] ss:$16 sps:$4 sm:$0xff]  }
 0x1ca   :  { %4185 = vmatprep.subr.bf16.mxu0 %v6253_v2  ;;  %v6325_v36 = vld [vmem:[#allocation7 + $0x90c] ss:$16 sps:$4 sm:$0xff]   ;;  %v6320_v42 = vld [vmem:[#allocation7 + $0xb28] ss:$16 sps:$4 sm:$0xff]  }
 0x1cb   :  { %4225 = vmatpush1.bf16.msra.mxu1 %v6248_v3  ;;  %v6328_v50 = vld [vmem:[#allocation7 + $0xb0c] ss:$16 sps:$4 sm:$0xff]   ;;  %v6323_v2 = vld [vmem:[#allocation7 + $0x908] ss:$16 sps:$4 sm:$0xff]  }
 0x1cc   :  { %4226 = vmatprep.subr.bf16.mxu1 %v6256_v30  ;;  %v6331_v3 = vld [vmem:[#allocation7 + $0xcec] ss:$16 sps:$4 sm:$0xff]   ;;  %v6326_v4 = vld [vmem:[#allocation7 + $0xb08] ss:$16 sps:$4 sm:$0xff]  }
 0x1cd   :  { %4186 = vmatpush1.bf16.msra.mxu0 %v6251_v7  ;;  %v6334_v30 = vld [vmem:[#allocation7 + $0xeec] ss:$16 sps:$4 sm:$0xff]   ;;  %v6329_v7 = vld [vmem:[#allocation7 + $0xce8] ss:$16 sps:$4 sm:$0xff]  }
 0x1ce   :  { %4187 = vmatprep.subr.bf16.mxu0 %v6259_v48  ;;  %v6337_v48 = vld [vmem:[#allocation7 + $0xccc] ss:$16 sps:$4 sm:$0xff]  }
 0x1cf   :  { %4227 = vmatpush1.bf16.msra.mxu1 %v6254_v8  ;;  %v6332_v8 = vld [vmem:[#allocation7 + $0xee8] ss:$16 sps:$4 sm:$0xff]  }
 0x1d0   :  { %4228 = vmatprep.subr.bf16.mxu1 %v6262_v9 }
 0x1d1   :  { %4188 = vmatpush1.bf16.msra.mxu0 %v6257_v10  ;;  %v6340_v10 = vld [vmem:[#allocation7 + $0xecc] ss:$16 sps:$4 sm:$0xff]  }
 0x1d2   :  { %4189 = vmatprep.subr.bf16.mxu0 %v6265_v11 }
 0x1d3   :  { %4229 = vmatpush1.bf16.msra.mxu1 %v6260_v12  ;;  %v6335_v12 = vld [vmem:[#allocation7 + $0xcc8] ss:$16 sps:$4 sm:$0xff]  }
 0x1d4   :  { %4230 = vmatprep.subr.bf16.mxu1 %v6268_v13 }
 0x1d5   :  { %4190 = vmatpush1.bf16.msra.mxu0 %v6263_v15 }
 0x1d6   :  { %4191 = vmatprep.subr.bf16.mxu0 %v6271_v17  ;;  %v6343_v17 = vld [vmem:[#allocation7 + $0xcac] ss:$16 sps:$4 sm:$0xff]  }
 0x1d7   :  { %4231 = vmatpush1.bf16.msra.mxu1 %v6266_v19 }
 0x1d8   :  { %4232 = vmatprep.subr.bf16.mxu1 %v6274_v21  ;;  %v6338_v21 = vld [vmem:[#allocation7 + $0xec8] ss:$16 sps:$4 sm:$0xff]  }
 0x1d9   :  { %4192 = vmatpush1.bf16.msra.mxu0 %v6269_v22 }
 0x1da   :  { %4193 = vmatprep.subr.bf16.mxu0 %v6277_v23 }
 0x1db   :  { %4233 = vmatpush1.bf16.msra.mxu1 %v6272_v24  ;;  %v6341_v24 = vld [vmem:[#allocation7 + $0xca8] ss:$16 sps:$4 sm:$0xff]  }
 0x1dc   :  { %4234 = vmatprep.subr.bf16.mxu1 %v6280_v47 }
 0x1dd   :  { %4194 = vmatpush1.bf16.msra.mxu0 %v6275_v29 }
 0x1de   :  { %4195 = vmatprep.subr.bf16.mxu0 %v6283_v32 }
 0x1df   :  { %4235 = vmatpush1.bf16.msra.mxu1 %v6278_v55 }
 0x1e0   :  { %4236 = vmatprep.subr.bf16.mxu1 %v6286_v6  ;;  %v6344_v6 = vld [vmem:[#allocation7 + $0xea8] ss:$16 sps:$4 sm:$0xff]  }
 0x1e1   :  { %4196 = vmatpush2.bf16.msra.mxu0 %v6281_v38 }
 0x1e2   :  { %4197 = vmatprep.subr.bf16.mxu0 %v6289_v31 }
 0x1e3   :  { %4237 = vmatpush2.bf16.msra.mxu1 %v6284_v51 }
 0x1e4   :  { %4238 = vmatprep.subr.bf16.mxu1 %v6292_v34  ;;  %v6352_v34 = vld [vmem:[#allocation7 + $0xe8c] ss:$16 sps:$4 sm:$0xff]  }
 0x1e5   :  { %4198 = vmatpush2.bf16.msra.mxu0 %v6287_v35 }
 0x1e6   :  { %4199 = vmatprep.subr.bf16.mxu0 %v6295_v41 }
 0x1e7   :  { %4239 = vmatpush2.bf16.msra.mxu1 %v6290_v57  ;;  %v6347_v57 = vld [vmem:[#allocation7 + $0xc88] ss:$16 sps:$4 sm:$0xff]  }
 0x1e8   :  { %4240 = vmatprep.subr.bf16.mxu1 %v6298_v14  ;;  %v6355_v14 = vld [vmem:[#allocation7 + $0xc6c] ss:$16 sps:$4 sm:$0xff]  }
 0x1e9   :  { %4200 = vmatpush2.bf16.msra.mxu0 %v6293_v44 }
 0x1ea   :  { %4201 = vmatprep.subr.bf16.mxu0 %v6301_v52 }
 0x1eb   :  { %4241 = vmatpush2.bf16.msra.mxu1 %v6296_v53  ;;  %v6350_v53 = vld [vmem:[#allocation7 + $0xe88] ss:$16 sps:$4 sm:$0xff]  }
 0x1ec   :  { %4242 = vmatprep.subr.bf16.mxu1 %v6304_v54  ;;  %v6358_v54 = vld [vmem:[#allocation7 + $0xe6c] ss:$16 sps:$4 sm:$0xff]  }
 0x1ed   :  { %4202 = vmatpush2.bf16.msra.mxu0 %v6299_v40 }
 0x1ee   :  { %4203 = vmatprep.subr.bf16.mxu0 %v6307_v45 }
 0x1ef   :  { %4243 = vmatpush2.bf16.msra.mxu1 %v6302_v46  ;;  %v6353_v46 = vld [vmem:[#allocation7 + $0xc68] ss:$16 sps:$4 sm:$0xff]  }
 0x1f0   :  { %4244 = vmatprep.subr.bf16.mxu1 %v6310_v56  ;;  %v6361_v56 = vld [vmem:[#allocation7 + $0xc4c] ss:$16 sps:$4 sm:$0xff]  }
 0x1f1   :  { %4204 = vmatpush2.bf16.msra.mxu0 %v6305_v49 }
 0x1f2   :  { %4205 = vmatprep.subr.bf16.mxu0 %v6313_v43 }
 0x1f3   :  { %4245 = vmatpush2.bf16.msra.mxu1 %v6308_v58  ;;  %v6356_v58 = vld [vmem:[#allocation7 + $0xe68] ss:$16 sps:$4 sm:$0xff]  }
 0x1f4   :  { %4246 = vmatprep.subr.bf16.mxu1 %v6316_v59  ;;  %v6364_v59 = vld [vmem:[#allocation7 + $0xe4c] ss:$16 sps:$4 sm:$0xff]  }
 0x1f5   :  { %4206 = vmatpush2.bf16.msra.mxu0 %v6311_v62 }
 0x1f6   :  { %4207 = vmatprep.subr.bf16.mxu0 %v6319_v39  ;;  %v6359_v39 = vld [vmem:[#allocation7 + $0xc48] ss:$16 sps:$4 sm:$0xff]  }
 0x1f7   :  { %4247 = vmatpush2.bf16.msra.mxu1 %v6314_v63  ;;  %v6367_v63 = vld [vmem:[#allocation7 + $0xc2c] ss:$16 sps:$4 sm:$0xff]  }
 0x1f8   :  { %4248 = vmatprep.subr.bf16.mxu1 %v6322_v28 }
 0x1f9   :  { %4208 = vmatpush2.bf16.msra.mxu0 %v6317_v0 }
 0x1fa   :  { %4209 = vmatprep.subr.bf16.mxu0 %v6325_v36  ;;  %v6362_v36 = vld [vmem:[#allocation7 + $0xe48] ss:$16 sps:$4 sm:$0xff]  }
 0x1fb   :  { %4249 = vmatpush2.bf16.msra.mxu1 %v6320_v42  ;;  %v6370_v42 = vld [vmem:[#allocation7 + $0xe2c] ss:$16 sps:$4 sm:$0xff]  }
 0x1fc   :  { %4250 = vmatprep.subr.bf16.mxu1 %v6328_v50 }
 0x1fd   :  { %4210 = vmatpush2.bf16.msra.mxu0 %v6323_v2  ;;  %v6365_v2 = vld [vmem:[#allocation7 + $0xc28] ss:$16 sps:$4 sm:$0xff]  }
 0x1fe   :  { %4261 = vmatprep.subr.bf16.mxu0 %v6331_v3  ;;  %v6373_v3 = vld [vmem:[#allocation7 + $0xc0c] ss:$16 sps:$4 sm:$0xff]  }
 0x1ff   :  { %4251 = vmatpush2.bf16.msra.mxu1 %v6326_v4  ;;  %v6368_v4 = vld [vmem:[#allocation7 + $0xe28] ss:$16 sps:$4 sm:$0xff]  }
 0x200   :  { %v3967_v9 = vpop.f32.mrf.mxu0  ;;  %4212 = vmatmul.mubr.bf16.vlgmr.msra.gmra.mxu0 %v6751_v18  ;;  %4302 = vmatprep.subr.bf16.mxu1 %v6334_v30  ;;  %v6376_v30 = vld [vmem:[#allocation7 + $0xe0c] ss:$16 sps:$4 sm:$0xff]  }
 0x201   :  { %v3968_v11 = vadd.f32 %v3967_v9, %v6812_v61  ;;  %4262 = vmatpush1.bf16.msra.mxu0 %v6329_v7  ;;  %4293 = vmatprep.mubr.bf16.mxu0 %v6758_v20  ;;  %v6346_v20 = vld [vmem:[#allocation7 + $0xeac] ss:$16 sps:$4 sm:$0xff]   ;;  %v6371_v7 = vld [vmem:[#allocation7 + $0xc08] ss:$16 sps:$4 sm:$0xff]  }
 0x202   :  { %v4008_v13 = vpop.f32.mrf.mxu1  ;;  %4253 = vmatmul.mubr.bf16.vlgmr.msra.gmra.mxu1 %v6753_v25  ;;  %v3969_v15 = vpop.f32.mrf.mxu0  ;;  %4263 = vmatprep.subr.bf16.mxu0 %v6337_v48  ;;  %v6379_v48 = vld [vmem:[#allocation7 + $0xdec] ss:$16 sps:$4 sm:$0xff]  }
 0x203   :  { %v4009_v19 = vadd.f32 %v4008_v13, %v3968_v11  ;;  %4303 = vmatpush1.bf16.msra.mxu1 %v6332_v8  ;;  %v3970_v18 = vadd.f32 %v3969_v15, %v6816_v1  ;;  %4334 = vmatprep.mubr.bf16.mxu1 %v6766_v33  ;;  %v6349_v1 = vld [vmem:[#allocation7 + $0xc8c] ss:$16 sps:$4 sm:$0xff]   ;;  %v6374_v8 = vld [vmem:[#allocation7 + $0xe08] ss:$16 sps:$4 sm:$0xff]  }
 0x204   :  { %v4010_v61 = vpop.f32.mrf.mxu1  ;;  %v3971_v22 = vpop.f32.mrf.mxu0  ;;  %4304 = vmatprep.subr.bf16.mxu1 %v6340_v10  ;;  %v6382_v9 = vld [vmem:[#allocation7 + $0xfec] ss:$16 sps:$4 sm:$0xff]   ;;  %v6377_v10 = vld [vmem:[#allocation7 + $0xde8] ss:$16 sps:$4 sm:$0xff]  }
 0x205   :  { %v6827_v23 = vsel %vm4348_vm1, %v4009_v19, 0.0  ;;  %v4011_v25 = vadd.f32 %v4010_v61, %v3970_v18  ;;  %4264 = vmatpush1.bf16.msra.mxu0 %v6335_v12  ;;  %v6385_v11 = vld [vmem:[#allocation7 + $0xdcc] ss:$16 sps:$4 sm:$0xff]   ;;  %v6380_v12 = vld [vmem:[#allocation7 + $0xfe8] ss:$16 sps:$4 sm:$0xff]  }
 0x206   :  { %v4357_v47 = vsel %vm4356_vm2, %v6827_v23, 0.0  ;;  %v4012_v29 = vpop.f32.mrf.mxu1  ;;  %v3972_v32 = vpop.f32.mrf.mxu0  ;;  %4265 = vmatprep.subr.bf16.mxu0 %v6343_v17  ;;  %v6388_v13 = vld [vmem:[#allocation7 + $0xfcc] ss:$16 sps:$4 sm:$0xff]   ;;  %v6383_v15 = vld [vmem:[#allocation7 + $0xdc8] ss:$16 sps:$4 sm:$0xff]  }
 0x207   :  { %v4358_v55 = vrot.slane %v4357_v47, 4  ;;  %v6833_v33 = vsel %vm4348_vm1, %v4011_v25, 0.0  ;;  %4305 = vmatpush1.bf16.msra.mxu1 %v6338_v21  ;;  %v6391_v17 = vld [vmem:[#allocation7 + $0xdac] ss:$16 sps:$4 sm:$0xff]   ;;  %v6386_v19 = vld [vmem:[#allocation7 + $0xfc8] ss:$16 sps:$4 sm:$0xff]  }
 0x208   :  { %v4364_v38 = vsel %vm4356_vm2, %v6833_v33, 0.0  ;;  %v4424_v31 = vcombine.low %v6827_v23, %v6833_v33  ;;  %v4013_v51 = vpop.f32.mrf.mxu1  ;;  %4306 = vmatprep.subr.bf16.mxu1 %v6346_v20  ;;  %v6394_v18 = vld [vmem:[#allocation7 + $0xfac] ss:$16 sps:$4 sm:$0xff]   ;;  %v6389_v21 = vld [vmem:[#allocation7 + $0xda8] ss:$16 sps:$4 sm:$0xff]  }
 0x209   :  { %v4359_v35 = vadd.f32 %v4358_v55, %v4357_v47  ;;  %v4365_v41 = vrot.slane %v4364_v38, 4  ;;  %4266 = vmatpush1.bf16.msra.mxu0 %v6341_v24  ;;  %v6397_v61 = vld [vmem:[#allocation7 + $0xd8c] ss:$16 sps:$4 sm:$0xff]   ;;  %v6392_v22 = vld [vmem:[#allocation7 + $0xfa8] ss:$16 sps:$4 sm:$0xff]  }
 0x20a   :  { %4267 = vmatprep.subr.bf16.mxu0 %v6349_v1  ;;  %v6400_v20 = vld [vmem:[#allocation7 + $0xf8c] ss:$16 sps:$4 sm:$0xff]   ;;  %v6395_v25 = vld [vmem:[#allocation7 + $0xd88] ss:$16 sps:$4 sm:$0xff]  }
 0x20b   :  { %v4360_v44 = vrot.slane %v4359_v35, 2  ;;  %v4366_v52 = vadd.f32 %v4365_v41, %v4364_v38  ;;  %4307 = vmatpush1.bf16.msra.mxu1 %v6344_v6  ;;  %v6403_v24 = vld [vmem:[#allocation7 + $0xd6c] ss:$16 sps:$4 sm:$0xff]   ;;  %v6398_v47 = vld [vmem:[#allocation7 + $0xf88] ss:$16 sps:$4 sm:$0xff]  }
 0x20c   :  { %4308 = vmatprep.subr.bf16.mxu1 %v6352_v34  ;;  %v6406_v29 = vld [vmem:[#allocation7 + $0xf6c] ss:$16 sps:$4 sm:$0xff]   ;;  %v6401_v32 = vld [vmem:[#allocation7 + $0xd68] ss:$16 sps:$4 sm:$0xff]  }
 0x20d   :  { %v4361_v40 = vadd.f32 %v4360_v44, %v4359_v35  ;;  %v4367_v45 = vrot.slane %v4366_v52, 2  ;;  %4268 = vmatpush1.bf16.msra.mxu0 %v6347_v57  ;;  %v6409_v1 = vld [vmem:[#allocation7 + $0xd4c] ss:$16 sps:$4 sm:$0xff]   ;;  %v6404_v55 = vld [vmem:[#allocation7 + $0xf68] ss:$16 sps:$4 sm:$0xff]  }
 0x20e   :  { %4269 = vmatprep.subr.bf16.mxu0 %v6355_v14  ;;  %v6412_v6 = vld [vmem:[#allocation7 + $0xf4c] ss:$16 sps:$4 sm:$0xff]   ;;  %v6407_v38 = vld [vmem:[#allocation7 + $0xd48] ss:$16 sps:$4 sm:$0xff]  }
 0x20f   :  { %v4362_v49 = vrot.slane %v4361_v40, 1  ;;  %v4368_v43 = vadd.f32 %v4367_v45, %v4366_v52  ;;  %4309 = vmatpush1.bf16.msra.mxu1 %v6350_v53  ;;  %v6415_v51 = vld [vmem:[#allocation7 + $0xd2c] ss:$16 sps:$4 sm:$0xff]   ;;  %v6410_v34 = vld [vmem:[#allocation7 + $0xf48] ss:$16 sps:$4 sm:$0xff]   ;;  %v6846_v53 = vsub.s32 2, %v6774_v5 }
 0x210   :  { %4310 = vmatprep.subr.bf16.mxu1 %v6358_v54  ;;  %v6418_v35 = vld [vmem:[#allocation7 + $0xf2c] ss:$16 sps:$4 sm:$0xff]   ;;  %v6413_v41 = vld [vmem:[#allocation7 + $0xd28] ss:$16 sps:$4 sm:$0xff]  }
 0x211   :  { %v4369_v62 = vrot.slane %v4368_v43, 1  ;;  %4270 = vmatpush1.bf16.msra.mxu0 %v6353_v46  ;;  %v6839_v28 = vadd.f32 %v4362_v49, %v4361_v40  ;;  %v6421_v57 = vld [vmem:[#allocation7 + $0xd0c] ss:$16 sps:$4 sm:$0xff]   ;;  %v6416_v14 = vld [vmem:[#allocation7 + $0xf28] ss:$16 sps:$4 sm:$0xff]   ;;  %v6849_v40 = vsub.s32 3, %v6774_v5 }
 0x212   :  { %4271 = vmatprep.subr.bf16.mxu0 %v6361_v56  ;;  %v6424_v44 = vld [vmem:[#allocation7 + $0xf0c] ss:$16 sps:$4 sm:$0xff]   ;;  %v6419_v52 = vld [vmem:[#allocation7 + $0xd08] ss:$16 sps:$4 sm:$0xff]  }
 0x213   :  { %v6841_v0 = vadd.f32 %v4369_v62, %v4368_v43  ;;  %4311 = vmatpush1.bf16.msra.mxu1 %v6356_v58  ;;  %v6422_v54 = vld [vmem:[#allocation7 + $0xf08] ss:$16 sps:$4 sm:$0xff]  }
 0x214   :  { %4312 = vmatprep.subr.bf16.mxu1 %v6364_v59  ;;  %v6465_v45 = vld [vmem:[#allocation9] ss:$4 sm:$0xf] }
 0x215   :  { %v4389_v50 = vcombine.low %v6839_v28, %v6841_v0  ;;  %4272 = vmatpush1.bf16.msra.mxu0 %v6359_v39  ;;  %v1005_v46 = vrot.slane %v6465_v45, %v6846_v53  ;;  %v1009_v56 = vrot.slane %v6465_v45, %v6849_v40  ;;  %v6441_v45 = vld [vmem:[#allocation10 + $0x58] sm:$0xff]  }
 0x216   :  { %4273 = vmatprep.subr.bf16.mxu0 %v6367_v63 }
 0x217   :  { %4313 = vmatpush1.bf16.msra.mxu1 %v6362_v36 }
 0x218   :  { %4314 = vmatprep.subr.bf16.mxu1 %v6370_v42 }
 0x219   :  { %4274 = vmatpush1.bf16.msra.mxu0 %v6365_v2 }
 0x21a   :  { %4275 = vmatprep.subr.bf16.mxu0 %v6373_v3 }
 0x21b   :  { %4315 = vmatpush1.bf16.msra.mxu1 %v6368_v4 }
 0x21c   :  { %4316 = vmatprep.subr.bf16.mxu1 %v6376_v30 }
 0x21d   :  { %4276 = vmatpush1.bf16.msra.mxu0 %v6371_v7 }
 0x21e   :  { %4277 = vmatprep.subr.bf16.mxu0 %v6379_v48 }
 0x21f   :  { %4317 = vmatpush1.bf16.msra.mxu1 %v6374_v8 }
 0x220   :  { %4318 = vmatprep.subr.bf16.mxu1 %v6382_v9 }
 0x221   :  { %4278 = vmatpush2.bf16.msra.mxu0 %v6377_v10 }
 0x222   :  { %4279 = vmatprep.subr.bf16.mxu0 %v6385_v11 }
 0x223   :  { %4319 = vmatpush2.bf16.msra.mxu1 %v6380_v12 }
 0x224   :  { %4320 = vmatprep.subr.bf16.mxu1 %v6388_v13 }
 0x225   :  { %4280 = vmatpush2.bf16.msra.mxu0 %v6383_v15 }
 0x226   :  { %4281 = vmatprep.subr.bf16.mxu0 %v6391_v17 }
 0x227   :  { %4321 = vmatpush2.bf16.msra.mxu1 %v6386_v19  ;;  %v6604_v19 = vmov 0.0  }
 0x228   :  { %4322 = vmatprep.subr.bf16.mxu1 %v6394_v18  ;;  %94 = vst.msk [vmem:[#allocation3] sm:$0xf] %vm6860_vm3, %v6604_v19 }
 0x229   :  { %4282 = vmatpush2.bf16.msra.mxu0 %v6389_v21 }
 0x22a   :  { %4283 = vmatprep.subr.bf16.mxu0 %v6397_v61 }
 0x22b   :  { %4323 = vmatpush2.bf16.msra.mxu1 %v6392_v22 }
 0x22c   :  { %4324 = vmatprep.subr.bf16.mxu1 %v6400_v20 }
 0x22d   :  { %4284 = vmatpush2.bf16.msra.mxu0 %v6395_v25 }
 0x22e   :  { %4285 = vmatprep.subr.bf16.mxu0 %v6403_v24 }
 0x22f   :  { %4325 = vmatpush2.bf16.msra.mxu1 %v6398_v47 }
 0x230   :  { %4326 = vmatprep.subr.bf16.mxu1 %v6406_v29  ;;  %v6426_v29 = vld [vmem:[#allocation10 + $0x38] sm:$0xff]  }
 0x231   :  { %4286 = vmatpush2.bf16.msra.mxu0 %v6401_v32  ;;  %v6427_v32 = vld [vmem:[#allocation10 + $0xf8] sm:$0xff]  }
 0x232   :  { %4287 = vmatprep.subr.bf16.mxu0 %v6409_v1  ;;  %v6428_v1 = vld [vmem:[#allocation10 + $0xb8] sm:$0xff]  }
 0x233   :  { %4327 = vmatpush2.bf16.msra.mxu1 %v6404_v55  ;;  %v6429_v55 = vld [vmem:[#allocation10 + $0x70] sm:$0xff]  }
 0x234   :  { %4328 = vmatprep.subr.bf16.mxu1 %v6412_v6  ;;  %v6430_v6 = vld [vmem:[#allocation10 + $0x30] sm:$0xff]  }
 0x235   :  { %4288 = vmatpush2.bf16.msra.mxu0 %v6407_v38  ;;  %v6431_v38 = vld [vmem:[#allocation10 + $0xf0] sm:$0xff]  }
 0x236   :  { %4289 = vmatprep.subr.bf16.mxu0 %v6415_v51  ;;  %v6432_v51 = vld [vmem:[#allocation10 + $0xb0] sm:$0xff]  }
 0x237   :  { %4329 = vmatpush2.bf16.msra.mxu1 %v6410_v34  ;;  %v6433_v34 = vld [vmem:[#allocation10 + $0x68] sm:$0xff]  }
 0x238   :  { %4330 = vmatprep.subr.bf16.mxu1 %v6418_v35  ;;  %v6434_v35 = vld [vmem:[#allocation10 + $0x28] sm:$0xff]  }
 0x239   :  { %4290 = vmatpush2.bf16.msra.mxu0 %v6413_v41  ;;  %v6435_v41 = vld [vmem:[#allocation10 + $0xe8] sm:$0xff]  }
 0x23a   :  { %4291 = vmatprep.subr.bf16.mxu0 %v6421_v57  ;;  %v6436_v57 = vld [vmem:[#allocation10 + $0xa8] sm:$0xff]  }
 0x23b   :  { %4331 = vmatpush2.bf16.msra.mxu1 %v6416_v14  ;;  %v6437_v14 = vld [vmem:[#allocation10 + $0x60] sm:$0xff]  }
 0x23c   :  { %4332 = vmatprep.subr.bf16.mxu1 %v6424_v44  ;;  %v6438_v44 = vld [vmem:[#allocation10 + $0x20] sm:$0xff]  }
 0x23d   :  { %4292 = vmatpush2.bf16.msra.mxu0 %v6419_v52  ;;  %v6439_v52 = vld [vmem:[#allocation10 + $0xe0] sm:$0xff]  }
 0x23e   :  { %5599 = vmatprep.subr.bf16.mxu0 %v6425_v60 }
 0x23f   :  { %4333 = vmatpush2.bf16.msra.mxu1 %v6422_v54  ;;  %v6440_v54 = vld [vmem:[#allocation10 + $0xa0] sm:$0xff]  }
 0x240   :  { %v4049_v49 = vpop.f32.mrf.mxu0  ;;  %4294 = vmatmul.mubr.bf16.vlgmr.msra.gmra.mxu0 %v6784_v27  ;;  %5621 = vmatprep.subr.bf16.mxu1 %v6427_v32 }
 0x241   :  { %v4050_v43 = vadd.f32 %v4049_v49, %v1005_v46  ;;  %5600 = vmatpush3.bf16.msra.mxu0 %v6426_v29  ;;  %v6442_v46 = vld [vmem:[#allocation10 + $0x18] sm:$0xff]  }
 0x242   :  { %v4090_v58 = vpop.f32.mrf.mxu1  ;;  %4335 = vmatmul.mubr.bf16.vlgmr.msra.gmra.mxu1 %v6787_v37  ;;  %v4051_v59 = vpop.f32.mrf.mxu0  ;;  %5601 = vmatprep.subr.bf16.mxu0 %v6429_v55  ;;  %v6444_v49 = vld [vmem:[#allocation10 + $0x98] sm:$0xff]  }
 0x243   :  { %v4091_v62 = vadd.f32 %v4090_v58, %v4050_v43  ;;  %v4052_v39 = vadd.f32 %v4051_v59, %v1009_v56  ;;  %5622 = vmatpush3.bf16.msra.mxu1 %v6428_v1  ;;  %v6443_v56 = vld [vmem:[#allocation10 + $0xd8] sm:$0xff]   ;;  %v6445_v43 = vld [vmem:[#allocation10 + $0x50] sm:$0xff]  }
 0x244   :  { %v4092_v63 = vpop.f32.mrf.mxu1  ;;  %v4053_v36 = vpop.f32.mrf.mxu0  ;;  %5623 = vmatprep.subr.bf16.mxu1 %v6431_v38  ;;  %v6447_v58 = vld [vmem:[#allocation10 + $0xd0] sm:$0xff]  }
 0x245   :  { %v4093_v42 = vadd.f32 %v4092_v63, %v4052_v39  ;;  %5602 = vmatpush3.bf16.msra.mxu0 %v6430_v6  ;;  %v6446_v59 = vld [vmem:[#allocation10 + $0x10] sm:$0xff]   ;;  %v6451_v63 = vld [vmem:[#allocation10 + $0xc8] sm:$0xff]  }
 0x246   :  { %v4094_v2 = vpop.f32.mrf.mxu1  ;;  %v4054_v3 = vpop.f32.mrf.mxu0  ;;  %5603 = vmatprep.subr.bf16.mxu0 %v6433_v34  ;;  %v6448_v39 = vld [vmem:[#allocation10 + $0x90] sm:$0xff]   ;;  %v6450_v36 = vld [vmem:[#allocation10 + $0x8] sm:$0xff]  }
 0x247   :  { %5624 = vmatpush3.bf16.msra.mxu1 %v6432_v51  ;;  %v6452_v2 = vld [vmem:[#allocation10 + $0x88] sm:$0xff]   ;;  %v6455_v3 = vld [vmem:[#allocation10 + $0xc0] sm:$0xff]  }
 0x248   :  { %v4095_v4 = vpop.f32.mrf.mxu1  ;;  %5625 = vmatprep.subr.bf16.mxu1 %v6435_v41  ;;  %v6606_v41 = vmov 1966171168  }
 0x249   :  { %5604 = vmatpush3.bf16.msra.mxu0 %v6434_v35  ;;  %v6454_v4 = vld [vmem:[#allocation10] sm:$0xff]  }
 0x24a   :  { %5605 = vmatprep.subr.bf16.mxu0 %v6437_v14 }
 0x24b   :  { %5626 = vmatpush3.bf16.msra.mxu1 %v6436_v57  ;;  %v4392_v57 = vunpack.c.l.s4 %v6606_v41 }
 0x24c   :  { %5627 = vmatprep.subr.bf16.mxu1 %v6439_v52 }
 0x24d   :  { %5606 = vmatpush3.bf16.msra.mxu0 %v6438_v44 }
 0x24e   :  { %5607 = vmatprep.subr.bf16.mxu0 %v6441_v45 }
 0x24f   :  { %5628 = vmatpush3.bf16.msra.mxu1 %v6440_v54 }
 0x250   :  { %5629 = vmatprep.subr.bf16.mxu1 %v6443_v56 }
 0x251   :  { %5608 = vmatpush3.bf16.msra.mxu0 %v6442_v46  ;;  %v4393_v46 = vunpack.c.0.s8 %v4392_v57 }
 0x252   :  { %5609 = vmatprep.subr.bf16.mxu0 %v6445_v43 }
 0x253   :  { %5630 = vmatpush3.bf16.msra.mxu1 %v6444_v49 }
 0x254   :  { %5631 = vmatprep.subr.bf16.mxu1 %v6447_v58  ;;  %v6897_v58 = vsub.s32 %v4393_v46, %v6774_v5 }
 0x255   :  { %5610 = vmatpush3.bf16.msra.mxu0 %v6446_v59 }
 0x257   :  { %5632 = vmatpush3.bf16.msra.mxu1 %v6448_v39 }
 0x258   :  { %5633 = vmatprep.subr.bf16.mxu1 %v6451_v63  ;;  %v4355_v63 = vld [vmem:[#allocation3] sm:$0xf] }
 0x25b   :  { %5634 = vmatpush3.bf16.msra.mxu1 %v6452_v2 }
 0x25c   :  { %5635 = vmatprep.subr.bf16.mxu1 %v6455_v3 }
 0x280   :  { %v4131_v30 = vpop.f32.mrf.mxu0 }
 0x281   :  { %v4132_v7 = vadd.f32 %v4131_v30, %v4091_v62  ;;  %v6449_v62 = vld [vmem:[#allocation10 + $0x48] sm:$0xff]  }
 0x282   :  { %v4172_v48 = vpop.f32.mrf.mxu1  ;;  %v4133_v8 = vpop.f32.mrf.mxu0  ;;  %5611 = vmatprep.subr.bf16.mxu0 %v6449_v62 }
 0x283   :  { %v6855_v9 = vadd.f32 %v4172_v48, %v4132_v7  ;;  %v4134_v27 = vadd.f32 %v4133_v8, %v4093_v42  ;;  %v6453_v42 = vld [vmem:[#allocation10 + $0x40] sm:$0xff]   ;;  %5612 = vmatpush3.bf16.msra.mxu0 %v6450_v36  ;;  %v6605_v8 = vmov 1983009808  }
 0x284   :  { %v4174_v10 = vpop.f32.mrf.mxu1  ;;  %v4135_v11 = vpop.f32.mrf.mxu0  ;;  %5613 = vmatprep.subr.bf16.mxu0 %v6453_v42  ;;  %v6456_v7 = vld [vmem:[#allocation10 + $0x80] sm:$0xff]  }
 0x285   :  { %v6857_v12 = vadd.f32 %v4174_v10, %v4134_v27  ;;  %5636 = vmatpush3.bf16.msra.mxu1 %v6456_v7  ;;  %v4427_v27 = vunpack.c.l.s4 %v6605_v8 }
 0x286   :  { %v4176_v37 = vpop.f32.mrf.mxu1  ;;  %v4136_v13 = vpop.f32.mrf.mxu0 }
 0x287   :  { %5614 = vmatpush3.bf16.msra.mxu0 %v6454_v4 }
 0x288   :  { %v4177_v15 = vpop.f32.mrf.mxu1 }
 0x289   :  { %v4428_v15 = vunpack.c.0.s8 %v4427_v27 }
 0x2c0   :  { %v6866_v18 = vpop.f32.mrf.mxu0 }
 0x2c1   :  { %v4214_v30 = vadd.f32 %v6866_v18, %v6855_v9 }
 0x2c2   :  { %v6868_v21 = vpop.f32.mrf.mxu1  ;;  %v6870_v61 = vpop.f32.mrf.mxu0 }
 0x2c3   :  { %v4216_v48 = vadd.f32 %v6870_v61, %v6857_v12  ;;  %v4255_v10 = vadd.f32 %v6868_v21, %v4214_v30  ;;  %v6883_v61 = vsub.s32 %v4428_v15, %v6774_v5 }
 0x2c4   :  { %v6872_v22 = vpop.f32.mrf.mxu1  ;;  %v4217_v20 = vpop.f32.mrf.mxu0 }
 0x2c5   :  { %v4257_v37 = vadd.f32 %v6872_v22, %v4216_v48  ;;  %v4432_v34 = vrot.slane %v4424_v31, %v6883_v61  ;;  %v4397_v31 = vrot.slane %v4389_v50, %v6897_v58 }
 0x2c6   :  { %v4258_v25 = vpop.f32.mrf.mxu1  ;;  %v4218_v24 = vpop.f32.mrf.mxu0 }
 0x2c8   :  { %v4259_v47 = vpop.f32.mrf.mxu1 }
 0x300   :  { %v4295_v11 = vpop.f32.mrf.mxu0 }
 0x301   :  { %v4296_v13 = vadd.f32 %v4295_v11, %v4255_v10 }
 0x302   :  { %v4336_v19 = vpop.f32.mrf.mxu1  ;;  %v4297_v20 = vpop.f32.mrf.mxu0 }
 0x303   :  { %v4337_v25 = vadd.f32 %v4336_v19, %v4296_v13  ;;  %v4298_v24 = vadd.f32 %v4297_v20, %v4257_v37 }
 0x304   :  { %v4338_v9 = vpop.f32.mrf.mxu1  ;;  %v4299_v18 = vpop.f32.mrf.mxu0 }
 0x305   :  { %v4353_v47 = vsel %vm4348_vm1, %v4337_v25, 0.0  ;;  %v4339_v12 = vadd.f32 %v4338_v9, %v4298_v24 }
 0x306   :  { %v4371_v21 = vsel %vm4356_vm2, %v4353_v47, 0.0  ;;  %v4340_v60 = vpop.f32.mrf.mxu1  ;;  %v4300_v29 = vpop.f32.mrf.mxu0 }
 0x307   :  { %v4372_v22 = vrot.slane %v4371_v21, 4  ;;  %v4354_v32 = vsel %vm4348_vm1, %v4339_v12, 0.0 }
 0x308   :  { %v4378_v1 = vsel %vm4356_vm2, %v4354_v32, 0.0  ;;  %v4425_v55 = vcombine.low %v4353_v47, %v4354_v32  ;;  %v4341_v6 = vpop.f32.mrf.mxu1 }
 0x309   :  { %v4373_v38 = vadd.f32 %v4372_v22, %v4371_v21  ;;  %v4379_v51 = vrot.slane %v4378_v1, 4 }
 0x30a   :  { %v4439_v35 = vrot.slane %v4425_v55, %v6883_v61 }
 0x30b   :  { %v4374_v14 = vrot.slane %v4373_v38, 2  ;;  %v4380_v44 = vadd.f32 %v4379_v51, %v4378_v1 }
 0x30c   :  { %v6894_v52 = vcombine.low %v4432_v34, %v4439_v35 }
 0x30d   :  { %v4375_v54 = vadd.f32 %v4374_v14, %v4373_v38  ;;  %v4381_v45 = vrot.slane %v4380_v44, 2 }
 0x30f   :  { %v4376_v56 = vrot.slane %v4375_v54, 1  ;;  %v4382_v49 = vadd.f32 %v4381_v45, %v4380_v44 }
 0x311   :  { %v4383_v43 = vrot.slane %v4382_v49, 1  ;;  %v4377_v59 = vadd.f32 %v4376_v56, %v4375_v54 }
 0x313   :  { %v4384_v23 = vadd.f32 %v4383_v43, %v4382_v49 }
 0x315   :  { %v4390_v33 = vcombine.low %v4377_v59, %v4384_v23 }
 0x317   :  { %v4404_v62 = vrot.slane %v4390_v33, %v6897_v58 }
 0x319   :  { %v4405_v39 = vcombine.low %v4397_v31, %v4404_v62 }
 0x31b   :  { %v4412_v36 = vrot.slane %v4405_v39, %v6897_v58 }
 0x31d   :  { %v4414_v42 = vadd.f32 %v4412_v36, %v4355_v63 }
 0x31f   :  { %4419 = vst.msk [vmem:[#allocation3] sm:$0xf] %vm6860_vm3, %v4414_v42 }
 0x326   :  { %v4446_v2 = vld [vmem:[#allocation3] sm:$0xf] }
 0x327   :  { %v6907_v3 = vmul.f32 0.5, %v4446_v2 }
 0x329   :  { %v4454_v4 = vrot.slane %v6907_v3, %v6777_v16  ;;  %v4458_v28 = vrot.slane %v6907_v3, %v6782_v26  ;;  %v4462_v0 = vrot.slane %v6907_v3, %v6846_v53  ;;  %v4466_v50 = vrot.slane %v6907_v3, %v6849_v40 }
 0x32b   :  { %v4467_v30 = vcombine.low %v4454_v4, %v4458_v28  ;;  %v4468_v7 = vcombine.low %v4462_v0, %v4466_v50 }
 0x32d   :  { %v4475_v17 = vrot.slane %v4467_v30, %v6883_v61  ;;  %v4482_v48 = vrot.slane %v4468_v7, %v6883_v61 }
 0x32f   :  { %v4483_v8 = vcombine.low %v4475_v17, %v4482_v48 }
 0x331   :  { %v4485_v27 = vsub.f32 %v6894_v52, %v4483_v8 }
 0x333   :  { %v4489_v10 = vcombine.high %v4485_v27, %v4485_v27  ;;  %v4496_v11 = vrot.slane %v4485_v27, %v6883_v61 }
 0x335   :  { %v4503_v37 = vrot.slane %v4489_v10, %v6883_v61  ;;  %v4504_v13 = vcombine.high %v4496_v11, %v4496_v11  ;;  %v4510_v15 = vsel %vm4348_vm1, %v4496_v11, 0.0 }
 0x336   :  { %v4514_v19 = vmul.f32 %v4510_v15, %v4510_v15 }
 0x337   :  { %v4505_v20 = vcombine.high %v4503_v37, %v4503_v37  ;;  %v4511_v25 = vsel %vm4348_vm1, %v4504_v13, 0.0  ;;  %v4512_v24 = vsel %vm4348_vm1, %v4503_v37, 0.0  ;;  %v4551_v37 = vld [vmem:[#allocation9 + $0x1] ss:$4 sm:$0xf] }
 0x338   :  { %v4515_v9 = vmul.f32 %v4511_v25, %v4511_v25  ;;  %v4516_v18 = vmul.f32 %v4512_v24, %v4512_v24  ;;  %v4518_v47 = vsel %vm4356_vm2, %v4514_v19, 0.0 }
 0x339   :  { %v4513_v12 = vsel %vm4348_vm1, %v4505_v20, 0.0  ;;  %v4519_v21 = vrot.slane %v4518_v47, 4 }
 0x33a   :  { %v4517_v60 = vmul.f32 %v4513_v12, %v4513_v12  ;;  %v4525_v29 = vsel %vm4356_vm2, %v4515_v9, 0.0  ;;  %v4532_v22 = vsel %vm4356_vm2, %v4516_v18, 0.0  ;;  %v4591_v9 = vld [vmem:[#allocation9 + $0x2] ss:$4 sm:$0xf] }
 0x33b   :  { %v4520_v32 = vadd.f32 %v4519_v21, %v4518_v47  ;;  %v4526_v1 = vrot.slane %v4525_v29, 4  ;;  %v4533_v55 = vrot.slane %v4532_v22, 4 }
 0x33c   :  { %v4539_v6 = vsel %vm4356_vm2, %v4517_v60, 0.0 }
 0x33d   :  { %v4521_v38 = vrot.slane %v4520_v32, 2  ;;  %v4527_v51 = vadd.f32 %v4526_v1, %v4525_v29  ;;  %v4534_v34 = vadd.f32 %v4533_v55, %v4532_v22  ;;  %v4540_v35 = vrot.slane %v4539_v6, 4 }
 0x33f   :  { %v4522_v41 = vadd.f32 %v4521_v38, %v4520_v32  ;;  %v4528_v57 = vrot.slane %v4527_v51, 2  ;;  %v4535_v14 = vrot.slane %v4534_v34, 2  ;;  %v4541_v5 = vadd.f32 %v4540_v35, %v4539_v6 }
 0x341   :  { %v4523_v44 = vrot.slane %v4522_v41, 1  ;;  %v4529_v54 = vadd.f32 %v4528_v57, %v4527_v51  ;;  %v4536_v45 = vadd.f32 %v4535_v14, %v4534_v34  ;;  %v4542_v46 = vrot.slane %v4541_v5, 2 }
 0x343   :  { %v4524_v56 = vadd.f32 %v4523_v44, %v4522_v41  ;;  %v4530_v49 = vrot.slane %v4529_v54, 1  ;;  %v4537_v43 = vrot.slane %v4536_v45, 1  ;;  %v4543_v59 = vadd.f32 %v4542_v46, %v4541_v5 }
 0x345   :  { %v4531_v23 = vadd.f32 %v4530_v49, %v4529_v54  ;;  %v4538_v33 = vadd.f32 %v4537_v43, %v4536_v45  ;;  %v4544_v31 = vrot.slane %v4543_v59, 1  ;;  %v4546_v62 = vmul.f32 0.5, %v4524_v56 }
 0x347   :  { %v4545_v39 = vadd.f32 %v4544_v31, %v4543_v59  ;;  %v4547_v63 = vmul.f32 0.5, %v4531_v23  ;;  %v4548_v36 = vmul.f32 0.5, %v4538_v33  ;;  %v4552_v42 = vadd.f32 1e-05, %v4546_v62 }
 0x349   :  { %v4549_v2 = vmul.f32 0.5, %v4545_v39  ;;  %v4553_v4 = vadd.f32 1e-05, %v4547_v63  ;;  %v4554_v28 = vadd.f32 1e-05, %v4548_v36  ;;  %6457 = vrsqrt.f32 %v4552_v42 }
 0x34b   :  { %v4555_v0 = vadd.f32 1e-05, %v4549_v2  ;;  %6459 = vrsqrt.f32 %v4553_v4 }
 0x34c   :  { %6461 = vrsqrt.f32 %v4554_v28 }
 0x34d   :  { %6463 = vrsqrt.f32 %v4555_v0 }
 0x356   :  { %v6458_v50 = vpop.eup %6457 }
 0x358   :  { %v6460_v30 = vpop.eup %6459 }
 0x359   :  { %v6462_v7 = vpop.eup %6461  ;;  %v4564_v17 = vcombine.low %v6458_v50, %v6460_v30 }
 0x35a   :  { %v6464_v48 = vpop.eup %6463 }
 0x35b   :  { %v4565_v8 = vcombine.low %v6462_v7, %v6464_v48  ;;  %v4572_v27 = vrot.slane %v4564_v17, %v6897_v58 }
 0x35d   :  { %v4579_v10 = vrot.slane %v4565_v8, %v6897_v58 }
 0x35f   :  { %v4580_v11 = vcombine.low %v4572_v27, %v4579_v10 }
 0x361   :  { %v4587_v13 = vrot.slane %v4580_v11, %v6897_v58 }
 0x363   :  { %v4589_v15 = vmul.f32 %v4587_v13, %v4551_v37 }
 0x365   :  { %v4598_v19 = vrot.slane %v4589_v15, %v6777_v16  ;;  %v4602_v20 = vrot.slane %v4589_v15, %v6782_v26  ;;  %v4606_v25 = vrot.slane %v4589_v15, %v6846_v53  ;;  %v4610_v24 = vrot.slane %v4589_v15, %v6849_v40 }
 0x366   :  { %v4592_v18 = vmul.f32 %v4589_v15, %v6907_v3 }
 0x367   :  { %v4611_v47 = vcombine.low %v4598_v19, %v4602_v20  ;;  %v4612_v12 = vcombine.low %v4606_v25, %v4610_v24 }
 0x368   :  { %v4593_v21 = vsub.f32 %v4591_v9, %v4592_v18 }
 0x369   :  { %v4619_v60 = vrot.slane %v4611_v47, %v6883_v61  ;;  %v4626_v29 = vrot.slane %v4612_v12, %v6883_v61 }
 0x36a   :  { %v4634_v58 = vrot.slane %v4593_v21, %v6777_v16  ;;  %v4638_v22 = vrot.slane %v4593_v21, %v6782_v26  ;;  %v4642_v32 = vrot.slane %v4593_v21, %v6846_v53  ;;  %v4646_v1 = vrot.slane %v4593_v21, %v6849_v40 }
 0x36b   :  { %v4627_v55 = vcombine.low %v4619_v60, %v4626_v29 }
 0x36c   :  { %v4647_v6 = vcombine.low %v4634_v58, %v4638_v22  ;;  %v4648_v38 = vcombine.low %v4642_v32, %v4646_v1 }
 0x36d   :  { %v4629_v34 = vmul.f32 %v4627_v55, %v6894_v52  ;;  %v5566_v52 = vld [vmem:[#allocation12] ss:$0 sm:$0xff] }
 0x36e   :  { %v4655_v3 = vrot.slane %v4647_v6, %v6883_v61  ;;  %v4662_v51 = vrot.slane %v4648_v38, %v6883_v61 }
 0x370   :  { %v4663_v35 = vcombine.low %v4655_v3, %v4662_v51 }
 0x372   :  { %v4665_v41 = vadd.f32 %v4663_v35, %v4629_v34 }
 0x374   :  { %v4666_v57 = vmax.f32 %v4665_v41, 0.0 }
 0x376   :  { %v4675_v16 = vrot.slane %v4666_v57, %v6883_v61  ;;  %v4668_v14 = vcombine.high %v4666_v57, %v4666_v57 }
 0x378   :  { %v4683_v26 = vcombine.high %v4675_v16, %v4675_v16  ;;  %v4682_v53 = vrot.slane %v4668_v14, %v6883_v61  ;;  %v4689_v44 = vpack.c.bf16 %v4675_v16, %v4675_v16 }
 0x37a   :  { %v4690_v5 = vpack.c.bf16 %v4683_v26, %v4683_v26  ;;  %v4684_v40 = vcombine.high %v4682_v53, %v4682_v53  ;;  %v4691_v45 = vpack.c.bf16 %v4682_v53, %v4682_v53 }
 0x37c   :  { %4988 = vmatprep.mubr.bf16.mxu0 %v4690_v5  ;;  %v4692_v54 = vpack.c.bf16 %v4684_v40, %v4684_v40 }
 0x37d   :  { %4989 = vmatmul.mubr.bf16.vlgmr.msra.gmra.mxu0 %v4689_v44 }
 0x37e   :  { %5028 = vmatprep.mubr.bf16.mxu1 %v4692_v54 }
 0x37f   :  { %5029 = vmatmul.mubr.bf16.vlgmr.msra.gmra.mxu1 %v4691_v45 }
 0x43d   :  { %v5615_v46 = vpop.f32.mrf.mxu0 }
 0x43f   :  { %v5616_v56 = vpop.f32.mrf.mxu0  ;;  %v5637_v49 = vpop.f32.mrf.mxu1 }
 0x440   :  { %v5617_v43 = vadd.f32 %v5616_v56, %v5615_v46 }
 0x441   :  { %v5618_v59 = vpop.f32.mrf.mxu0  ;;  %v5638_v23 = vpop.f32.mrf.mxu1 }
 0x442   :  { %v4991_v33 = vadd.f32 %v5617_v43, %v5566_v52  ;;  %v5639_v61 = vadd.f32 %v5638_v23, %v5637_v49 }
 0x443   :  { %v5619_v31 = vpop.f32.mrf.mxu0  ;;  %v5640_v62 = vpop.f32.mrf.mxu1 }
 0x444   :  { %v5031_v39 = vadd.f32 %v5639_v61, %v4991_v33 }
 0x445   :  { %v5641_v63 = vpop.f32.mrf.mxu1 }
 0x446   :  { %5036 = vst [vmem:[#allocation13] sm:$0x3] %v5031_v39 }
 0x447   :  { %6577 = shalt.err (!%p6574_p1)
}
 0x448   :  { %5046 = dma.vmem_to_hbm [thread:$0]  %s5044_s4, 32, %s6961_s5, [#allocation6]  }
 0x449   :  { %6592 = dma.done.wait [#allocation6], 32  }
 0x44a   :  { %6593 = vsyncadd [#allocation6], 4294967264 }
 0x44b   :  { %5050 = vsyncpa [#allocation5], 1 }
 0x44c   :  { %5051 = vsyncpa [#allocation8], 1 }
 0x44d   :  { %5052 = vsyncpa [#allocation11], 1 }
 0x44e   :  { %5053 = vsyncpa [#allocation6], 1 }

</bundles_post_ra>
